<compile_context>
chip_gen: v7x
topology: tpu7x:2x2x1
jax: 0.10.0
libtpu: 0.0.40
codegen_flags: <defaults>
</compile_context>

<pallas_src>
import functools

import jax
import jax.numpy as jnp
import numpy as np
from jax.experimental import pallas as pl
from jax.experimental.pallas import tpu as pltpu


def _multihot_to_indices_kernel(mh_ref, idx_ref, cnt_ref, *, pad_value: int):
    tb, Cp = mh_ref.shape
    m = mh_ref[...] != 0                                              # (tb, Cp) bool

    # Per-row counts (also used to mask the pad region).
    count = jnp.sum(m.astype(jnp.int32), axis=-1, keepdims=True)      # (tb, 1)
    cnt_ref[...] = count

    # Exclusive prefix-sum of the mask via one MXU matmul with a strict
    # lower-triangular matrix: rank[b, i] = #set bits in m[b, :i].
    m_f = m.astype(jnp.float32)
    tri = (jax.lax.broadcasted_iota(jnp.int32, (Cp, Cp), 0)
           < jax.lax.broadcasted_iota(jnp.int32, (Cp, Cp), 1)).astype(jnp.float32)
    rank = jnp.dot(m_f, tri, preferred_element_type=jnp.float32).astype(jnp.int32)

    col = jax.lax.broadcasted_iota(jnp.int32, (tb, Cp), 1)            # class id i

    # One-hot scatter (stream compaction), chunked along the output-slot axis
    # to bound the (tb, j_chunk, Cp) intermediate.
    if Cp <= 1024:
        j_chunk = Cp
    else:
        j_chunk = max(c for c in (1024, 512, 256, 128) if Cp % c == 0)

    for j0 in range(0, Cp, j_chunk):
        # hit[b, j, i] = m[b, i] and (rank[b, i] == j0 + j)
        j_ids = j0 + jax.lax.broadcasted_iota(jnp.int32, (tb, j_chunk, Cp), 1)
        hit = (rank[:, None, :] == j_ids) & m[:, None, :]
        vals = jnp.sum(jnp.where(hit, col[:, None, :], 0), axis=-1)   # (tb, j_chunk)
        out_pos = j0 + jax.lax.broadcasted_iota(jnp.int32, (tb, j_chunk), 1)
        vals = jnp.where(out_pos < count, vals, jnp.int32(pad_value))
        idx_ref[:, j0:j0 + j_chunk] = vals


def _multihot_to_indices_dense(multihot_2d: jax.Array, pad_value: int, *, tile_b: int = 8):
    """Device part: (B, C) multihot -> padded indices (B, Cp) + counts (B,)."""
    B, C = multihot_2d.shape
    Bp = tile_b * pl.cdiv(B, tile_b)
    Cp = 128 * pl.cdiv(max(C, 1), 128)

    # Normalize to a lane-dense int32 mask, padded to tile-friendly extents
    # (padded rows/columns are zero -> never selected).
    x = (multihot_2d != 0).astype(jnp.int32)
    x = jnp.pad(x, ((0, Bp - B), (0, Cp - C)))

    kernel = functools.partial(_multihot_to_indices_kernel, pad_value=pad_value)
    idx, counts = pl.pallas_call(
        kernel,
        out_shape=(
            jax.ShapeDtypeStruct((Bp, Cp), jnp.int32),
            jax.ShapeDtypeStruct((Bp, 1), jnp.int32),
        ),
        grid_spec=pltpu.PrefetchScalarGridSpec(
            num_scalar_prefetch=0,
            grid=(Bp // tile_b,),                       # 1-D grid over batch tiles
            in_specs=[pl.BlockSpec((tile_b, Cp), lambda i: (i, 0))],
            out_specs=(
                pl.BlockSpec((tile_b, Cp), lambda i: (i, 0)),
                pl.BlockSpec((tile_b, 1), lambda i: (i, 0)),
            ),
        ),
        compiler_params=pltpu.CompilerParams(
            dimension_semantics=("parallel",),          # shards across TCs on v7x
            vmem_limit_bytes=48 * 1024 * 1024,          # < 64 MiB physical on v7x
        ),
    )(x)
    return idx[:B], counts[:B, 0]


def multihot_to_indices(multihot, *, padding_idx=None):
    """JAX/Pallas counterpart of torchoutil multihot_to_indices."""
    x = jnp.asarray(multihot)
    single = x.ndim == 1
    if single:
        x = x[None, :]
    if x.ndim != 2:
        raise ValueError("multihot_to_indices expects a 1-D or 2-D multihot array")

    pad_value = -1 if padding_idx is None else int(padding_idx)
    idx, counts = _multihot_to_indices_dense(x, pad_value)
    idx = np.asarray(jax.block_until_ready(idx))
    counts = np.asarray(jax.block_until_ready(counts))

    if padding_idx is None:
        out = [idx[b, : int(counts[b])].tolist() for b in range(idx.shape[0])]
    else:
        max_len = int(counts.max()) if counts.size else 0
        out = [idx[b, :max_len].tolist() for b in range(idx.shape[0])]
    return out[0] if single else out


class MultihotToIndices:
    """Minimal JAX/Pallas counterpart of torchoutil.nn.MultihotToIndices."""

    def __init__(self, *, padding_idx=None):
        self.padding_idx = padding_idx

    def __call__(self, multihot):
        return multihot_to_indices(multihot, padding_idx=self.padding_idx)


if __name__ == "__main__":
    key = jax.random.PRNGKey(0)
    B, C = 4, 16
    probs = jax.random.uniform(key, (B, C), dtype=jnp.float32)
    multihot = probs >= 0.5                      # (B, C) bool multihot

    # Host/NumPy reference.
    mh_np = np.asarray(multihot)
    ref = [np.nonzero(mh_np[b])[0].tolist() for b in range(B)]

    # Case 1: no padding -> ragged List[List[int]].
    out = MultihotToIndices()(multihot)
    assert out == ref, (out, ref)

    # Case 2: padding_idx -> each list padded to the max count in the batch.
    pad = -1
    out_pad = MultihotToIndices(padding_idx=pad)(multihot)
    max_len = max(len(r) for r in ref) if ref else 0
    ref_pad = [r + [pad] * (max_len - len(r)) for r in ref]
    assert out_pad == ref_pad, (out_pad, ref_pad)

    # Case 3: 1-D input -> List[int].
    out_1d = MultihotToIndices()(multihot[0])
    assert out_1d == ref[0], (out_1d, ref[0])

    print("KERNEL_OK")
</pallas_src>

<mosaic_0001>
module attributes {stable_mosaic.version = 11 : i64} {
  func.func @_multihot_to_indices_kernel(%arg0: i32, %arg1: memref<8x128xi32, #tpu.memory_space<vmem>>, %arg2: memref<8x128xi32, #tpu.memory_space<vmem>>, %arg3: memref<8x1xi32, #tpu.memory_space<vmem>>) attributes {dimension_semantics = [#tpu.dimension_semantics<parallel>], iteration_bounds = array<i64: 1>, scalar_prefetch = 0 : i64, scratch_operands = 0 : i64, tpu.core_type = #tpu.core_type<tc>, window_params = [{transform_indices = @transform_0, window_bounds = array<i64: 8, 128>}, {transform_indices = @transform_1, window_bounds = array<i64: 8, 128>}, {transform_indices = @transform_2, window_bounds = array<i64: 8, 1>}]} {
    %c0 = arith.constant 0 : index
    %c0_0 = arith.constant 0 : index
    %0 = vector.load %arg1[%c0, %c0_0] : memref<8x128xi32, #tpu.memory_space<vmem>>, vector<8x128xi32>
    %c0_i32 = arith.constant 0 : i32
    %1 = vector.broadcast %c0_i32 : i32 to vector<8x128xi32>
    %2 = arith.cmpi ne, %0, %1 : vector<8x128xi32>
    %3 = arith.extui %2 : vector<8x128xi1> to vector<8x128xi32>
    %cst = arith.constant dense<0> : vector<8xi32>
    %4 = vector.multi_reduction <add>, %3, %cst [1] : vector<8x128xi32> to vector<8xi32>
    %5 = vector.shape_cast %4 : vector<8xi32> to vector<8x1xi32>
    %c0_1 = arith.constant 0 : index
    %c0_2 = arith.constant 0 : index
    %6 = vector.load %arg3[%c0_1, %c0_2] : memref<8x1xi32, #tpu.memory_space<vmem>>, vector<8x1xi32>
    tpu.vector_store %arg3[%c0_1, %c0_2], %5 {strides = array<i32>} : memref<8x1xi32, #tpu.memory_space<vmem>>, vector<8x1xi32>,
    %7 = arith.extui %2 : vector<8x128xi1> to vector<8x128xi32>
    %8 = arith.sitofp %7 : vector<8x128xi32> to vector<8x128xf32>
    %9 = tpu.iota {dimensions = array<i32: 0>} : vector<128x128xi32>
    %10 = tpu.iota {dimensions = array<i32: 1>} : vector<128x128xi32>
    %11 = arith.cmpi slt, %9, %10 : vector<128x128xi32>
    %12 = arith.extui %11 : vector<128x128xi1> to vector<128x128xi32>
    %13 = arith.sitofp %12 : vector<128x128xi32> to vector<128x128xf32>
    %cst_3 = arith.constant dense<0.000000e+00> : vector<8x128xf32>
    %14 = tpu.matmul %8, %13, %cst_3 {dimension_numbers = #tpu.dot_dimension_numbers<[1], [0], [0], [1], [0, 0, 1, 1], [], []>} : vector<8x128xf32>, vector<128x128xf32>, vector<8x128xf32> -> vector<8x128xf32>
    %15 = arith.fptosi %14 : vector<8x128xf32> to vector<8x128xi32>
    %16 = tpu.iota {dimensions = array<i32: 1>} : vector<8x128xi32>
    %17 = tpu.iota {dimensions = array<i32: 1>} : vector<8x128x128xi32>
    %c0_i32_4 = arith.constant 0 : i32
    %18 = vector.broadcast %c0_i32_4 : i32 to vector<8x128x128xi32>
    %19 = arith.addi %18, %17 : vector<8x128x128xi32>
    %20 = vector.shape_cast %15 : vector<8x128xi32> to vector<8x1x128xi32>
    %21 = vector.broadcast %20 : vector<8x1x128xi32> to vector<8x128x128xi32>
    %22 = arith.cmpi eq, %21, %19 : vector<8x128x128xi32>
    %23 = vector.shape_cast %2 : vector<8x128xi1> to vector<8x1x128xi1>
    %24 = vector.broadcast %23 : vector<8x1x128xi1> to vector<8x128x128xi1>
    %25 = arith.andi %22, %24 : vector<8x128x128xi1>
    %26 = vector.shape_cast %16 : vector<8x128xi32> to vector<8x1x128xi32>
    %c0_i32_5 = arith.constant 0 : i32
    %27 = vector.shape_cast %26 : vector<8x1x128xi32> to vector<8x1x128xi32>
    %28 = vector.broadcast %27 : vector<8x1x128xi32> to vector<8x128x128xi32>
    %29 = vector.broadcast %c0_i32_5 : i32 to vector<8x128x128xi32>
    %30 = arith.select %25, %28, %29 : vector<8x128x128xi1>, vector<8x128x128xi32>
    %cst_6 = arith.constant dense<0> : vector<8x128xi32>
    %31 = vector.multi_reduction <add>, %30, %cst_6 [2] : vector<8x128x128xi32> to vector<8x128xi32>
    %32 = tpu.iota {dimensions = array<i32: 1>} : vector<8x128xi32>
    %c0_i32_7 = arith.constant 0 : i32
    %33 = vector.broadcast %c0_i32_7 : i32 to vector<8x128xi32>
    %34 = arith.addi %33, %32 : vector<8x128xi32>
    %35 = vector.broadcast %5 : vector<8x1xi32> to vector<8x128xi32>
    %36 = arith.cmpi slt, %34, %35 : vector<8x128xi32>
    %c-1_i32 = arith.constant -1 : i32
    %37 = vector.broadcast %c-1_i32 : i32 to vector<8x128xi32>
    %38 = arith.select %36, %31, %37 : vector<8x128xi1>, vector<8x128xi32>
    %c0_8 = arith.constant 0 : index
    %c0_9 = arith.constant 0 : index
    %39 = vector.load %arg2[%c0_8, %c0_9] : memref<8x128xi32, #tpu.memory_space<vmem>>, vector<8x128xi32>
    tpu.vector_store %arg2[%c0_8, %c0_9], %38 {strides = array<i32>} : memref<8x128xi32, #tpu.memory_space<vmem>>, vector<8x128xi32>,
    return
  }
  func.func @transform_0(%arg0: i32) -> (i32, i32) {
    %c0_i32 = arith.constant 0 : i32
    %c0_i32_0 = arith.constant 0 : i32
    return %arg0, %c0_i32 : i32, i32
  }
  func.func @transform_1(%arg0: i32) -> (i32, i32) {
    %c0_i32 = arith.constant 0 : i32
    %c0_i32_0 = arith.constant 0 : i32
    return %arg0, %c0_i32 : i32, i32
  }
  func.func @transform_2(%arg0: i32) -> (i32, i32) {
    %c0_i32 = arith.constant 0 : i32
    %c0_i32_0 = arith.constant 0 : i32
    return %arg0, %c0_i32 : i32, i32
  }
}

</mosaic_0001>

<bundles_post_ra>
// kernel: tpu_custom_call.1
= control target key start
LH: loop header
LB: loop body
LE: loop exit
PB: predicated region body
PF: predicated region fallthrough
CT: control target
= control target key end

     0   :  { %8 = vsyncpa [#allocation3], 0  ;;  %s5164_s0 = inlined_call_operand.hbm [shape: s32[8,128], index: 0, kind: input, shape index: {}]   ;;  %s5165_s1 = inlined_call_operand.hbm [shape: s32[8,128], index: 1, kind: output, shape index: {0}]   ;;  %s5166_s2 = inlined_call_operand.vmem [shape: s32[8,1], index: 2, kind: output, shape index: {1}]  }
   0x1   :  { %9 = vsyncpa [#allocation4], 0  ;;  %s3233_s9 = smov [#allocation2]   ;;  %s3185_s13 = scalar_lea.hbm %s5164_s0, 128 }
   0x2   :  { %s16_s10 = sshll.u32 %s3233_s9, 4  ;;  %p3186_p0 = scmp.ne.s32.totalorder %s5164_s0, %s3185_s13  ;;  %s17_s10 = int_to_ptr.vmem [resolvable:$true] %s16_s10 }
   0x3   :  { %p3189_p1 = scmp.lt.u32.totalorder %s3185_s13, %s5164_s0 }
   0x5   :  { %p3191_p2 = pnand %p3189_p1, %p3186_p0 }
   0x7   :  { %3194 = shalt.err (!%p3191_p2)
}
   0x8   :  { %s3195_s18 = scalar_lea.vmem %s17_s10, 128  ;;  %p3200_p4 = scmp.lt.s32.totalorder %s17_s10, %s17_s10 }
   0x9   :  { %p3196_p3 = scmp.ne.s32.totalorder %s17_s10, %s3195_s18  ;;  %p3201_p5 = scmp.lt.s32.totalorder %s3195_s18, %s3195_s18 }
   0xb   :  { %p3202_p6 = por %p3201_p5, %p3200_p4 }
   0xd   :  { %p3203_p7 = pnand %p3202_p6, %p3196_p3 }
   0xf   :  { %3206 = shalt.err (!%p3203_p7)
}
  0x10   :  { %19 = dma.hbm_to_vmem [thread:$0]  %s5164_s0, 128, %s17_s10, [#allocation3]   ;;  %v41_v0 = vlaneseq }
  0x11   :  { %3229 = dma.done.wait [#allocation3], 128  }
  0x12   :  { %3230 = vsyncadd [#allocation3], 4294967168  ;;  %v3234_v1 = vmov 0.0|0.0   ;;  %v3269_v2 = vshrl.u32 %v41_v0, 7  ;;  %v3271_v3 = vand.u32 127, %v41_v0  ;;  %vm3235_vm0 = vmmov 0  }
  0x13   :  { %3150 = vmatprep.subr.bf16.mxu0 %v3234_v1  ;;  %v3236_v4 = vmov 0.0   ;;  %v3237_v10 = vmov 1.0|1.0   ;;  %v23_v21 = vld [vmem:[#allocation2] sm:$0xff]  ;;  %v3238_v22 = vmov 1.0   ;;  %v3240_v27 = vmov 0  }
  0x14   :  { %5236 = vst [vmem:[#allocation8_spill] sm:$0xff] %v3271_v3  ;;  %3147 = vmatprep.mubr.msk.f32.mxu0 %vm3235_vm0, %v3236_v4  ;;  %v3274_v5 = vadd.s32 8, %v3269_v2  ;;  %vm60_vm1 = vcmp.lt.s32.totalorder %v3269_v2, %v3271_v3  ;;  %v3279_v6 = vadd.s32 16, %v3269_v2  ;;  %v3282_v7 = vadd.s32 24, %v3269_v2 }
  0x15   :  { %v3285_v8 = vadd.s32 32, %v3269_v2  ;;  %v3294_v9 = vadd.s32 40, %v3269_v2  ;;  %v3301_v11 = vadd.s32 48, %v3269_v2  ;;  %v3304_v12 = vadd.s32 56, %v3269_v2 }
  0x16   :  { %vm61_vm2 = vcmp.lt.s32.totalorder %v3274_v5, %v3271_v3  ;;  %vm62_vm3 = vcmp.lt.s32.totalorder %v3279_v6, %v3271_v3  ;;  %vm63_vm4 = vcmp.lt.s32.totalorder %v3282_v7, %v3271_v3  ;;  %v3311_v13 = vadd.s32 64, %v3269_v2 }
  0x17   :  { %vm3151_vm5 = vmpackc.low %vm61_vm2, %vm60_vm1  ;;  %vm64_vm7 = vcmp.lt.s32.totalorder %v3285_v8, %v3271_v3  ;;  %vm65_vm8 = vcmp.lt.s32.totalorder %v3294_v9, %v3271_v3  ;;  %vm66_vm10 = vcmp.lt.s32.totalorder %v3301_v11, %v3271_v3  ;;  %vm67_vm11 = vcmp.lt.s32.totalorder %v3304_v12, %v3271_v3 }
  0x18   :  { %3152 = vmatpush3.bf16.msk.msra.mxu0 %vm3151_vm5, %v3237_v10  ;;  %vm3154_vm6 = vmpackc.low %vm63_vm4, %vm62_vm3  ;;  %v3314_v14 = vadd.s32 72, %v3269_v2  ;;  %vm68_vm13 = vcmp.lt.s32.totalorder %v3311_v13, %v3271_v3  ;;  %v3321_v15 = vadd.s32 80, %v3269_v2  ;;  %v3324_v16 = vadd.s32 88, %v3269_v2 }
  0x19   :  { %3153 = vmatprep.subr.bf16.mxu0 %v3234_v1  ;;  %vm3157_vm9 = vmpackc.low %vm65_vm8, %vm64_vm7  ;;  %v3331_v17 = vadd.s32 96, %v3269_v2  ;;  %v3334_v18 = vadd.s32 104, %v3269_v2  ;;  %v3341_v19 = vadd.s32 112, %v3269_v2  ;;  %v3344_v20 = vadd.s32 120, %v3269_v2 }
  0x1a   :  { %vm3160_vm12 = vmpackc.low %vm67_vm11, %vm66_vm10  ;;  %vm69_vm14 = vcmp.lt.s32.totalorder %v3314_v14, %v3271_v3  ;;  %5237 = vst [vmem:[#allocation9_spill] sm:$0xff] %v3321_v15  ;;  %vm70_vm0 = vcmp.lt.s32.totalorder %v3321_v15, %v3271_v3  ;;  %vm71_vm1 = vcmp.lt.s32.totalorder %v3324_v16, %v3271_v3  ;;  %v3239_v23 = vmov 1966171168  }
  0x1b   :  { %vm3163_vm15 = vmpackc.low %vm69_vm14, %vm68_vm13  ;;  %vm72_vm3 = vcmp.lt.s32.totalorder %v3331_v17, %v3271_v3  ;;  %vm73_vm4 = vcmp.lt.s32.totalorder %v3334_v18, %v3271_v3  ;;  %5238 = vst [vmem:[#allocation10_spill] sm:$0xff] %v3341_v19  ;;  %vm75_vm7 = vcmp.lt.s32.totalorder %v3344_v20, %v3271_v3  ;;  %v181_v24 = vunpack.c.l.s4 %v3239_v23 }
  0x1c   :  { %3155 = vmatpush3.bf16.msk.msra.mxu0 %vm3154_vm6, %v3237_v10  ;;  %vm3166_vm2 = vmpackc.low %vm71_vm1, %vm70_vm0  ;;  %5239 = vst [vmem:[#allocation11_spill] sm:$0xff] %v3344_v20  ;;  %vm74_vm6 = vcmp.lt.s32.totalorder %v3341_v19, %v3271_v3  ;;  %v3374_v57 = vsub.s32 0, %v3269_v2 }
  0x1d   :  { %3156 = vmatprep.subr.bf16.mxu0 %v3234_v1  ;;  %vm3169_vm5 = vmpackc.low %vm73_vm4, %vm72_vm3  ;;  %v182_v25 = vunpack.c.0.s8 %v181_v24 }
  0x1e   :  { %vm3172_vm8 = vmpackc.low %vm75_vm7, %vm74_vm6 }
  0x1f   :  { %v3351_v26 = vsub.s32 %v182_v25, %v3269_v2 }
  0x20   :  { %3158 = vmatpush3.bf16.msk.msra.mxu0 %vm3157_vm9, %v3237_v10  ;;  %vm24_vm9 = vcmp.ne.s32.totalorder %v23_v21, 0 }
  0x21   :  { %3159 = vmatprep.subr.bf16.mxu0 %v3234_v1  ;;  %v25_v28 = vsel %vm24_vm9, 1, %v3240_v27  ;;  %v3378_v58 = vrot.slane %v3271_v3, %v3351_v26 }
  0x22   :  { %v388_v29 = vcombine.high %v25_v28, %v25_v28  ;;  %v395_v30 = vrot.slane %v25_v28, %v3351_v26  ;;  %v26_v34 = vand.u32 65535, %v25_v28  ;;  %v27_v52 = vshrl.u32 %v25_v28, 16 }
  0x23   :  { %v3387_v62 = vrot.slane %v3378_v58, %v3351_v26 }
  0x24   :  { %3161 = vmatpush3.bf16.msk.msra.mxu0 %vm3160_vm12, %v3237_v10  ;;  %v402_v31 = vrot.slane %v388_v29, %v3351_v26  ;;  %v403_v32 = vcombine.high %v395_v30, %v395_v30  ;;  %v411_v33 = vrot.slane %v395_v30, %v3351_v26  ;;  %v28_v39 = vcvt.s32.f32 %v26_v34 }
  0x25   :  { %3162 = vmatprep.subr.bf16.mxu0 %v3234_v1  ;;  %v29_v53 = vcvt.s32.f32 %v27_v52  ;;  %v3402_v4 = vrot.slane %v3387_v62, %v3374_v57  ;;  %v5284_v52 = vmov 0 }
  0x26   :  { %v404_v35 = vcombine.high %v402_v31, %v402_v31  ;;  %v418_v36 = vrot.slane %v402_v31, %v3351_v26  ;;  %v425_v37 = vrot.slane %v403_v32, %v3351_v26  ;;  %v433_v38 = vcombine.high %v411_v33, %v411_v33  ;;  %30 = vadd.xlane.f32.xlu0 %v28_v39 }
  0x27   :  { %vm437_vm10 = vcmp.ne.s32.totalorder %v411_v33, 0 }
  0x28   :  { %3164 = vmatpush3.bf16.msk.msra.mxu0 %vm3163_vm15, %v3237_v10  ;;  %v432_v40 = vrot.slane %v404_v35, %v3351_v26  ;;  %v434_v41 = vcombine.high %v418_v36, %v418_v36  ;;  %v435_v42 = vcombine.high %v425_v37, %v425_v37  ;;  %vm438_vm11 = vcmp.ne.s32.totalorder %v425_v37, 0 }
  0x29   :  { %3165 = vmatprep.subr.bf16.mxu0 %v3234_v1  ;;  %vm439_vm12 = vcmp.ne.s32.totalorder %v433_v38, 0  ;;  %vm441_vm13 = vcmp.ne.s32.totalorder %v418_v36, 0  ;;  %v445_v43 = vsel %vm437_vm10, 1, %v3240_v27  ;;  %v3359_v44 = vsel %vm438_vm11, 1, %v3240_v27 }
  0x2a   :  { %v436_v45 = vcombine.high %v432_v40, %v432_v40  ;;  %vm440_vm14 = vcmp.ne.s32.totalorder %v435_v42, 0  ;;  %vm442_vm15 = vcmp.ne.s32.totalorder %v432_v40, 0  ;;  %vm443_vm0 = vcmp.ne.s32.totalorder %v434_v41, 0  ;;  %32 = vadd.xlane.f32.xlu0 %v29_v53 }
  0x2b   :  { %v3361_v46 = vsel %vm439_vm12, 1, %v3240_v27  ;;  %v3363_v47 = vsel %vm440_vm14, 1, %v3240_v27  ;;  %v3365_v48 = vsel %vm441_vm13, 1, %v3240_v27  ;;  %v3367_v49 = vsel %vm442_vm15, 1, %v3240_v27 }
  0x2c   :  { %3167 = vmatpush3.bf16.msk.msra.mxu0 %vm3166_vm2, %v3237_v10  ;;  %vm444_vm1 = vcmp.ne.s32.totalorder %v436_v45, 0  ;;  %v3369_v50 = vsel %vm443_vm0, 1, %v3240_v27  ;;  %v456_v61 = vrot.slane %v445_v43, %v3374_v57 }
  0x2d   :  { %3168 = vmatprep.subr.bf16.mxu0 %v3234_v1  ;;  %5240 = vst [vmem:[#allocation12_spill] sm:$0xff] %v3369_v50  ;;  %v3371_v51 = vsel %vm444_vm1, 1, %v3240_v27 }
  0x2e   :  { %5241 = vst [vmem:[#allocation13_spill] sm:$0xff] %v3371_v51  ;;  %vm3396_vm2 = vcmp.eq.s32.totalorder %v456_v61, 1  ;;  %v460_v61 = vrot.slane %v3359_v44, %v3374_v57  ;;  %v5300_v44 = vmov 0 }
  0x30   :  { %3170 = vmatpush3.bf16.msk.msra.mxu0 %vm3169_vm5, %v3237_v10 }
  0x31   :  { %3171 = vmatprep.subr.bf16.mxu0 %v3234_v1 }
  0x34   :  { %3173 = vmatpush3.bf16.msk.msra.mxu0 %vm3172_vm8, %v3237_v10 }
  0x37   :  { %3148 = vmatmul.mubr.msk.f32.vlgmr.msra.gmra.mrb[0].mxu0 %vm24_vm9, %v3238_v22 }
 0x10a   :  { %v174_v54 = vpop.f32.mrb[0].mxu0 }
 0x10b   :  { %v3174_v55 = vtrunc.f32 %v174_v54  ;;  %v3149_v56 = vpop.f32.mrb[1].mxu0 }
 0x10d   :  { %v3380_v59 = vcvt.f32.s32 %v3174_v55 }
 0x10f   :  { %v186_v60 = vrot.slane %v3380_v59, %v3351_v26 }
 0x111   :  { %v3390_v63 = vrot.slane %v186_v60, %v3351_v26  ;;  %v194_v33 = vcombine.high %v186_v60, %v186_v60 }
 0x113   :  { %v3394_v0 = vrot.slane %v3390_v63, %v3374_v57  ;;  %v3472_v42 = vrot.slane %v194_v33, %v3351_v26  ;;  %v224_v55 = vcombine.high %v3390_v63, %v3390_v63  ;;  %v5290_v63 = vmov 0 }
 0x115   :  { %vm260_vm3 = vcmp.eq.s32.totalorder %v3394_v0, %v3269_v2  ;;  %vm261_vm4 = vcmp.eq.s32.totalorder %v3394_v0, %v3274_v5  ;;  %vm262_vm7 = vcmp.eq.s32.totalorder %v3394_v0, %v3279_v6  ;;  %vm263_vm8 = vcmp.eq.s32.totalorder %v3394_v0, %v3282_v7 }
 0x116   :  { %vm493_vm5 = vmand %vm260_vm3, %vm3396_vm2  ;;  %vm264_vm9 = vcmp.eq.s32.totalorder %v3394_v0, %v3285_v8  ;;  %vm265_vm12 = vcmp.eq.s32.totalorder %v3394_v0, %v3294_v9  ;;  %vm266_vm15 = vcmp.eq.s32.totalorder %v3394_v0, %v3301_v11  ;;  %vm267_vm1 = vcmp.eq.s32.totalorder %v3394_v0, %v3304_v12 }
 0x117   :  { %v702_v10 = vsel %vm493_vm5, %v3402_v4, 0  ;;  %vm494_vm6 = vmand %vm261_vm4, %vm3396_vm2  ;;  %vm268_vm3 = vcmp.eq.s32.totalorder %v3394_v0, %v3311_v13  ;;  %vm269_vm5 = vcmp.eq.s32.totalorder %v3394_v0, %v3314_v14 }
 0x118   :  { %v830_v21 = vand.u32 65535, %v702_v10  ;;  %v703_v22 = vsel %vm494_vm6, %v3402_v4, 0  ;;  %vm495_vm10 = vmand %vm262_vm7, %vm3396_vm2  ;;  %v831_v27 = vshrl.u32 %v702_v10, 16  ;;  %vm270_vm7 = vcmp.eq.s32.totalorder %v3394_v0, %v3321_v15 }
 0x119   :  { %v842_v23 = vand.u32 65535, %v703_v22  ;;  %v704_v24 = vsel %vm495_vm10, %v3402_v4, 0  ;;  %vm496_vm11 = vmand %vm263_vm8, %vm3396_vm2  ;;  %v843_v35 = vshrl.u32 %v703_v22, 16  ;;  %v3501_v10 = vrot.slane %v3472_v42, %v3374_v57 }
 0x11a   :  { %v832_v25 = vcvt.s32.f32 %v830_v21  ;;  %vm3429_vm13 = vmand %vm264_vm9, %vm3396_vm2  ;;  %v854_v30 = vand.u32 65535, %v704_v24  ;;  %v705_v32 = vsel %vm496_vm11, %v3402_v4, 0  ;;  %v833_v34 = vcvt.s32.f32 %v831_v27 }
 0x11b   :  { %v844_v29 = vcvt.s32.f32 %v842_v23  ;;  %vm3435_vm14 = vmand %vm265_vm12, %vm3396_vm2  ;;  %v866_v37 = vand.u32 65535, %v705_v32  ;;  %v706_v39 = vsel %vm3429_vm13, %v3402_v4, 0  ;;  %v845_v43 = vcvt.s32.f32 %v843_v35 }
 0x11c   :  { %834 = vadd.xlane.f32.xlu1 %v832_v25  ;;  %v856_v36 = vcvt.s32.f32 %v854_v30  ;;  %vm3444_vm0 = vmand %vm266_vm15, %vm3396_vm2  ;;  %v855_v45 = vshrl.u32 %v704_v24, 16  ;;  %vm271_vm9 = vcmp.eq.s32.totalorder %v3394_v0, %v3324_v16  ;;  %v878_v54 = vand.u32 65535, %v706_v39 }
 0x11d   :  { %846 = vadd.xlane.f32.xlu0 %v844_v29  ;;  %vm3457_vm4 = vmand %vm267_vm1, %vm3396_vm2  ;;  %v868_v53 = vcvt.s32.f32 %v866_v37  ;;  %v707_v56 = vsel %vm3435_vm14, %v3402_v4, 0  ;;  %v867_v22 = vshrl.u32 %v705_v32, 16  ;;  %vm272_vm12 = vcmp.eq.s32.totalorder %v3394_v0, %v3331_v17 }
 0x11e   :  { %vm3465_vm6 = vmand %vm268_vm3, %vm3396_vm2  ;;  %v857_v21 = vcvt.s32.f32 %v855_v45  ;;  %v880_v23 = vcvt.s32.f32 %v878_v54  ;;  %v890_v24 = vand.u32 65535, %v707_v56  ;;  %v708_v25 = vsel %vm3444_vm0, %v3402_v4, 0 }
 0x11f   :  { %vm3476_vm8 = vmand %vm269_vm5, %vm3396_vm2  ;;  %vm273_vm14 = vcmp.eq.s32.totalorder %v3394_v0, %v3334_v18  ;;  %vm274_vm15 = vcmp.eq.s32.totalorder %v3394_v0, %v3341_v19  ;;  %vm3518_vm1 = vcmp.eq.s32.totalorder %v460_v61, 1  ;;  %vm275_vm3 = vcmp.eq.s32.totalorder %v3394_v0, %v3344_v20 }
 0x120   :  { %836 = vadd.xlane.f32.xlu1 %v833_v34  ;;  %vm3484_vm10 = vmand %vm270_vm7, %vm3396_vm2  ;;  %v869_v29 = vcvt.s32.f32 %v867_v22  ;;  %v879_v30 = vshrl.u32 %v706_v39, 16  ;;  %vm276_vm7 = vcmp.eq.s32.totalorder %v3501_v10, %v3269_v2  ;;  %v892_v32 = vcvt.s32.f32 %v890_v24 }
 0x121   :  { %858 = vadd.xlane.f32.xlu0 %v856_v36  ;;  %vm3493_vm11 = vmand %vm271_vm9, %vm3396_vm2  ;;  %v902_v33 = vand.u32 65535, %v708_v25  ;;  %v709_v0 = vsel %vm3457_vm4, %v3402_v4, 0  ;;  %v891_v37 = vshrl.u32 %v707_v56, 16  ;;  %v710_v40 = vsel %vm3465_vm6, %v3402_v4, 0 }
 0x122   :  { %vm3510_vm13 = vmand %vm272_vm12, %vm3396_vm2  ;;  %vm277_vm12 = vcmp.eq.s32.totalorder %v3501_v10, %v3274_v5  ;;  %v881_v36 = vcvt.s32.f32 %v879_v30  ;;  %v914_v39 = vand.u32 65535, %v709_v0  ;;  %vm278_vm4 = vcmp.eq.s32.totalorder %v3501_v10, %v3279_v6 }
 0x123   :  { %vm3524_vm0 = vmand %vm273_vm14, %vm3396_vm2  ;;  %v904_v38 = vcvt.s32.f32 %v902_v33  ;;  %v893_v45 = vcvt.s32.f32 %v891_v37  ;;  %v926_v56 = vand.u32 65535, %v710_v40  ;;  %v5278_v61 = vmov 0 }
 0x124   :  { %848 = vadd.xlane.f32.xlu1 %v845_v43  ;;  %vm3532_vm5 = vmand %vm274_vm15, %vm3396_vm2  ;;  %v5274_v43 = vmov 0  ;;  %v916_v54 = vcvt.s32.f32 %v914_v39  ;;  %v5288_v39 = vmov 0 }
 0x125   :  { %870 = vadd.xlane.f32.xlu0 %v868_v53  ;;  %vm3540_vm9 = vmand %vm275_vm3, %vm3396_vm2  ;;  %vm279_vm3 = vcmp.eq.s32.totalorder %v3501_v10, %v3282_v7  ;;  %v903_v53 = vshrl.u32 %v708_v25, 16  ;;  %v915_v25 = vshrl.u32 %v709_v0, 16  ;;  %v5286_v0 = vmov 0 }
 0x126   :  { %vm3551_vm14 = vmand %vm276_vm7, %vm3518_vm1  ;;  %vm280_vm7 = vcmp.eq.s32.totalorder %v3501_v10, %v3285_v8 }
 0x127   :  { %vm3557_vm2 = vmand %vm277_vm12, %vm3518_vm1  ;;  %vm281_vm12 = vcmp.eq.s32.totalorder %v3501_v10, %v3294_v9  ;;  %v905_v24 = vcvt.s32.f32 %v903_v53  ;;  %v917_v33 = vcvt.s32.f32 %v915_v25  ;;  %v5292_v53 = vmov 0 }
 0x128   :  { %860 = vadd.xlane.f32.xlu1 %v857_v21  ;;  %vm3568_vm15 = vmand %vm278_vm4, %vm3518_vm1  ;;  %v711_v21 = vsel %vm3476_vm8, %v3402_v4, 0 }
 0x129   :  { %882 = vadd.xlane.f32.xlu0 %v880_v23  ;;  %v5275_v43 = vsel %vm3568_vm15, 4294967295, %v5274_v43  ;;  %vm3578_vm6 = vmand %vm279_vm3, %vm3518_vm1  ;;  %vm282_vm15 = vcmp.eq.s32.totalorder %v3501_v10, %v3301_v11  ;;  %v938_v30 = vand.u32 65535, %v711_v21 }
 0x12a   :  { %vm3586_vm4 = vmand %vm280_vm7, %vm3518_vm1  ;;  %vm283_vm7 = vcmp.eq.s32.totalorder %v3501_v10, %v3304_v12 }
 0x12b   :  { %v5279_v61 = vsel %vm3586_vm4, 4294967295, %v5278_v61  ;;  %vm3597_vm3 = vmand %vm281_vm12, %vm3518_vm1  ;;  %v940_v37 = vcvt.s32.f32 %v938_v30  ;;  %v5296_v30 = vmov 0 }
 0x12c   :  { %872 = vadd.xlane.f32.xlu1 %v869_v29  ;;  %vm3605_vm4 = vmand %vm282_vm15, %vm3518_vm1  ;;  %v928_v29 = vcvt.s32.f32 %v926_v56  ;;  %vm284_vm15 = vcmp.eq.s32.totalorder %v3501_v10, %v3311_v13  ;;  %v5294_v56 = vmov 0 }
 0x12d   :  { %894 = vadd.xlane.f32.xlu0 %v892_v32  ;;  %vm3611_vm8 = vmand %vm283_vm7, %vm3518_vm1  ;;  %v712_v32 = vsel %vm3484_vm10, %v3402_v4, 0  ;;  %vm285_vm7 = vcmp.eq.s32.totalorder %v3501_v10, %v3314_v14 }
 0x12e   :  { %v5285_v52 = vsel %vm3611_vm8, 4294967295, %v5284_v52  ;;  %vm3622_vm12 = vmand %vm284_vm15, %vm3518_vm1  ;;  %vm286_vm8 = vcmp.eq.s32.totalorder %v3501_v10, %v3321_v15  ;;  %vm287_vm15 = vcmp.eq.s32.totalorder %v3501_v10, %v3324_v16 }
 0x12f   :  { %v5287_v0 = vsel %vm3622_vm12, 4294967295, %v5286_v0  ;;  %vm3634_vm10 = vmand %vm285_vm7, %vm3518_vm1  ;;  %vm288_vm7 = vcmp.eq.s32.totalorder %v3501_v10, %v3331_v17 }
 0x130   :  { %884 = vadd.xlane.f32.xlu1 %v881_v36  ;;  %v927_v36 = vshrl.u32 %v710_v40, 16  ;;  %v5289_v39 = vsel %vm3634_vm10, 4294967295, %v5288_v39  ;;  %v713_v40 = vsel %vm3493_vm11, %v3402_v4, 0  ;;  %vm3645_vm12 = vmand %vm286_vm8, %vm3518_vm1  ;;  %vm289_vm11 = vcmp.eq.s32.totalorder %v3501_v10, %v3334_v18 }
 0x131   :  { %906 = vadd.xlane.f32.xlu0 %v904_v38  ;;  %v950_v38 = vand.u32 65535, %v712_v32  ;;  %v5291_v63 = vsel %vm3645_vm12, 4294967295, %v5290_v63  ;;  %vm3655_vm10 = vmand %vm287_vm15, %vm3518_vm1  ;;  %v963_v28 = vshrl.u32 %v713_v40, 16 }
 0x132   :  { %v5293_v53 = vsel %vm3655_vm10, 4294967295, %v5292_v53  ;;  %v929_v60 = vcvt.s32.f32 %v927_v36  ;;  %vm3663_vm8 = vmand %vm288_vm7, %vm3518_vm1  ;;  %v951_v36 = vshrl.u32 %v712_v32, 16  ;;  %v715_v32 = vsel %vm3524_vm0, %v3402_v4, 0 }
 0x133   :  { %v5295_v56 = vsel %vm3663_vm8, 4294967295, %v5294_v56  ;;  %v952_v25 = vcvt.s32.f32 %v950_v38  ;;  %vm3674_vm15 = vmand %vm289_vm11, %vm3518_vm1  ;;  %vm290_vm8 = vcmp.eq.s32.totalorder %v3501_v10, %v3341_v19  ;;  %v965_v31 = vcvt.s32.f32 %v963_v28 }
 0x134   :  { %896 = vadd.xlane.f32.xlu1 %v893_v45  ;;  %v464_v45 = vrot.slane %v3361_v46, %v3374_v57  ;;  %v666_v46 = vcombine.high %v3387_v62, %v3387_v62  ;;  %v5297_v30 = vsel %vm3674_vm15, 4294967295, %v5296_v30  ;;  %vm3692_vm11 = vmand %vm290_vm8, %vm3518_vm1 }
 0x135   :  { %918 = vadd.xlane.f32.xlu0 %v916_v54  ;;  %v939_v54 = vshrl.u32 %v711_v21, 16  ;;  %v714_v21 = vsel %vm3510_vm13, %v3402_v4, 0  ;;  %v5301_v44 = vsel %vm3692_vm11, 4294967295, %v5300_v44  ;;  %vm291_vm13 = vcmp.eq.s32.totalorder %v3501_v10, %v3344_v20 }
 0x136   :  { %vm3681_vm7 = vcmp.eq.s32.totalorder %v464_v45, 1  ;;  %v636_v45 = vcombine.high %v3378_v58, %v3378_v58  ;;  %vm3707_vm8 = vmand %vm291_vm13, %vm3518_vm1  ;;  %v953_v10 = vcvt.s32.f32 %v951_v36  ;;  %vm38_vm13 = vcmask 7168  }
 0x137   :  { %v941_v62 = vcvt.s32.f32 %v939_v54 }
 0x138   :  { %908 = vadd.xlane.f32.xlu1 %v905_v24  ;;  %v3670_v24 = vrot.slane %v224_v55, %v3374_v57  ;;  %v3688_v55 = vrot.slane %v666_v46, %v3374_v57  ;;  %v986_v46 = vand.u32 65535, %v715_v32 }
 0x139   :  { %930 = vadd.xlane.f32.xlu0 %v928_v29  ;;  %v962_v29 = vand.u32 65535, %v713_v40  ;;  %v3731_v40 = vrot.slane %v636_v45, %v3351_v26 }
 0x13a   :  { %vm292_vm15 = vcmp.eq.s32.totalorder %v3670_v24, %v3269_v2  ;;  %vm293_vm11 = vcmp.eq.s32.totalorder %v3670_v24, %v3274_v5  ;;  %vm294_vm12 = vcmp.eq.s32.totalorder %v3670_v24, %v3279_v6  ;;  %v988_v50 = vcvt.s32.f32 %v986_v46 }
 0x13b   :  { %v964_v38 = vcvt.s32.f32 %v962_v29  ;;  %vm525_vm10 = vmand %vm292_vm15, %vm3681_vm7 }
 0x13c   :  { %920 = vadd.xlane.f32.xlu1 %v917_v33  ;;  %v3718_v58 = vsel %vm525_vm10, %v3688_v55, 0  ;;  %vm526_vm1 = vmand %vm293_vm11, %vm3681_vm7  ;;  %vm295_vm10 = vcmp.eq.s32.totalorder %v3670_v24, %v3282_v7  ;;  %vm297_vm11 = vcmp.eq.s32.totalorder %v3670_v24, %v3294_v9 }
 0x13d   :  { %942 = vadd.xlane.f32.xlu0 %v940_v37  ;;  %v31_v37 = vpop.xlane.xlu0 %30  ;;  %v3726_v29 = vsel %vm526_vm1, %v3688_v55, 0  ;;  %vm527_vm0 = vmand %vm294_vm12, %vm3681_vm7  ;;  %vm296_vm12 = vcmp.eq.s32.totalorder %v3670_v24, %v3285_v8  ;;  %vm298_vm1 = vcmp.eq.s32.totalorder %v3670_v24, %v3301_v11 }
 0x13e   :  { %v3734_v36 = vsel %vm527_vm0, %v3688_v55, 0  ;;  %v34_v51 = vcvt.f32.s32 %v31_v37  ;;  %vm529_vm15 = vmand %vm296_vm12, %vm3681_vm7 }
 0x13f   :  { %5304 = vst [vmem:[#allocation14_spill] sm:$0xff] %v3734_v36  ;;  %v3748_v36 = vrot.slane %v3731_v40, %v3374_v57  ;;  %vm531_vm0 = vmand %vm298_vm1, %vm3681_vm7  ;;  %vm303_vm1 = vcmp.eq.s32.totalorder %v3670_v24, %v3324_v16 }
 0x140   :  { %932 = vadd.xlane.f32.xlu1 %v929_v60  ;;  %v974_v60 = vand.u32 65535, %v714_v21 }
 0x141   :  { %954 = vadd.xlane.f32.xlu0 %v952_v25  ;;  %v716_v25 = vsel %vm3532_vm5, %v3402_v4, 0  ;;  %vm528_vm5 = vmand %vm295_vm10, %vm3681_vm7  ;;  %vm299_vm10 = vcmp.eq.s32.totalorder %v3670_v24, %v3304_v12  ;;  %v719_v35 = vsel %vm3557_vm2, %v3748_v36, 0  ;;  %vm301_vm2 = vcmp.eq.s32.totalorder %v3670_v24, %v3314_v14 }
 0x142   :  { %v976_v27 = vcvt.s32.f32 %v974_v60  ;;  %v998_v60 = vand.u32 65535, %v716_v25  ;;  %v724_v33 = vsel %vm3605_vm4, %v3748_v36, 0 }
 0x144   :  { %944 = vadd.xlane.f32.xlu1 %v941_v62  ;;  %v33_v62 = vpop.xlane.xlu0 %32 }
 0x145   :  { %966 = vadd.xlane.f32.xlu0 %v964_v38  ;;  %v975_v38 = vshrl.u32 %v714_v21, 16  ;;  %v35_v45 = vcvt.f32.s32 %v33_v62  ;;  %v987_v21 = vshrl.u32 %v715_v32, 16  ;;  %v718_v62 = vsel %vm3551_vm14, %v3748_v36, 0 }
 0x146   :  { %vm300_vm14 = vcmp.eq.s32.totalorder %v3670_v24, %v3311_v13 }
 0x147   :  { %v36_v28 = vshll.u32 %v35_v45, 16  ;;  %v977_v37 = vcvt.s32.f32 %v975_v38  ;;  %v999_v38 = vshrl.u32 %v716_v25, 16  ;;  %v1022_v45 = vand.u32 65535, %v718_v62  ;;  %vm533_vm12 = vmand %vm300_vm14, %vm3681_vm7 }
 0x148   :  { %956 = vadd.xlane.f32.xlu1 %v953_v10  ;;  %v3741_v10 = vsel %vm528_vm5, %v3688_v55, 0  ;;  %vm532_vm5 = vmand %vm299_vm10, %vm3681_vm7  ;;  %v179_v25 = vcombine.high %v3380_v59, %v3380_v59  ;;  %vm304_vm10 = vcmp.eq.s32.totalorder %v3670_v24, %v3331_v17  ;;  %vm5310_vm14 = vnez %v5279_v61 }
 0x149   :  { %978 = vadd.xlane.f32.xlu0 %v976_v27  ;;  %v717_v27 = vsel %vm3540_vm9, %v3402_v4, 0  ;;  %v3757_v4 = vsel %vm529_vm15, %v3688_v55, 0  ;;  %vm530_vm9 = vmand %vm297_vm11, %vm3681_vm7  ;;  %v3763_v32 = vadd.s32 %v36_v28, %v34_v51  ;;  %v989_v51 = vcvt.s32.f32 %v987_v21 }
 0x14a   :  { %v1010_v34 = vand.u32 65535, %v717_v27  ;;  %v3766_v46 = vsel %vm530_vm9, %v3688_v55, 0  ;;  %v3788_v28 = vsel %vm532_vm5, %v3688_v55, 0  ;;  %v1001_v21 = vcvt.s32.f32 %v999_v38  ;;  %vm534_vm15 = vmand %vm301_vm2, %vm3681_vm7 }
 0x14b   :  { %5305 = vst [vmem:[#allocation15_spill] sm:$0xff] %v3763_v32  ;;  %39 = vst.msk [vmem:[%s5166_s2] sm:$0xff] %vm38_vm13, %v3763_v32  ;;  %v1024_v1 = vcvt.s32.f32 %v1022_v45  ;;  %vm5306_vm11 = vnez %v5275_v43  ;;  %vm302_vm13 = vcmp.eq.s32.totalorder %v3670_v24, %v3321_v15  ;;  %vm306_vm2 = vcmp.eq.s32.totalorder %v3670_v24, %v3341_v19  ;;  %s3241_s2 = smov [#allocation5]  }
 0x14c   :  { %968 = vadd.xlane.f32.xlu1 %v965_v31  ;;  %v3774_v31 = vsel %vm531_vm0, %v3688_v55, 0  ;;  %v720_v59 = vsel %vm5306_vm11, %v3748_v36, 0  ;;  %vm535_vm9 = vmand %vm302_vm13, %vm3681_vm7  ;;  %vm307_vm11 = vcmp.eq.s32.totalorder %v3670_v24, %v3344_v20  ;;  %s3051_s22 = sshll.u32 %s3241_s2, 4  ;;  %s3052_s22 = int_to_ptr.vmem [resolvable:$true] %s3051_s22 }
 0x14d   :  { %990 = vadd.xlane.f32.xlu0 %v988_v50  ;;  %v1000_v50 = vcvt.s32.f32 %v998_v60  ;;  %v1012_v60 = vcvt.s32.f32 %v1010_v34  ;;  %v1034_v34 = vand.u32 65535, %v719_v35  ;;  %v3817_v45 = vsel %vm535_vm9, %v3688_v55, 0  ;;  %vm536_vm0 = vmand %vm303_vm1, %vm3681_vm7  ;;  %s3207_s23 = scalar_lea.vmem %s3052_s22, 128  ;;  %p3212_p9 = scmp.lt.s32.totalorder %s3052_s22, %s3052_s22 }
 0x14e   :  { %vm537_vm5 = vmand %vm304_vm10, %vm3681_vm7  ;;  %vm5317_vm10 = vnez %v5285_v52  ;;  %p3208_p8 = scmp.ne.s32.totalorder %s3052_s22, %s3207_s23  ;;  %p3213_p10 = scmp.lt.s32.totalorder %s3207_s23, %s3207_s23 }
 0x14f   :  { %v1036_v43 = vcvt.s32.f32 %v1034_v34  ;;  %v1035_v34 = vshrl.u32 %v719_v35, 16  ;;  %v3838_v41 = vsel %vm537_vm5, %v3688_v55, 0  ;;  %vm540_vm9 = vmand %vm307_vm11, %vm3681_vm7 }
 0x150   :  { %980 = vadd.xlane.f32.xlu1 %v977_v37  ;;  %v1011_v37 = vshrl.u32 %v717_v27, 16  ;;  %v3812_v27 = vrot.slane %v179_v25, %v3351_v26  ;;  %v721_v25 = vsel %vm3578_vm6, %v3748_v36, 0  ;;  %5309 = vst [vmem:[#allocation18_spill] sm:$0xff] %v3838_v41  ;;  %vm305_vm6 = vcmp.eq.s32.totalorder %v3670_v24, %v3334_v18  ;;  %p3214_p11 = por %p3213_p10, %p3212_p9 }
 0x151   :  { %1002 = vadd.xlane.f32.xlu0 %v1000_v50  ;;  %v3797_v50 = vsel %vm533_vm12, %v3688_v55, 0  ;;  %v1058_v32 = vand.u32 65535, %v721_v25  ;;  %vm538_vm12 = vmand %vm305_vm6, %vm3681_vm7  ;;  %v226_v24 = vcombine.high %v3472_v42, %v3472_v42  ;;  %v668_v42 = vcombine.high %v3731_v40, %v3731_v40 }
 0x152   :  { %v1013_v38 = vcvt.s32.f32 %v1011_v37  ;;  %v3850_v35 = vsel %vm538_vm12, %v3688_v55, 0  ;;  %v725_v40 = vsel %vm5317_vm10, %v3748_v36, 0  ;;  %p3215_p12 = pnand %p3214_p11, %p3208_p8 }
 0x153   :  { %v1060_v61 = vcvt.s32.f32 %v1058_v32  ;;  %v3875_v32 = vsel %vm540_vm9, %v3688_v55, 0  ;;  %v3905_v23 = vrot.slane %v226_v24, %v3374_v57 }
 0x154   :  { %992 = vadd.xlane.f32.xlu1 %v989_v51  ;;  %v3807_v51 = vsel %vm534_vm15, %v3688_v55, 0  ;;  %vm539_vm15 = vmand %vm306_vm2, %vm3681_vm7  ;;  %vm5324_vm2 = vnez %v5287_v0 }
 0x155   :  { %1014 = vadd.xlane.f32.xlu0 %v1012_v60  ;;  %v1023_v60 = vshrl.u32 %v718_v62, 16  ;;  %v3833_v62 = vrot.slane %v3812_v27, %v3351_v26  ;;  %vm309_vm9 = vcmp.eq.s32.totalorder %v3905_v23, %v3274_v5  ;;  %vm311_vm10 = vcmp.eq.s32.totalorder %v3905_v23, %v3282_v7 }
 0x157   :  { %5308 = vst [vmem:[#allocation17_spill] sm:$0xff] %v3833_v62  ;;  %v1025_v37 = vcvt.s32.f32 %v1023_v60  ;;  %v722_v60 = vsel %vm5310_vm14, %v3748_v36, 0 }
 0x158   :  { %1004 = vadd.xlane.f32.xlu1 %v1001_v21  ;;  %v1046_v21 = vand.u32 65535, %v720_v59  ;;  %v1070_v41 = vand.u32 65535, %v722_v60 }
 0x159   :  { %1026 = vadd.xlane.f32.xlu0 %v1024_v1  ;;  %v3827_v1 = vsel %vm536_vm0, %v3688_v55, 0 }
 0x15a   :  { %5307 = vst [vmem:[#allocation16_spill] sm:$0xff] %v3827_v1  ;;  %v3861_v1 = vsel %vm539_vm15, %v3688_v55, 0  ;;  %v468_v55 = vrot.slane %v3363_v47, %v3374_v57  ;;  %v1094_v47 = vand.u32 65535, %v724_v33  ;;  %vm308_vm15 = vcmp.eq.s32.totalorder %v3905_v23, %v3269_v2 }
 0x15c   :  { %1016 = vadd.xlane.f32.xlu1 %v1013_v38  ;;  %v1048_v38 = vcvt.s32.f32 %v1046_v21  ;;  %v3856_v21 = vrot.slane %v3833_v62, %v3374_v57  ;;  %v1059_v62 = vshrl.u32 %v721_v25, 16  ;;  %vm3918_vm14 = vcmp.eq.s32.totalorder %v468_v55, 1 }
 0x15d   :  { %1038 = vadd.xlane.f32.xlu0 %v1036_v43  ;;  %v472_v43 = vrot.slane %v3365_v48, %v3374_v57  ;;  %v1037_v48 = vcvt.s32.f32 %v1035_v34  ;;  %v726_v55 = vsel %vm5324_vm2, %v3748_v36, 0  ;;  %vm541_vm11 = vmand %vm308_vm15, %vm3918_vm14  ;;  %vm313_vm2 = vcmp.eq.s32.totalorder %v3905_v23, %v3294_v9 }
 0x15e   :  { %vm324_vm1 = vcmp.eq.s32.totalorder %v3856_v21, %v3269_v2  ;;  %vm325_vm7 = vcmp.eq.s32.totalorder %v3856_v21, %v3274_v5  ;;  %vm326_vm4 = vcmp.eq.s32.totalorder %v3856_v21, %v3279_v6  ;;  %vm327_vm6 = vcmp.eq.s32.totalorder %v3856_v21, %v3282_v7 }
 0x15f   :  { %vm3865_vm13 = vcmp.eq.s32.totalorder %v472_v43, 1  ;;  %v1072_v43 = vcvt.s32.f32 %v1070_v41  ;;  %v1061_v41 = vcvt.s32.f32 %v1059_v62  ;;  %vm5325_vm15 = vnez %v5289_v39 }
 0x160   :  { %1028 = vadd.xlane.f32.xlu1 %v1025_v37  ;;  %v1047_v37 = vshrl.u32 %v720_v59, 16  ;;  %v723_v59 = vsel %vm3597_vm3, %v3748_v36, 0  ;;  %vm3883_vm3 = vmand %vm324_vm1, %vm3865_vm13  ;;  %vm310_vm1 = vcmp.eq.s32.totalorder %v3905_v23, %v3279_v6  ;;  %v195_v62 = vcombine.high %v3812_v27, %v3812_v27 }
 0x161   :  { %1050 = vadd.xlane.f32.xlu0 %v1048_v38  ;;  %vm3898_vm0 = vmand %vm325_vm7, %vm3865_vm13  ;;  %v5363_v38 = vmov 0 }
 0x162   :  { %v1049_v34 = vcvt.s32.f32 %v1047_v37  ;;  %v1071_v37 = vshrl.u32 %v722_v60, 16  ;;  %vm3912_vm5 = vmand %vm326_vm4, %vm3865_vm13  ;;  %v3929_v60 = vrot.slane %v668_v42, %v3374_v57  ;;  %v1095_v42 = vshrl.u32 %v724_v33, 16 }
 0x163   :  { %vm3924_vm12 = vmand %vm327_vm6, %vm3865_vm13  ;;  %vm312_vm6 = vcmp.eq.s32.totalorder %v3905_v23, %v3285_v8  ;;  %v727_v33 = vsel %vm5325_vm15, %v3748_v36, 0  ;;  %vm317_vm15 = vcmp.eq.s32.totalorder %v3905_v23, %v3314_v14 }
 0x164   :  { %1040 = vadd.xlane.f32.xlu1 %v1037_v48  ;;  %v1082_v48 = vand.u32 65535, %v723_v59  ;;  %v1073_v24 = vcvt.s32.f32 %v1071_v37  ;;  %v1118_v37 = vand.u32 65535, %v726_v55  ;;  %vm542_vm7 = vmand %vm309_vm9, %vm3918_vm14 }
 0x165   :  { %1062 = vadd.xlane.f32.xlu0 %v1060_v61  ;;  %vm543_vm4 = vmand %vm310_vm1, %vm3918_vm14 }
 0x166   :  { %v1084_v61 = vcvt.s32.f32 %v1082_v48  ;;  %v1106_v48 = vand.u32 65535, %v725_v40  ;;  %vm545_vm9 = vmand %vm312_vm6, %vm3918_vm14  ;;  %v1120_v39 = vcvt.s32.f32 %v1118_v37  ;;  %vm315_vm6 = vcmp.eq.s32.totalorder %v3905_v23, %v3304_v12 }
 0x167   :  { %vm546_vm1 = vmand %vm313_vm2, %vm3918_vm14  ;;  %vm316_vm2 = vcmp.eq.s32.totalorder %v3905_v23, %v3311_v13 }
 0x168   :  { %1052 = vadd.xlane.f32.xlu1 %v1049_v34  ;;  %v1108_v0 = vcvt.s32.f32 %v1106_v48 }
 0x169   :  { %1074 = vadd.xlane.f32.xlu0 %v1072_v43  ;;  %v1083_v43 = vshrl.u32 %v723_v59, 16 }
 0x16b   :  { %v1085_v59 = vcvt.s32.f32 %v1083_v43  ;;  %v1107_v43 = vshrl.u32 %v725_v40, 16 }
 0x16c   :  { %1064 = vadd.xlane.f32.xlu1 %v1061_v41  ;;  %v1096_v41 = vcvt.s32.f32 %v1094_v47  ;;  %v3948_v47 = vsel %vm542_vm7, %v3929_v60, 0  ;;  %vm5329_vm7 = vnez %v5291_v63 }
 0x16d   :  { %1086 = vadd.xlane.f32.xlu0 %v1084_v61  ;;  %v3939_v61 = vsel %vm541_vm11, %v3929_v60, 0  ;;  %vm544_vm11 = vmand %vm311_vm10, %vm3918_vm14  ;;  %v728_v40 = vsel %vm5329_vm7, %v3748_v36, 0 }
 0x16e   :  { %v3967_v48 = vsel %vm544_vm11, %v3929_v60, 0  ;;  %v1142_v37 = vand.u32 65535, %v728_v40  ;;  %vm548_vm11 = vmand %vm315_vm6, %vm3918_vm14  ;;  %vm320_vm6 = vcmp.eq.s32.totalorder %v3905_v23, %v3331_v17 }
 0x16f   :  { %5327 = vst [vmem:[#allocation20_spill] sm:$0xff] %v3967_v48  ;;  %v3982_v48 = vsel %vm546_vm1, %v3929_v60, 0  ;;  %vm5332_vm1 = vnez %v5293_v53  ;;  %vm549_vm7 = vmand %vm316_vm2, %vm3918_vm14 }
 0x170   :  { %1076 = vadd.xlane.f32.xlu1 %v1073_v24  ;;  %v3962_v24 = vsel %vm543_vm4, %v3929_v60, 0  ;;  %5330 = vst [vmem:[#allocation22_spill] sm:$0xff] %v3982_v48  ;;  %vm314_vm4 = vcmp.eq.s32.totalorder %v3905_v23, %v3301_v11 }
 0x171   :  { %1098 = vadd.xlane.f32.xlu0 %v1096_v41  ;;  %5326 = vst [vmem:[#allocation19_spill] sm:$0xff] %v3962_v24  ;;  %v1097_v41 = vcvt.s32.f32 %v1095_v42  ;;  %v1130_v24 = vand.u32 65535, %v727_v33  ;;  %v1109_v42 = vcvt.s32.f32 %v1107_v43  ;;  %vm547_vm10 = vmand %vm314_vm4, %vm3918_vm14  ;;  %vm319_vm4 = vcmp.eq.s32.totalorder %v3905_v23, %v3324_v16 }
 0x172   :  { %v3995_v43 = vsel %vm547_vm10, %v3929_v60, 0  ;;  %vm550_vm10 = vmand %vm317_vm15, %vm3918_vm14  ;;  %vm5336_vm15 = vnez %v5295_v56 }
 0x173   :  { %v1132_v63 = vcvt.s32.f32 %v1130_v24  ;;  %5331 = vst [vmem:[#allocation23_spill] sm:$0xff] %v3995_v43  ;;  %v4008_v24 = vsel %vm548_vm11, %v3929_v60, 0  ;;  %vm552_vm11 = vmand %vm319_vm4, %vm3918_vm14 }
 0x174   :  { %1088 = vadd.xlane.f32.xlu1 %v1085_v59  ;;  %v3972_v59 = vsel %vm545_vm9, %v3929_v60, 0  ;;  %vm318_vm9 = vcmp.eq.s32.totalorder %v3905_v23, %v3321_v15  ;;  %5333 = vst [vmem:[#allocation24_spill] sm:$0xff] %v4008_v24  ;;  %v1144_v24 = vcvt.s32.f32 %v1142_v37 }
 0x175   :  { %1110 = vadd.xlane.f32.xlu0 %v1108_v0  ;;  %5328 = vst [vmem:[#allocation21_spill] sm:$0xff] %v3972_v59  ;;  %v621_v0 = vcombine.high %v3271_v3, %v3271_v3  ;;  %v1119_v59 = vshrl.u32 %v726_v55, 16  ;;  %v729_v55 = vsel %vm5332_vm1, %v3748_v36, 0  ;;  %vm551_vm2 = vmand %vm318_vm9, %vm3918_vm14  ;;  %vm321_vm1 = vcmp.eq.s32.totalorder %v3905_v23, %v3334_v18 }
 0x176   :  { %v1154_v43 = vand.u32 65535, %v729_v55  ;;  %vm553_vm9 = vmand %vm320_vm6, %vm3918_vm14 }
 0x177   :  { %v1121_v53 = vcvt.s32.f32 %v1119_v59  ;;  %vm554_vm4 = vmand %vm321_vm1, %vm3918_vm14  ;;  %vm329_vm1 = vcmp.eq.s32.totalorder %v3856_v21, %v3294_v9 }
 0x178   :  { %1100 = vadd.xlane.f32.xlu1 %v1097_v41  ;;  %v4005_v41 = vrot.slane %v621_v0, %v3351_v26  ;;  %v1131_v0 = vshrl.u32 %v727_v33, 16  ;;  %v4036_v33 = vsel %vm551_vm2, %v3929_v60, 0  ;;  %v1156_v56 = vcvt.s32.f32 %v1154_v43 }
 0x179   :  { %1122 = vadd.xlane.f32.xlu0 %v1120_v39  ;;  %v4015_v39 = vsel %vm549_vm7, %v3929_v60, 0  ;;  %5338 = vst [vmem:[#allocation28_spill] sm:$0xff] %v4036_v33  ;;  %vm5341_vm7 = vnez %v5297_v30  ;;  %vm323_vm2 = vcmp.eq.s32.totalorder %v3905_v23, %v3344_v20  ;;  %v1155_v43 = vshrl.u32 %v729_v55, 16 }
 0x17a   :  { %5334 = vst [vmem:[#allocation25_spill] sm:$0xff] %v4015_v39  ;;  %v4033_v59 = vrot.slane %v4005_v41, %v3351_v26  ;;  %v1133_v37 = vcvt.s32.f32 %v1131_v0  ;;  %v4044_v39 = vsel %vm553_vm9, %v3929_v60, 0  ;;  %v731_v33 = vsel %vm5341_vm7, %v3748_v36, 0 }
 0x17b   :  { %5340 = vst [vmem:[#allocation30_spill] sm:$0xff] %v4044_v39  ;;  %vm5345_vm7 = vnez %v5301_v44 }
 0x17c   :  { %1112 = vadd.xlane.f32.xlu1 %v1109_v42  ;;  %v4022_v42 = vsel %vm550_vm10, %v3929_v60, 0  ;;  %5337 = vst [vmem:[#allocation27_spill] sm:$0xff] %v4033_v59  ;;  %vm322_vm10 = vcmp.eq.s32.totalorder %v3905_v23, %v3341_v19  ;;  %v732_v23 = vsel %vm5345_vm7, %v3748_v36, 0 }
 0x17d   :  { %1134 = vadd.xlane.f32.xlu0 %v1132_v63  ;;  %5335 = vst [vmem:[#allocation26_spill] sm:$0xff] %v4022_v42  ;;  %v730_v63 = vsel %vm5336_vm15, %v3748_v36, 0  ;;  %v4039_v42 = vsel %vm552_vm11, %v3929_v60, 0  ;;  %vm555_vm6 = vmand %vm322_vm10, %vm3918_vm14  ;;  %vm328_vm11 = vcmp.eq.s32.totalorder %v3856_v21, %v3285_v8 }
 0x17e   :  { %5339 = vst [vmem:[#allocation29_spill] sm:$0xff] %v4039_v42  ;;  %v1166_v48 = vand.u32 65535, %v730_v63  ;;  %v4053_v42 = vrot.slane %v4033_v59, %v3374_v57  ;;  %vm556_vm15 = vmand %vm323_vm2, %vm3918_vm14  ;;  %v733_v59 = vsel %vm3707_vm8, %v3748_v36, 0  ;;  %vm332_vm2 = vcmp.eq.s32.totalorder %v3856_v21, %v3311_v13 }
 0x17f   :  { %vm561_vm9 = vmand %vm328_vm11, %vm3865_vm13 }
 0x180   :  { %1124 = vadd.xlane.f32.xlu1 %v1121_v53  ;;  %v1143_v53 = vshrl.u32 %v728_v40, 16  ;;  %v4060_v40 = vsel %vm554_vm4, %v3929_v60, 0  ;;  %v1168_v0 = vcvt.s32.f32 %v1166_v48  ;;  %v4084_v55 = vsel %vm561_vm9, %v4053_v42, 0  ;;  %vm562_vm14 = vmand %vm329_vm1, %vm3865_vm13 }
 0x181   :  { %1146 = vadd.xlane.f32.xlu0 %v1144_v24  ;;  %5342 = vst [vmem:[#allocation31_spill] sm:$0xff] %v4060_v40  ;;  %v4069_v24 = vsel %vm555_vm6, %v3929_v60, 0  ;;  %5346 = vst [vmem:[#allocation34_spill] sm:$0xff] %v4084_v55  ;;  %v1157_v48 = vcvt.s32.f32 %v1155_v43  ;;  %vm330_vm4 = vcmp.eq.s32.totalorder %v3856_v21, %v3301_v11  ;;  %vm331_vm6 = vcmp.eq.s32.totalorder %v3856_v21, %v3304_v12 }
 0x182   :  { %v1145_v30 = vcvt.s32.f32 %v1143_v53  ;;  %5343 = vst [vmem:[#allocation32_spill] sm:$0xff] %v4069_v24  ;;  %v4091_v53 = vsel %vm562_vm14, %v4053_v42, 0  ;;  %vm563_vm10 = vmand %vm330_vm4, %vm3865_vm13  ;;  %vm334_vm9 = vcmp.eq.s32.totalorder %v3856_v21, %v3321_v15  ;;  %vm335_vm1 = vcmp.eq.s32.totalorder %v3856_v21, %v3324_v16 }
 0x183   :  { %5347 = vst [vmem:[#allocation35_spill] sm:$0xff] %v4091_v53  ;;  %v4101_v27 = vsel %vm563_vm10, %v4053_v42, 0  ;;  %vm564_vm11 = vmand %vm331_vm6, %vm3865_vm13  ;;  %vm336_vm10 = vcmp.eq.s32.totalorder %v3856_v21, %v3331_v17  ;;  %v2413_v24 = vadd.s32 4294967240, %v3271_v3 }
 0x184   :  { %1136 = vadd.xlane.f32.xlu1 %v1133_v37  ;;  %v1178_v37 = vand.u32 65535, %v731_v33  ;;  %5348 = vst [vmem:[#allocation36_spill] sm:$0xff] %v4101_v27  ;;  %v4113_v54 = vsel %vm564_vm11, %v4053_v42, 0  ;;  %vm565_vm8 = vmand %vm332_vm2, %vm3865_vm13  ;;  %vm337_vm11 = vcmp.eq.s32.totalorder %v3856_v21, %v3334_v18  ;;  %v2385_v27 = vadd.s32 4294967272, %v3271_v3 }
 0x185   :  { %1158 = vadd.xlane.f32.xlu0 %v1156_v56  ;;  %v4074_v56 = vsel %vm556_vm15, %v3929_v60, 0  ;;  %v1167_v60 = vshrl.u32 %v730_v63, 16  ;;  %v4108_v63 = vrot.slane %v195_v62, %v3351_v26  ;;  %5349 = vst [vmem:[#allocation37_spill] sm:$0xff] %v4113_v54  ;;  %vm333_vm15 = vcmp.eq.s32.totalorder %v3856_v21, %v3314_v14  ;;  %vm567_vm14 = vmand %vm334_vm9, %vm3865_vm13 }
 0x186   :  { %5344 = vst [vmem:[#allocation33_spill] sm:$0xff] %v4074_v56  ;;  %v1180_v44 = vcvt.s32.f32 %v1178_v37  ;;  %v4124_v37 = vsel %vm565_vm8, %v4053_v42, 0  ;;  %vm566_vm7 = vmand %vm333_vm15, %vm3865_vm13  ;;  %vm338_vm8 = vcmp.eq.s32.totalorder %v3856_v21, %v3341_v19  ;;  %vm339_vm15 = vcmp.eq.s32.totalorder %v3856_v21, %v3344_v20 }
 0x187   :  { %v1169_v43 = vcvt.s32.f32 %v1167_v60  ;;  %5350 = vst [vmem:[#allocation38_spill] sm:$0xff] %v4124_v37  ;;  %v4129_v62 = vsel %vm566_vm7, %v4053_v42, 0  ;;  %v476_v60 = vrot.slane %v3367_v49, %v3374_v57  ;;  %vm568_vm4 = vmand %vm335_vm1, %vm3865_vm13  ;;  %v1214_v37 = vand.u32 65535, %v3718_v58 }
 0x188   :  { %1148 = vadd.xlane.f32.xlu1 %v1145_v30  ;;  %v1190_v30 = vand.u32 65535, %v732_v23  ;;  %5351 = vst [vmem:[#allocation39_spill] sm:$0xff] %v4129_v62  ;;  %v4146_v54 = vsel %vm568_vm4, %v4053_v42, 0  ;;  %vm569_vm2 = vmand %vm336_vm10, %vm3865_vm13 }
 0x189   :  { %1170 = vadd.xlane.f32.xlu0 %v1168_v0  ;;  %v1179_v0 = vshrl.u32 %v731_v33, 16  ;;  %v1202_v33 = vand.u32 65535, %v733_v59  ;;  %5353 = vst [vmem:[#allocation41_spill] sm:$0xff] %v4146_v54  ;;  %vm4150_vm6 = vcmp.eq.s32.totalorder %v476_v60, 1  ;;  %vm570_vm9 = vmand %vm337_vm11, %vm3865_vm13  ;;  %v1310_v54 = vand.u32 65535, %v3797_v50 }
 0x18a   :  { %v1192_v36 = vcvt.s32.f32 %v1190_v30  ;;  %v4171_v60 = vsel %vm570_vm9, %v4053_v42, 0  ;;  %vm571_vm7 = vmand %vm338_vm8, %vm3865_vm13 }
 0x18b   :  { %v1181_v30 = vcvt.s32.f32 %v1179_v0  ;;  %v1204_v62 = vcvt.s32.f32 %v1202_v33  ;;  %v1203_v0 = vshrl.u32 %v733_v59, 16  ;;  %v1216_v33 = vcvt.s32.f32 %v1214_v37  ;;  %5357 = vst [vmem:[#allocation43_spill] sm:$0xff] %v4171_v60 }
 0x18c   :  { %1160 = vadd.xlane.f32.xlu1 %v1157_v48  ;;  %v4136_v48 = vsel %vm567_vm14, %v4053_v42, 0  ;;  %v4176_v21 = vsel %vm571_vm7, %v4053_v42, 0  ;;  %vm572_vm14 = vmand %vm339_vm15, %vm3865_vm13  ;;  %v5360_v37 = vmov 0 }
 0x18d   :  { %1182 = vadd.xlane.f32.xlu0 %v1180_v44  ;;  %5352 = vst [vmem:[#allocation40_spill] sm:$0xff] %v4136_v48  ;;  %v4142_v44 = vrot.slane %v4108_v63, %v3374_v57  ;;  %5358 = vst [vmem:[#allocation44_spill] sm:$0xff] %v4176_v21  ;;  %v4183_v59 = vsel %vm572_vm14, %v4053_v42, 0  ;;  %v1312_v48 = vcvt.s32.f32 %v1310_v54  ;;  %v1311_v54 = vshrl.u32 %v3797_v50, 16 }
 0x18e   :  { %5359 = vst [vmem:[#allocation45_spill] sm:$0xff] %v4183_v59  ;;  %v2392_v50 = vadd.s32 4294967264, %v3271_v3 }
 0x18f   :  { %vm340_vm1 = vcmp.eq.s32.totalorder %v4142_v44, %v3269_v2  ;;  %vm341_vm4 = vcmp.eq.s32.totalorder %v4142_v44, %v3274_v5  ;;  %vm342_vm13 = vcmp.eq.s32.totalorder %v4142_v44, %v3279_v6  ;;  %vm343_vm8 = vcmp.eq.s32.totalorder %v4142_v44, %v3282_v7 }
 0x190   :  { %1172 = vadd.xlane.f32.xlu1 %v1169_v43  ;;  %v1191_v43 = vshrl.u32 %v732_v23, 16  ;;  %vm4187_vm10 = vmand %vm340_vm1, %vm4150_vm6  ;;  %vm344_vm15 = vcmp.eq.s32.totalorder %v4142_v44, %v3285_v8  ;;  %vm345_vm1 = vcmp.eq.s32.totalorder %v4142_v44, %v3294_v9  ;;  %vm346_vm7 = vcmp.eq.s32.totalorder %v4142_v44, %v3301_v11 }
 0x191   :  { %1194 = vadd.xlane.f32.xlu0 %v1192_v36  ;;  %v4163_v36 = vsel %vm569_vm2, %v4053_v42, 0  ;;  %v5361_v37 = vsel %vm4187_vm10, 4294967295, %v5360_v37  ;;  %vm4194_vm2 = vmand %vm341_vm4, %vm4150_vm6  ;;  %vm347_vm4 = vcmp.eq.s32.totalorder %v4142_v44, %v3304_v12 }
 0x192   :  { %v1193_v23 = vcvt.s32.f32 %v1191_v43  ;;  %5356 = vst [vmem:[#allocation42_spill] sm:$0xff] %v4163_v36  ;;  %5362 = vst [vmem:[#allocation46_spill] sm:$0xff] %v5361_v37  ;;  %v1215_v43 = vshrl.u32 %v3718_v58, 16  ;;  %v5364_v38 = vsel %vm4194_vm2, 4294967295, %v5363_v38  ;;  %v5367_v37 = vmov 0 }
 0x193   :  { %5365 = vst [vmem:[#allocation47_spill] sm:$0xff] %v5364_v38  ;;  %vm4203_vm11 = vmand %vm342_vm13, %vm4150_vm6  ;;  %v5370_v58 = vmov 0  ;;  %v1286_v36 = vand.u32 65535, %v3774_v31 }
 0x194   :  { %1184 = vadd.xlane.f32.xlu1 %v1181_v30  ;;  %v1205_v30 = vcvt.s32.f32 %v1203_v0  ;;  %v5368_v37 = vsel %vm4203_vm11, 4294967295, %v5367_v37  ;;  %vm4213_vm9 = vmand %vm343_vm8, %vm4150_vm6  ;;  %v1217_v0 = vcvt.s32.f32 %v1215_v43  ;;  %vm348_vm8 = vcmp.eq.s32.totalorder %v4142_v44, %v3311_v13 }
 0x195   :  { %1206 = vadd.xlane.f32.xlu0 %v1204_v62  ;;  %v1226_v62 = vand.u32 65535, %v3726_v29  ;;  %v5371_v58 = vsel %vm4213_vm9, 4294967295, %v5370_v58  ;;  %vm4224_vm14 = vmand %vm344_vm15, %vm4150_vm6 }
 0x196   :  { %5372 = vst [vmem:[#allocation48_spill] sm:$0xff] %v5371_v58  ;;  %v1250_v58 = vand.u32 65535, %v3741_v10  ;;  %vm4233_vm13 = vmand %vm345_vm1, %vm4150_vm6 }
 0x197   :  { %vm4241_vm15 = vmand %vm346_vm7, %vm4150_vm6 }
 0x198   :  { %1196 = vadd.xlane.f32.xlu1 %v1193_v23  ;;  %v1228_v23 = vcvt.s32.f32 %v1226_v62  ;;  %v1227_v62 = vshrl.u32 %v3726_v29, 16  ;;  %v5379_v29 = vmov 0  ;;  %vm4249_vm1 = vmand %vm347_vm4, %vm4150_vm6 }
 0x199   :  { %1218 = vadd.xlane.f32.xlu0 %v1216_v33  ;;  %v5366_v33 = vld [vmem:[#allocation14_spill] sm:$0xff]  ;;  %v5380_v29 = vsel %vm4241_vm15, 4294967295, %v5379_v29  ;;  %vm4258_vm7 = vmand %vm348_vm8, %vm4150_vm6  ;;  %vm352_vm8 = vcmp.eq.s32.totalorder %v4142_v44, %v3331_v17  ;;  %vm5416_vm15 = vcmask 458112  }
 0x19a   :  { %v1238_v21 = vand.u32 65535, %v5366_v33  ;;  %5369 = vst [vmem:[#allocation14_spill] sm:$0xff] %v5368_v37  ;;  %v5376_v37 = vmov 0  ;;  %5381 = vst [vmem:[#allocation51_spill] sm:$0xff] %v5380_v29  ;;  %v1229_v43 = vcvt.s32.f32 %v1227_v62  ;;  %v5385_v29 = vmov 0 }
 0x19b   :  { %v5377_v37 = vsel %vm4233_vm13, 4294967295, %v5376_v37  ;;  %vm350_vm13 = vcmp.eq.s32.totalorder %v4142_v44, %v3321_v15  ;;  %v5386_v29 = vsel %vm4258_vm7, 4294967295, %v5385_v29 }
 0x19c   :  { %1208 = vadd.xlane.f32.xlu1 %v1205_v30  ;;  %v5373_v30 = vmov 0  ;;  %5378 = vst [vmem:[#allocation50_spill] sm:$0xff] %v5377_v37  ;;  %5387 = vst [vmem:[#allocation53_spill] sm:$0xff] %v5386_v29  ;;  %v1252_v37 = vcvt.s32.f32 %v1250_v58  ;;  %v1251_v29 = vshrl.u32 %v3741_v10, 16  ;;  %v5394_v10 = vmov 0 }
 0x19d   :  { %1230 = vadd.xlane.f32.xlu0 %v1228_v23  ;;  %v5374_v30 = vsel %vm4224_vm14, 4294967295, %v5373_v30  ;;  %v1240_v23 = vcvt.s32.f32 %v1238_v21  ;;  %vm349_vm14 = vcmp.eq.s32.totalorder %v4142_v44, %v3314_v14  ;;  %v5382_v21 = vmov 0 }
 0x19e   :  { %5375 = vst [vmem:[#allocation49_spill] sm:$0xff] %v5374_v30  ;;  %v5383_v21 = vsel %vm4249_vm1, 4294967295, %v5382_v21  ;;  %vm4265_vm4 = vmand %vm349_vm14, %vm4150_vm6  ;;  %v5388_v30 = vmov 0  ;;  %v1253_v60 = vcvt.s32.f32 %v1251_v29  ;;  %vm351_vm14 = vcmp.eq.s32.totalorder %v4142_v44, %v3324_v16 }
 0x19f   :  { %5384 = vst [vmem:[#allocation52_spill] sm:$0xff] %v5383_v21  ;;  %v5389_v30 = vsel %vm4265_vm4, 4294967295, %v5388_v30  ;;  %vm4271_vm1 = vmand %vm350_vm13, %vm4150_vm6  ;;  %v1274_v21 = vand.u32 65535, %v3766_v46  ;;  %vm354_vm4 = vcmp.eq.s32.totalorder %v4142_v44, %v3341_v19 }
 0x1a0   :  { %1220 = vadd.xlane.f32.xlu1 %v1217_v0  ;;  %v1239_v0 = vshrl.u32 %v5366_v33, 16  ;;  %5390 = vst [vmem:[#allocation54_spill] sm:$0xff] %v5389_v30  ;;  %v5391_v33 = vmov 0  ;;  %vm4283_vm13 = vmand %vm351_vm14, %vm4150_vm6 }
 0x1a1   :  { %1242 = vadd.xlane.f32.xlu0 %v1240_v23  ;;  %v1262_v23 = vand.u32 65535, %v3757_v4  ;;  %v5392_v33 = vsel %vm4271_vm1, 4294967295, %v5391_v33  ;;  %v1276_v30 = vcvt.s32.f32 %v1274_v21  ;;  %v5395_v10 = vsel %vm4283_vm13, 4294967295, %v5394_v10  ;;  %vm4296_vm14 = vmand %vm352_vm8, %vm4150_vm6 }
 0x1a2   :  { %5393 = vst [vmem:[#allocation55_spill] sm:$0xff] %v5392_v33  ;;  %v1241_v62 = vcvt.s32.f32 %v1239_v0  ;;  %5396 = vst [vmem:[#allocation56_spill] sm:$0xff] %v5395_v10  ;;  %vm353_vm1 = vcmp.eq.s32.totalorder %v4142_v44, %v3334_v18  ;;  %v5397_v21 = vmov 0  ;;  %vm355_vm13 = vcmp.eq.s32.totalorder %v4142_v44, %v3344_v20 }
 0x1a3   :  { %v1264_v58 = vcvt.s32.f32 %v1262_v23  ;;  %v5398_v21 = vsel %vm4296_vm14, 4294967295, %v5397_v21  ;;  %v1288_v0 = vcvt.s32.f32 %v1286_v36  ;;  %v1298_v23 = vand.u32 65535, %v3788_v28  ;;  %vm4305_vm7 = vmand %vm353_vm1, %vm4150_vm6 }
 0x1a4   :  { %1232 = vadd.xlane.f32.xlu1 %v1229_v43  ;;  %v1263_v43 = vshrl.u32 %v3757_v4, 16  ;;  %5399 = vst [vmem:[#allocation57_spill] sm:$0xff] %v5398_v21  ;;  %vm4312_vm8 = vmand %vm354_vm4, %vm4150_vm6  ;;  %v5406_v36 = vmov 0  ;;  %v1287_v21 = vshrl.u32 %v3774_v31, 16  ;;  %v2378_v33 = vadd.s32 4294967280, %v3271_v3 }
 0x1a5   :  { %1254 = vadd.xlane.f32.xlu0 %v1252_v37  ;;  %vm4318_vm14 = vmand %vm355_vm13, %vm4150_vm6  ;;  %v1300_v10 = vcvt.s32.f32 %v1298_v23  ;;  %vm5211_vm6 = vcmask 130112   ;;  %vm5212_vm1 = vcmask 195712   ;;  %vm5217_vm4 = vcmask 261312  }
 0x1a6   :  { %v1265_v29 = vcvt.s32.f32 %v1263_v43  ;;  %v2371_v43 = vadd.s32 4294967288, %v3271_v3  ;;  %v5407_v36 = vsel %vm4318_vm14, 4294967295, %v5406_v36 }
 0x1a7   :  { %5408 = vst [vmem:[#allocation60_spill] sm:$0xff] %v5407_v36 }
 0x1a8   :  { %1244 = vadd.xlane.f32.xlu1 %v1241_v62  ;;  %v5400_v62 = vmov 0  ;;  %v4330_v49 = vsub.s32 %v2371_v43, %v3269_v2  ;;  %v1322_v43 = vand.u32 65535, %v3807_v51 }
 0x1a9   :  { %1266 = vadd.xlane.f32.xlu0 %v1264_v58  ;;  %v835_v38 = vpop.xlane.xlu1 %834  ;;  %v5401_v62 = vsel %vm4305_vm7, 4294967295, %v5400_v62 }
 0x1aa   :  { %v847_v59 = vpop.xlane.xlu0 %846  ;;  %5402 = vst [vmem:[#allocation58_spill] sm:$0xff] %v5401_v62  ;;  %v838_v58 = vcvt.f32.s32 %v835_v38 }
 0x1ac   :  { %1256 = vadd.xlane.f32.xlu1 %v1253_v60 }
 0x1ad   :  { %1278 = vadd.xlane.f32.xlu0 %v1276_v30  ;;  %v837_v37 = vpop.xlane.xlu1 %836  ;;  %v1275_v30 = vshrl.u32 %v3766_v46, 16 }
 0x1ae   :  { %v839_v4 = vcvt.f32.s32 %v837_v37  ;;  %v859_v60 = vpop.xlane.xlu0 %858  ;;  %v5403_v37 = vmov 0 }
 0x1af   :  { %v5404_v37 = vsel %vm4312_vm8, 4294967295, %v5403_v37 }
 0x1b0   :  { %v840_v46 = vshll.u32 %v839_v4, 16  ;;  %1268 = vadd.xlane.f32.xlu1 %v1265_v29  ;;  %5405 = vst [vmem:[#allocation59_spill] sm:$0xff] %v5404_v37  ;;  %v1277_v29 = vcvt.s32.f32 %v1275_v30  ;;  %v850_v37 = vcvt.f32.s32 %v847_v59  ;;  %v4334_v59 = vsub.s32 %v2378_v33, %v3269_v2 }
 0x1b1   :  { %1290 = vadd.xlane.f32.xlu0 %v1288_v0  ;;  %v849_v44 = vpop.xlane.xlu1 %848  ;;  %v4327_v0 = vsub.s32 %v3271_v3, %v3269_v2 }
 0x1b2   :  { %v841_v62 = vadd.s32 %v840_v46, %v838_v58  ;;  %v851_v38 = vcvt.f32.s32 %v849_v44  ;;  %v871_v4 = vpop.xlane.xlu0 %870  ;;  %v1289_v46 = vcvt.s32.f32 %v1287_v21  ;;  %v1299_v44 = vshrl.u32 %v3788_v28, 16  ;;  %v5409_v28 = vld [vmem:[#allocation13_spill] sm:$0xff] }
 0x1b3   :  { %v227_v21 = vcombine.high %v4108_v63, %v4108_v63  ;;  %v1334_v63 = vand.u32 65535, %v3817_v45 }
 0x1b4   :  { %v852_v36 = vshll.u32 %v851_v38, 16  ;;  %1280 = vadd.xlane.f32.xlu1 %v1277_v29  ;;  %v2370_v38 = vrot.slane %v841_v62, %v4327_v0  ;;  %v862_v29 = vcvt.f32.s32 %v859_v60  ;;  %v1301_v60 = vcvt.s32.f32 %v1299_v44 }
 0x1b5   :  { %1302 = vadd.xlane.f32.xlu0 %v1300_v10  ;;  %v861_v30 = vpop.xlane.xlu1 %860  ;;  %v1313_v44 = vcvt.s32.f32 %v1311_v54 }
 0x1b6   :  { %v853_v58 = vadd.s32 %v852_v36, %v850_v37  ;;  %v863_v31 = vcvt.f32.s32 %v861_v30  ;;  %v883_v23 = vpop.xlane.xlu0 %882  ;;  %v484_v37 = vrot.slane %v5409_v28, %v3374_v57 }
 0x1b8   :  { %v2375_v10 = vrot.slane %v853_v58, %v4330_v49  ;;  %v864_v53 = vshll.u32 %v863_v31, 16  ;;  %1292 = vadd.xlane.f32.xlu1 %v1289_v46  ;;  %v4347_v58 = vsub.s32 %v2385_v27, %v3269_v2  ;;  %v1324_v31 = vcvt.s32.f32 %v1322_v43 }
 0x1b9   :  { %1314 = vadd.xlane.f32.xlu0 %v1312_v48  ;;  %v873_v33 = vpop.xlane.xlu1 %872  ;;  %v874_v46 = vcvt.f32.s32 %v871_v4  ;;  %v1323_v4 = vshrl.u32 %v3807_v51, 16  ;;  %vm4357_vm13 = vcmp.eq.s32.totalorder %v484_v37, 1  ;;  %v2406_v37 = vadd.s32 4294967248, %v3271_v3 }
 0x1ba   :  { %v2377_v36 = vsel %vm5211_vm6, %v2375_v10, %v2370_v38  ;;  %v865_v30 = vadd.s32 %v864_v53, %v862_v29  ;;  %v875_v55 = vcvt.f32.s32 %v873_v33  ;;  %v895_v62 = vpop.xlane.xlu0 %894  ;;  %v4353_v38 = vrot.slane %v227_v21, %v3374_v57 }
 0x1bb   :  { %vm5218_vm6 = vcmask 326912   ;;  %v2399_v21 = vadd.s32 4294967256, %v3271_v3  ;;  %v898_v40 = vcvt.f32.s32 %v895_v62 }
 0x1bc   :  { %v2382_v28 = vrot.slane %v865_v30, %v4334_v59  ;;  %v876_v48 = vshll.u32 %v875_v55, 16  ;;  %1304 = vadd.xlane.f32.xlu1 %v1301_v60  ;;  %v1336_v55 = vcvt.s32.f32 %v1334_v63  ;;  %v5412_v30 = vld [vmem:[#allocation16_spill] sm:$0xff]  ;;  %v637_v63 = vcombine.high %v4005_v41, %v4005_v41 }
 0x1bd   :  { %1326 = vadd.xlane.f32.xlu0 %v1324_v31  ;;  %v885_v53 = vpop.xlane.xlu1 %884  ;;  %v1346_v60 = vand.u32 65535, %v5412_v30  ;;  %v886_v31 = vcvt.f32.s32 %v883_v23  ;;  %v1347_v41 = vshrl.u32 %v5412_v30, 16  ;;  %v4392_v30 = vsub.s32 %v2413_v24, %v3269_v2 }
 0x1be   :  { %v2384_v27 = vsel %vm5212_vm1, %v2382_v28, %v2377_v36  ;;  %v877_v29 = vadd.s32 %v876_v48, %v874_v46  ;;  %v887_v43 = vcvt.f32.s32 %v885_v53  ;;  %v907_v10 = vpop.xlane.xlu0 %906  ;;  %v4365_v36 = vsub.s32 %v2392_v50, %v3269_v2 }
 0x1bf   :  { %v1335_v28 = vshrl.u32 %v3817_v45, 16  ;;  %v1325_v50 = vcvt.s32.f32 %v1323_v4  ;;  %vm372_vm1 = vcmp.eq.s32.totalorder %v4353_v38, %v3269_v2  ;;  %vm374_vm7 = vcmp.eq.s32.totalorder %v4353_v38, %v3279_v6 }
 0x1c0   :  { %v2389_v54 = vrot.slane %v877_v29, %v4347_v58  ;;  %v888_v46 = vshll.u32 %v887_v43, 16  ;;  %1316 = vadd.xlane.f32.xlu1 %v1313_v44  ;;  %v4375_v43 = vsub.s32 %v2399_v21, %v3269_v2  ;;  %v1348_v44 = vcvt.s32.f32 %v1346_v60 }
 0x1c1   :  { %1338 = vadd.xlane.f32.xlu0 %v1336_v55  ;;  %v897_v51 = vpop.xlane.xlu1 %896  ;;  %v5413_v55 = vld [vmem:[#allocation18_spill] sm:$0xff]  ;;  %v1337_v21 = vcvt.s32.f32 %v1335_v28  ;;  %v4385_v60 = vrot.slane %v637_v63, %v3351_v26  ;;  %v1349_v63 = vcvt.s32.f32 %v1347_v41  ;;  %v1382_v41 = vand.u32 65535, %v3861_v1 }
 0x1c2   :  { %v2391_v48 = vsel %vm5217_vm4, %v2389_v54, %v2384_v27  ;;  %v889_v23 = vadd.s32 %v888_v46, %v886_v31  ;;  %v899_v53 = vcvt.f32.s32 %v897_v51  ;;  %v4372_v29 = vpop.xlane.xlu0 %918  ;;  %v1358_v56 = vand.u32 65535, %v5413_v55 }
 0x1c3   :  { %v4382_v27 = vsub.s32 %v2406_v37, %v3269_v2  ;;  %v2420_v51 = vadd.s32 4294967232, %v3271_v3  ;;  %v1370_v37 = vand.u32 65535, %v3850_v35  ;;  %v669_v24 = vcombine.high %v4385_v60, %v4385_v60 }
 0x1c4   :  { %v2396_v45 = vrot.slane %v889_v23, %v4365_v36  ;;  %v900_v39 = vshll.u32 %v899_v53, 16  ;;  %1328 = vadd.xlane.f32.xlu1 %v1325_v50  ;;  %v1360_v23 = vcvt.s32.f32 %v1358_v56  ;;  %v910_v53 = vcvt.f32.s32 %v907_v10 }
 0x1c5   :  { %1350 = vadd.xlane.f32.xlu0 %v1348_v44  ;;  %v909_v4 = vpop.xlane.xlu1 %908  ;;  %vm5414_vm4 = vcmask 392512   ;;  %v4407_v44 = vsub.s32 %v2420_v51, %v3269_v2  ;;  %vm376_vm8 = vcmp.eq.s32.totalorder %v4353_v38, %v3285_v8 }
 0x1c6   :  { %v2398_v31 = vsel %vm5218_vm6, %v2396_v45, %v2391_v48  ;;  %v901_v54 = vadd.s32 %v900_v39, %v898_v40  ;;  %v911_v62 = vcvt.f32.s32 %v909_v4  ;;  %v4388_v46 = vpop.xlane.xlu0 %930  ;;  %v1359_v40 = vshrl.u32 %v5413_v55, 16 }
 0x1c7   :  { %vm373_vm6 = vcmp.eq.s32.totalorder %v4353_v38, %v3274_v5  ;;  %v922_v55 = vcvt.f32.s32 %v4372_v29  ;;  %v1372_v45 = vcvt.s32.f32 %v1370_v37  ;;  %v4414_v4 = vrot.slane %v669_v24, %v3374_v57 }
 0x1c8   :  { %v2403_v28 = vrot.slane %v901_v54, %v4375_v43  ;;  %v912_v26 = vshll.u32 %v911_v62, 16  ;;  %1340 = vadd.xlane.f32.xlu1 %v1337_v21  ;;  %vm606_vm14 = vmand %vm373_vm6, %vm4357_vm13  ;;  %vm375_vm6 = vcmp.eq.s32.totalorder %v4353_v38, %v3282_v7  ;;  %v1361_v54 = vcvt.s32.f32 %v1359_v40 }
 0x1c9   :  { %1362 = vadd.xlane.f32.xlu0 %v1360_v23  ;;  %v921_v39 = vpop.xlane.xlu1 %920  ;;  %v4424_v62 = vsel %vm606_vm14, %v4414_v4, 0  ;;  %vm4437_vm14 = vmand %vm375_vm6, %vm4357_vm13  ;;  %v2427_v40 = vadd.s32 4294967224, %v3271_v3  ;;  %v1394_v24 = vand.u32 65535, %v3875_v32  ;;  %vm5424_vm6 = vcmask 589312  }
 0x1ca   :  { %v2405_v56 = vsel %vm5414_vm4, %v2403_v28, %v2398_v31  ;;  %v913_v10 = vadd.s32 %v912_v26, %v910_v53  ;;  %v923_v48 = vcvt.f32.s32 %v921_v39  ;;  %v4404_v50 = vpop.xlane.xlu0 %942  ;;  %vm605_vm4 = vmand %vm372_vm1, %vm4357_vm13  ;;  %v1371_v26 = vshrl.u32 %v3850_v35, 16 }
 0x1cb   :  { %v4427_v51 = vsel %vm605_vm4, %v4414_v4, 0  ;;  %vm607_vm1 = vmand %vm374_vm7, %vm4357_vm13  ;;  %v1384_v39 = vcvt.s32.f32 %v1382_v41  ;;  %v934_v35 = vcvt.f32.s32 %v4388_v46  ;;  %vm2432_vm7 = vcmask 654912  }
 0x1cc   :  { %v2410_v21 = vrot.slane %v913_v10, %v4382_v27  ;;  %v924_v31 = vshll.u32 %v923_v48, 16  ;;  %1352 = vadd.xlane.f32.xlu1 %v1349_v63  ;;  %5415 = vst [vmem:[#allocation13_spill] sm:$0xff] %v4427_v51  ;;  %v4444_v10 = vsel %vm607_vm1, %v4414_v4, 0  ;;  %v4464_v46 = vsel %vm4437_vm14, %v4414_v4, 0 }
 0x1cd   :  { %1374 = vadd.xlane.f32.xlu0 %v1372_v45  ;;  %v933_v29 = vpop.xlane.xlu1 %932  ;;  %5419 = vst [vmem:[#allocation16_spill] sm:$0xff] %v4444_v10  ;;  %v4457_v45 = vsel %vm3883_vm3, %v4053_v42, 0  ;;  %5422 = vst [vmem:[#allocation18_spill] sm:$0xff] %v4464_v46  ;;  %v1373_v22 = vcvt.s32.f32 %v1371_v26  ;;  %v4468_v10 = vsub.s32 %v2427_v40, %v3269_v2  ;;  %v946_v63 = vcvt.f32.s32 %v4404_v50 }
 0x1ce   :  { %v2412_v23 = vsel %vm5416_vm15, %v2410_v21, %v2405_v56  ;;  %v925_v37 = vadd.s32 %v924_v31, %v922_v55  ;;  %v935_v53 = vcvt.f32.s32 %v933_v29  ;;  %v955_v28 = vpop.xlane.xlu0 %954  ;;  %vm4448_vm15 = vmand %vm376_vm8, %vm4357_vm13  ;;  %v2434_v21 = vadd.s32 4294967216, %v3271_v3 }
 0x1cf   :  { %v1383_v31 = vshrl.u32 %v3861_v1, 16  ;;  %vm5423_vm8 = vcmask 523712   ;;  %v1598_v51 = vand.u32 65535, %v4457_v45  ;;  %v4474_v1 = vsel %vm4448_vm15, %v4414_v4, 0 }
 0x1d0   :  { %v2417_v48 = vrot.slane %v925_v37, %v4392_v30  ;;  %v936_v55 = vshll.u32 %v935_v53, 16  ;;  %1364 = vadd.xlane.f32.xlu1 %v1361_v54  ;;  %v4481_v26 = vsel %vm3898_vm0, %v4053_v42, 0  ;;  %v4484_v40 = vsub.s32 %v2434_v21, %v3269_v2 }
 0x1d1   :  { %1386 = vadd.xlane.f32.xlu0 %v1384_v39  ;;  %v945_v41 = vpop.xlane.xlu1 %944  ;;  %v1396_v39 = vcvt.s32.f32 %v1394_v24  ;;  %vm2439_vm3 = vcmask 720512   ;;  %v1385_v56 = vcvt.s32.f32 %v1383_v31  ;;  %vm377_vm4 = vcmp.eq.s32.totalorder %v4353_v38, %v3294_v9 }
 0x1d2   :  { %v2419_v29 = vsel %vm5423_vm8, %v2417_v48, %v2412_v23  ;;  %v937_v54 = vadd.s32 %v936_v55, %v934_v35  ;;  %v947_v37 = vcvt.f32.s32 %v945_v41  ;;  %v967_v53 = vpop.xlane.xlu0 %966  ;;  %v1395_v41 = vshrl.u32 %v3875_v32, 16  ;;  %vm610_vm0 = vmand %vm377_vm4, %vm4357_vm13 }
 0x1d3   :  { %v1600_v25 = vcvt.s32.f32 %v1598_v51  ;;  %v2441_v21 = vadd.s32 4294967208, %v3271_v3  ;;  %v4495_v31 = vsel %vm610_vm0, %v4414_v4, 0  ;;  %v4501_v32 = vsel %vm3912_vm5, %v4053_v42, 0 }
 0x1d4   :  { %v2424_v46 = vrot.slane %v937_v54, %v4407_v44  ;;  %v948_v23 = vshll.u32 %v947_v37, 16  ;;  %1376 = vadd.xlane.f32.xlu1 %v1373_v22  ;;  %v1610_v54 = vand.u32 65535, %v4481_v26  ;;  %v958_v37 = vcvt.f32.s32 %v955_v28 }
 0x1d5   :  { %1398 = vadd.xlane.f32.xlu0 %v1396_v39  ;;  %v957_v24 = vpop.xlane.xlu1 %956  ;;  %v2448_v51 = vadd.s32 4294967200, %v3271_v3  ;;  %v1599_v39 = vshrl.u32 %v4457_v45, 16  ;;  %vm378_vm1 = vcmp.eq.s32.totalorder %v4353_v38, %v3301_v11  ;;  %vm379_vm14 = vcmp.eq.s32.totalorder %v4353_v38, %v3304_v12 }
 0x1d6   :  { %v2426_v50 = vsel %vm5424_vm6, %v2424_v46, %v2419_v29  ;;  %v949_v35 = vadd.s32 %v948_v23, %v946_v63  ;;  %v959_v48 = vcvt.f32.s32 %v957_v24  ;;  %v979_v55 = vpop.xlane.xlu0 %978  ;;  %v1397_v34 = vcvt.s32.f32 %v1395_v41  ;;  %vm611_vm5 = vmand %vm378_vm1, %vm4357_vm13 }
 0x1d7   :  { %v4517_v45 = vsel %vm3924_vm12, %v4053_v42, 0  ;;  %v4523_v41 = vsel %vm611_vm5, %v4414_v4, 0  ;;  %vm612_vm15 = vmand %vm379_vm14, %vm4357_vm13  ;;  %v1601_v42 = vcvt.s32.f32 %v1599_v39  ;;  %vm2446_vm12 = vcmask 786112  }
 0x1d8   :  { %v2431_v22 = vrot.slane %v949_v35, %v4468_v10  ;;  %v960_v46 = vshll.u32 %v959_v48, 16  ;;  %1388 = vadd.xlane.f32.xlu1 %v1385_v56  ;;  %v4511_v56 = vsub.s32 %v2441_v21, %v3269_v2  ;;  %v1612_v35 = vcvt.s32.f32 %v1610_v54  ;;  %5425 = vst [vmem:[#allocation61_spill] sm:$0xff] %v4523_v41 }
 0x1d9   :  { %1602 = vadd.xlane.f32.xlu0 %v1600_v25  ;;  %v969_v29 = vpop.xlane.xlu1 %968  ;;  %v1622_v48 = vand.u32 65535, %v4501_v32  ;;  %v970_v25 = vcvt.f32.s32 %v967_v53  ;;  %v4531_v21 = vsel %vm612_vm15, %v4414_v4, 0  ;;  %v982_v41 = vcvt.f32.s32 %v979_v55 }
 0x1da   :  { %v2433_v28 = vsel %vm2432_vm7, %v2431_v22, %v2426_v50  ;;  %v961_v63 = vadd.s32 %v960_v46, %v958_v37  ;;  %v971_v23 = vcvt.f32.s32 %v969_v29  ;;  %v991_v24 = vpop.xlane.xlu0 %990  ;;  %5426 = vst [vmem:[#allocation62_spill] sm:$0xff] %v4531_v21  ;;  %v1611_v29 = vshrl.u32 %v4481_v26, 16 }
 0x1db   :  { %v4539_v39 = vsub.s32 %v2448_v51, %v3269_v2  ;;  %vm2453_vm8 = vcmask 851712   ;;  %vm380_vm4 = vcmp.eq.s32.totalorder %v4353_v38, %v3311_v13  ;;  %vm2460_vm0 = vcmask 917312  }
 0x1dc   :  { %v2438_v50 = vrot.slane %v961_v63, %v4484_v40  ;;  %v972_v37 = vshll.u32 %v971_v23, 16  ;;  %1400 = vadd.xlane.f32.xlu1 %v1397_v34  ;;  %v1624_v63 = vcvt.s32.f32 %v1622_v48  ;;  %v2455_v23 = vadd.s32 4294967192, %v3271_v3  ;;  %vm613_vm6 = vmand %vm380_vm4, %vm4357_vm13 }
 0x1dd   :  { %1614 = vadd.xlane.f32.xlu0 %v1612_v35  ;;  %v981_v52 = vpop.xlane.xlu1 %980  ;;  %v1634_v34 = vand.u32 65535, %v4517_v45  ;;  %vm381_vm1 = vcmp.eq.s32.totalorder %v4353_v38, %v3314_v14  ;;  %vm382_vm5 = vcmp.eq.s32.totalorder %v4353_v38, %v3321_v15  ;;  %vm2467_vm15 = vcmask 982912  }
 0x1de   :  { %v2440_v53 = vsel %vm2439_vm3, %v2438_v50, %v2433_v28  ;;  %v973_v54 = vadd.s32 %v972_v37, %v970_v25  ;;  %v983_v22 = vcvt.f32.s32 %v981_v52  ;;  %v1003_v46 = vpop.xlane.xlu0 %1002  ;;  %v1623_v25 = vshrl.u32 %v4501_v32, 16  ;;  %vm614_vm14 = vmand %vm381_vm1, %vm4357_vm13 }
 0x1df   :  { %v1613_v37 = vcvt.s32.f32 %v1611_v29  ;;  %v4548_v51 = vsub.s32 %v2455_v23, %v3269_v2  ;;  %v1636_v52 = vcvt.s32.f32 %v1634_v34  ;;  %v4552_v32 = vsel %vm613_vm6, %v4414_v4, 0  ;;  %vm615_vm4 = vmand %vm382_vm5, %vm4357_vm13 }
 0x1e0   :  { %v2445_v35 = vrot.slane %v973_v54, %v4511_v56  ;;  %v984_v21 = vshll.u32 %v983_v22, 16  ;;  %1604 = vadd.xlane.f32.xlu1 %v1601_v42  ;;  %v1406_v42 = vand.u32 65535, %v3939_v61  ;;  %5427 = vst [vmem:[#allocation63_spill] sm:$0xff] %v4552_v32  ;;  %v994_v54 = vcvt.f32.s32 %v991_v24 }
 0x1e1   :  { %1626 = vadd.xlane.f32.xlu0 %v1624_v63  ;;  %v993_v28 = vpop.xlane.xlu1 %992  ;;  %v1625_v29 = vcvt.s32.f32 %v1623_v25  ;;  %v1635_v24 = vshrl.u32 %v4517_v45, 16  ;;  %v4565_v25 = vsel %vm614_vm14, %v4414_v4, 0  ;;  %vm5231_vm6 = vcmask 1048512  }
 0x1e2   :  { %v2447_v26 = vsel %vm2446_vm12, %v2445_v35, %v2440_v53  ;;  %v985_v48 = vadd.s32 %v984_v21, %v982_v41  ;;  %v995_v50 = vcvt.f32.s32 %v993_v28  ;;  %v1015_v55 = vpop.xlane.xlu0 %1014  ;;  %v2462_v41 = vadd.s32 4294967184, %v3271_v3  ;;  %5428 = vst [vmem:[#allocation64_spill] sm:$0xff] %v4565_v25 }
 0x1e3   :  { %v1408_v28 = vcvt.s32.f32 %v1406_v42  ;;  %vm383_vm1 = vcmp.eq.s32.totalorder %v4353_v38, %v3324_v16  ;;  %vm384_vm5 = vcmp.eq.s32.totalorder %v4353_v38, %v3331_v17 }
 0x1e4   :  { %v2452_v22 = vrot.slane %v985_v48, %v4539_v39  ;;  %v996_v53 = vshll.u32 %v995_v50, 16  ;;  %1616 = vadd.xlane.f32.xlu1 %v1613_v37  ;;  %v2469_v48 = vadd.s32 4294967176, %v3271_v3  ;;  %v1418_v50 = vand.u32 65535, %v3948_v47  ;;  %vm616_vm14 = vmand %vm383_vm1, %vm4357_vm13 }
 0x1e5   :  { %1638 = vadd.xlane.f32.xlu0 %v1636_v52  ;;  %v1005_v21 = vpop.xlane.xlu1 %1004  ;;  %v1006_v37 = vcvt.f32.s32 %v1003_v46  ;;  %v1637_v46 = vcvt.s32.f32 %v1635_v24  ;;  %vm385_vm1 = vcmp.eq.s32.totalorder %v4353_v38, %v3334_v18 }
 0x1e6   :  { %v2454_v63 = vsel %vm2453_vm8, %v2452_v22, %v2447_v26  ;;  %v997_v23 = vadd.s32 %v996_v53, %v994_v54  ;;  %v1007_v34 = vcvt.f32.s32 %v1005_v21  ;;  %v1027_v35 = vpop.xlane.xlu0 %1026  ;;  %v4569_v26 = vsub.s32 %v2462_v41, %v3269_v2 }
 0x1e7   :  { %v1407_v22 = vshrl.u32 %v3939_v61, 16  ;;  %v1420_v41 = vcvt.s32.f32 %v1418_v50  ;;  %v1018_v61 = vcvt.f32.s32 %v1015_v55  ;;  %v5430_v55 = vld [vmem:[#allocation20_spill] sm:$0xff] }
 0x1e8   :  { %v2459_v52 = vrot.slane %v997_v23, %v4548_v51  ;;  %v1008_v54 = vshll.u32 %v1007_v34, 16  ;;  %1628 = vadd.xlane.f32.xlu1 %v1625_v29  ;;  %v4576_v23 = vsub.s32 %v2469_v48, %v3269_v2  ;;  %v5429_v34 = vld [vmem:[#allocation19_spill] sm:$0xff]  ;;  %v1442_v15 = vand.u32 65535, %v5430_v55 }
 0x1e9   :  { %1410 = vadd.xlane.f32.xlu0 %v1408_v28  ;;  %v1017_v45 = vpop.xlane.xlu1 %1016  ;;  %v1430_v29 = vand.u32 65535, %v5429_v34 }
 0x1ea   :  { %v2461_v42 = vsel %vm2460_vm0, %v2459_v52, %v2454_v63  ;;  %v1009_v53 = vadd.s32 %v1008_v54, %v1006_v37  ;;  %v1019_v21 = vcvt.f32.s32 %v1017_v45  ;;  %v1039_v3 = vpop.xlane.xlu0 %1038  ;;  %v4583_v63 = vsel %vm615_vm4, %v4414_v4, 0  ;;  %vm617_vm4 = vmand %vm384_vm5, %vm4357_vm13 }
 0x1eb   :  { %v1409_v37 = vcvt.s32.f32 %v1407_v22  ;;  %v1419_v45 = vshrl.u32 %v3948_v47, 16  ;;  %v1432_v32 = vcvt.s32.f32 %v1430_v29  ;;  %v1431_v22 = vshrl.u32 %v5429_v34, 16  ;;  %vm618_vm5 = vmand %vm385_vm1, %vm4357_vm13 }
 0x1ec   :  { %v2466_v28 = vrot.slane %v1009_v53, %v4569_v26  ;;  %v1020_v25 = vshll.u32 %v1019_v21, 16  ;;  %1640 = vadd.xlane.f32.xlu1 %v1637_v46  ;;  %v1030_v53 = vcvt.f32.s32 %v1027_v35  ;;  %v1444_v35 = vcvt.s32.f32 %v1442_v15 }
 0x1ed   :  { %1422 = vadd.xlane.f32.xlu0 %v1420_v41  ;;  %v1029_v24 = vpop.xlane.xlu1 %1028  ;;  %v1042_v34 = vcvt.f32.s32 %v1039_v3  ;;  %v4608_v3 = vsel %vm617_vm4, %v4414_v4, 0  ;;  %vm386_vm4 = vcmp.eq.s32.totalorder %v4353_v38, %v3341_v19  ;;  %vm387_vm1 = vcmp.eq.s32.totalorder %v4353_v38, %v3344_v20 }
 0x1ee   :  { %v2468_v48 = vsel %vm2467_vm15, %v2466_v28, %v2461_v42  ;;  %v1021_v52 = vadd.s32 %v1020_v25, %v1018_v61  ;;  %v1031_v50 = vcvt.f32.s32 %v1029_v24  ;;  %v1051_v54 = vpop.xlane.xlu0 %1050  ;;  %v1421_v61 = vcvt.s32.f32 %v1419_v45  ;;  %v5431_v28 = vld [vmem:[#allocation21_spill] sm:$0xff]  ;;  %5434 = vst [vmem:[#allocation20_spill] sm:$0xff] %v4608_v3 }
 0x1ef   :  { %v1454_v24 = vand.u32 65535, %v5431_v28  ;;  %v1455_v3 = vshrl.u32 %v5431_v28, 16 }
 0x1f0   :  { %v2473_v21 = vrot.slane %v1021_v52, %v4576_v23  ;;  %v1032_v46 = vshll.u32 %v1031_v50, 16  ;;  %1412 = vadd.xlane.f32.xlu1 %v1409_v37 }
 0x1f1   :  { %1434 = vadd.xlane.f32.xlu0 %v1432_v32  ;;  %v1041_v41 = vpop.xlane.xlu1 %1040  ;;  %v4599_v32 = vsel %vm616_vm14, %v4414_v4, 0  ;;  %v1456_v15 = vcvt.s32.f32 %v1454_v24  ;;  %vm5435_vm14 = vcmask 130112  }
 0x1f2   :  { %v4593_v25 = vsel %vm5231_vm6, %v2473_v21, %v2468_v48  ;;  %v1033_v47 = vadd.s32 %v1032_v46, %v1030_v53  ;;  %v1043_v42 = vcvt.f32.s32 %v1041_v41  ;;  %v1063_v29 = vpop.xlane.xlu0 %1062  ;;  %5432 = vst [vmem:[#allocation19_spill] sm:$0xff] %v4599_v32  ;;  %v1443_v48 = vshrl.u32 %v5430_v55, 16  ;;  %v5433_v46 = vld [vmem:[#allocation22_spill] sm:$0xff] }
 0x1f3   :  { %v1433_v21 = vcvt.s32.f32 %v1431_v22  ;;  %v1466_v41 = vand.u32 65535, %v5433_v46  ;;  %vm5442_vm6 = vcmask 261312  }
 0x1f4   :  { %v1044_v37 = vshll.u32 %v1043_v42, 16  ;;  %1424 = vadd.xlane.f32.xlu1 %v1421_v61  ;;  %v2479_v42 = vrot.slane %v1033_v47, %v4327_v0  ;;  %v1054_v61 = vcvt.f32.s32 %v1051_v54  ;;  %v5436_v47 = vld [vmem:[#allocation23_spill] sm:$0xff] }
 0x1f5   :  { %1446 = vadd.xlane.f32.xlu0 %v1444_v35  ;;  %v1053_v52 = vpop.xlane.xlu1 %1052  ;;  %v1468_v54 = vcvt.s32.f32 %v1466_v41 }
 0x1f6   :  { %v1045_v50 = vadd.s32 %v1044_v37, %v1042_v34  ;;  %v1055_v45 = vcvt.f32.s32 %v1053_v52  ;;  %v1075_v53 = vpop.xlane.xlu0 %1074  ;;  %v1445_v37 = vcvt.s32.f32 %v1443_v48  ;;  %v1066_v48 = vcvt.f32.s32 %v1063_v29 }
 0x1f7   :  { %v1457_v29 = vcvt.s32.f32 %v1455_v3 }
 0x1f8   :  { %v2483_v55 = vrot.slane %v1045_v50, %v4330_v49  ;;  %v1056_v35 = vshll.u32 %v1055_v45, 16  ;;  %1436 = vadd.xlane.f32.xlu1 %v1433_v21  ;;  %v1478_v50 = vand.u32 65535, %v5436_v47  ;;  %v4620_v45 = vsel %vm618_vm5, %v4414_v4, 0  ;;  %vm619_vm5 = vmand %vm386_vm4, %vm4357_vm13 }
 0x1f9   :  { %1458 = vadd.xlane.f32.xlu0 %v1456_v15  ;;  %v1065_v34 = vpop.xlane.xlu1 %1064  ;;  %5437 = vst [vmem:[#allocation21_spill] sm:$0xff] %v4620_v45  ;;  %v4634_v45 = vsel %vm619_vm5, %v4414_v4, 0  ;;  %vm5448_vm4 = vcmask 458112   ;;  %vm5452_vm5 = vcmask 589312  }
 0x1fa   :  { %v2484_v22 = vsel %vm5435_vm14, %v2483_v55, %v2479_v42  ;;  %v1057_v24 = vadd.s32 %v1056_v35, %v1054_v61  ;;  %v1067_v52 = vcvt.f32.s32 %v1065_v34  ;;  %v1087_v32 = vpop.xlane.xlu0 %1086  ;;  %v1467_v61 = vshrl.u32 %v5433_v46, 16  ;;  %5440 = vst [vmem:[#allocation22_spill] sm:$0xff] %v4634_v45 }
 0x1fb   :  { %vm5438_vm14 = vcmask 195712   ;;  %v1480_v34 = vcvt.s32.f32 %v1478_v50 }
 0x1fc   :  { %v2488_v21 = vrot.slane %v1057_v24, %v4334_v59  ;;  %v1068_v15 = vshll.u32 %v1067_v52, 16  ;;  %1448 = vadd.xlane.f32.xlu1 %v1445_v37  ;;  %v5439_v24 = vld [vmem:[#allocation24_spill] sm:$0xff]  ;;  %v1078_v37 = vcvt.f32.s32 %v1075_v53  ;;  %v1469_v3 = vcvt.s32.f32 %v1467_v61 }
 0x1fd   :  { %1470 = vadd.xlane.f32.xlu0 %v1468_v54  ;;  %v1077_v42 = vpop.xlane.xlu1 %1076  ;;  %v1490_v52 = vand.u32 65535, %v5439_v24 }
 0x1fe   :  { %v2489_v28 = vsel %vm5438_vm14, %v2488_v21, %v2484_v22  ;;  %v1069_v41 = vadd.s32 %v1068_v15, %v1066_v48  ;;  %v1079_v55 = vcvt.f32.s32 %v1077_v42  ;;  %v1099_v35 = vpop.xlane.xlu0 %1098  ;;  %vm620_vm14 = vmand %vm387_vm1, %vm4357_vm13  ;;  %v1479_v15 = vshrl.u32 %v5436_v47, 16  ;;  %v5445_v47 = vld [vmem:[#allocation26_spill] sm:$0xff] }
 0x1ff   :  { %v4639_v22 = vsel %vm620_vm14, %v4414_v4, 0  ;;  %v1492_v42 = vcvt.s32.f32 %v1490_v52  ;;  %v1491_v4 = vshrl.u32 %v5439_v24, 16  ;;  %vm5444_vm13 = vcmask 326912  }
 0x200   :  { %v2493_v46 = vrot.slane %v1069_v41, %v4347_v58  ;;  %v1080_v54 = vshll.u32 %v1079_v55, 16  ;;  %1460 = vadd.xlane.f32.xlu1 %v1457_v29  ;;  %5441 = vst [vmem:[#allocation23_spill] sm:$0xff] %v4639_v22  ;;  %v5443_v41 = vld [vmem:[#allocation25_spill] sm:$0xff]  ;;  %v1090_v29 = vcvt.f32.s32 %v1087_v32  ;;  %v1514_v52 = vand.u32 65535, %v5445_v47 }
 0x201   :  { %1482 = vadd.xlane.f32.xlu0 %v1480_v34  ;;  %v1089_v38 = vpop.xlane.xlu1 %1088  ;;  %v1502_v55 = vand.u32 65535, %v5443_v41  ;;  %v1102_v22 = vcvt.f32.s32 %v1099_v35  ;;  %vm5450_vm1 = vcmask 523712   ;;  %vm3029_vm14 = vcmask 1041409  }
 0x202   :  { %v2494_v50 = vsel %vm5442_vm6, %v2493_v46, %v2489_v28  ;;  %v1081_v48 = vadd.s32 %v1080_v54, %v1078_v37  ;;  %v1091_v53 = vcvt.f32.s32 %v1089_v38  ;;  %v1111_v21 = vpop.xlane.xlu0 %1110  ;;  %v1481_v54 = vcvt.s32.f32 %v1479_v15  ;;  %v5447_v15 = vld [vmem:[#allocation28_spill] sm:$0xff] }
 0x203   :  { %v1504_v38 = vcvt.s32.f32 %v1502_v55  ;;  %vm5446_vm6 = vcmask 392512   ;;  %v1526_v55 = vand.u32 65535, %v5447_v15 }
 0x204   :  { %v2498_v33 = vrot.slane %v1081_v48, %v4365_v36  ;;  %v1092_v45 = vshll.u32 %v1091_v53, 16  ;;  %1472 = vadd.xlane.f32.xlu1 %v1469_v3  ;;  %v1493_v48 = vcvt.s32.f32 %v1491_v4 }
 0x205   :  { %1494 = vadd.xlane.f32.xlu0 %v1492_v42  ;;  %v1101_v61 = vpop.xlane.xlu1 %1100 }
 0x206   :  { %v2499_v34 = vsel %vm5444_vm13, %v2498_v33, %v2494_v50  ;;  %v1093_v28 = vadd.s32 %v1092_v45, %v1090_v29  ;;  %v1103_v37 = vcvt.f32.s32 %v1101_v61  ;;  %v1123_v46 = vpop.xlane.xlu0 %1122  ;;  %v1503_v45 = vshrl.u32 %v5443_v41, 16  ;;  %v5449_v41 = vld [vmem:[#allocation29_spill] sm:$0xff] }
 0x207   :  { %v1516_v29 = vcvt.s32.f32 %v1514_v52  ;;  %v1114_v33 = vcvt.f32.s32 %v1111_v21  ;;  %v1538_v52 = vand.u32 65535, %v5449_v41  ;;  %vm5460_vm13 = vcmask 1048512  }
 0x208   :  { %v2503_v32 = vrot.slane %v1093_v28, %v4375_v43  ;;  %v1104_v20 = vshll.u32 %v1103_v37, 16  ;;  %1484 = vadd.xlane.f32.xlu1 %v1481_v54  ;;  %v1515_v37 = vshrl.u32 %v5445_v47, 16  ;;  %v1505_v54 = vcvt.s32.f32 %v1503_v45  ;;  %v5451_v45 = vld [vmem:[#allocation30_spill] sm:$0xff] }
 0x209   :  { %1506 = vadd.xlane.f32.xlu0 %v1504_v38  ;;  %v1113_v3 = vpop.xlane.xlu1 %1112  ;;  %v1528_v38 = vcvt.s32.f32 %v1526_v55  ;;  %v1550_v55 = vand.u32 65535, %v5451_v45 }
 0x20a   :  { %v2504_v53 = vsel %vm5446_vm6, %v2503_v32, %v2499_v34  ;;  %v1105_v24 = vadd.s32 %v1104_v20, %v1102_v22  ;;  %v1115_v42 = vcvt.f32.s32 %v1113_v3  ;;  %v1135_v50 = vpop.xlane.xlu0 %1134  ;;  %v1126_v32 = vcvt.f32.s32 %v1123_v46 }
 0x20b   :  { %vm5463_vm6 = vcmask 130112  }
 0x20c   :  { %v2508_v35 = vrot.slane %v1105_v24, %v4382_v27  ;;  %v1116_v61 = vshll.u32 %v1115_v42, 16  ;;  %1496 = vadd.xlane.f32.xlu1 %v1493_v48  ;;  %v1517_v24 = vcvt.s32.f32 %v1515_v37 }
 0x20d   :  { %1518 = vadd.xlane.f32.xlu0 %v1516_v29  ;;  %v1125_v28 = vpop.xlane.xlu1 %1124 }
 0x20e   :  { %v2509_v4 = vsel %vm5448_vm4, %v2508_v35, %v2504_v53  ;;  %v1117_v34 = vadd.s32 %v1116_v61, %v1114_v33  ;;  %v1127_v20 = vcvt.f32.s32 %v1125_v28  ;;  %v1147_v22 = vpop.xlane.xlu0 %1146  ;;  %v1527_v33 = vshrl.u32 %v5447_v15, 16  ;;  %v5453_v15 = vld [vmem:[#allocation31_spill] sm:$0xff] }
 0x20f   :  { %v1540_v35 = vcvt.s32.f32 %v1538_v52  ;;  %v1138_v61 = vcvt.f32.s32 %v1135_v50  ;;  %v1562_v52 = vand.u32 65535, %v5453_v15  ;;  %vm5465_vm4 = vcmask 195712  }
 0x210   :  { %v2513_v21 = vrot.slane %v1117_v34, %v4392_v30  ;;  %v1128_v3 = vshll.u32 %v1127_v20, 16  ;;  %1508 = vadd.xlane.f32.xlu1 %v1505_v54  ;;  %v1539_v20 = vshrl.u32 %v5449_v41, 16 }
 0x211   :  { %1530 = vadd.xlane.f32.xlu0 %v1528_v38  ;;  %v1137_v48 = vpop.xlane.xlu1 %1136 }
 0x212   :  { %v2514_v42 = vsel %vm5450_vm1, %v2513_v21, %v2509_v4  ;;  %v1129_v47 = vadd.s32 %v1128_v3, %v1126_v32  ;;  %v1139_v29 = vcvt.f32.s32 %v1137_v48  ;;  %v1159_v53 = vpop.xlane.xlu0 %1158  ;;  %v1529_v32 = vcvt.s32.f32 %v1527_v33  ;;  %v5454_v33 = vld [vmem:[#allocation32_spill] sm:$0xff] }
 0x213   :  { %v1552_v21 = vcvt.s32.f32 %v1550_v55  ;;  %v1150_v3 = vcvt.f32.s32 %v1147_v22  ;;  %v1574_v55 = vand.u32 65535, %v5454_v33  ;;  %vm5467_vm1 = vcmask 261312  }
 0x214   :  { %v2518_v46 = vrot.slane %v1129_v47, %v4407_v44  ;;  %v1140_v28 = vshll.u32 %v1139_v29, 16  ;;  %1520 = vadd.xlane.f32.xlu1 %v1517_v24  ;;  %v1551_v47 = vshrl.u32 %v5451_v45, 16 }
 0x215   :  { %1542 = vadd.xlane.f32.xlu0 %v1540_v35  ;;  %v1149_v34 = vpop.xlane.xlu1 %1148 }
 0x216   :  { %v2519_v37 = vsel %vm5452_vm5, %v2518_v46, %v2514_v42  ;;  %v1141_v4 = vadd.s32 %v1140_v28, %v1138_v61  ;;  %v1151_v54 = vcvt.f32.s32 %v1149_v34  ;;  %v1171_v38 = vpop.xlane.xlu0 %1170  ;;  %v1541_v61 = vcvt.s32.f32 %v1539_v20  ;;  %v5455_v20 = vld [vmem:[#allocation33_spill] sm:$0xff] }
 0x217   :  { %v1564_v46 = vcvt.s32.f32 %v1562_v52  ;;  %v1162_v28 = vcvt.f32.s32 %v1159_v53  ;;  %v1586_v52 = vand.u32 65535, %v5455_v20  ;;  %vm5469_vm5 = vcmask 326912  }
 0x218   :  { %v2523_v50 = vrot.slane %v1141_v4, %v4468_v10  ;;  %v1152_v48 = vshll.u32 %v1151_v54, 16  ;;  %1532 = vadd.xlane.f32.xlu1 %v1529_v32  ;;  %v1553_v54 = vcvt.s32.f32 %v1551_v47 }
 0x219   :  { %1554 = vadd.xlane.f32.xlu0 %v1552_v21  ;;  %v1161_v24 = vpop.xlane.xlu1 %1160 }
 0x21a   :  { %v2524_v41 = vsel %vm2432_vm7, %v2523_v50, %v2519_v37  ;;  %v1153_v29 = vadd.s32 %v1152_v48, %v1150_v3  ;;  %v1163_v42 = vcvt.f32.s32 %v1161_v24  ;;  %v1183_v35 = vpop.xlane.xlu0 %1182  ;;  %v1563_v3 = vshrl.u32 %v5453_v15, 16  ;;  %v5456_v15 = vld [vmem:[#allocation34_spill] sm:$0xff] }
 0x21b   :  { %v1576_v50 = vcvt.s32.f32 %v1574_v55  ;;  %v1174_v48 = vcvt.f32.s32 %v1171_v38  ;;  %v1646_v55 = vand.u32 65535, %v5456_v15 }
 0x21c   :  { %v2528_v22 = vrot.slane %v1153_v29, %v4484_v40  ;;  %v1164_v34 = vshll.u32 %v1163_v42, 16  ;;  %1544 = vadd.xlane.f32.xlu1 %v1541_v61  ;;  %v1575_v42 = vshrl.u32 %v5454_v33, 16 }
 0x21d   :  { %1566 = vadd.xlane.f32.xlu0 %v1564_v46  ;;  %v1173_v4 = vpop.xlane.xlu1 %1172 }
 0x21e   :  { %v2529_v32 = vsel %vm2439_vm3, %v2528_v22, %v2524_v41  ;;  %v1165_v45 = vadd.s32 %v1164_v34, %v1162_v28  ;;  %v1175_v21 = vcvt.f32.s32 %v1173_v4  ;;  %v1195_v37 = vpop.xlane.xlu0 %1194  ;;  %v1565_v28 = vcvt.s32.f32 %v1563_v3  ;;  %v5457_v3 = vld [vmem:[#allocation35_spill] sm:$0xff] }
 0x21f   :  { %v1588_v22 = vcvt.s32.f32 %v1586_v52  ;;  %v1186_v34 = vcvt.f32.s32 %v1183_v35  ;;  %v1658_v52 = vand.u32 65535, %v5457_v3 }
 0x220   :  { %v2533_v53 = vrot.slane %v1165_v45, %v4511_v56  ;;  %v1176_v24 = vshll.u32 %v1175_v21, 16  ;;  %1556 = vadd.xlane.f32.xlu1 %v1553_v54  ;;  %v1577_v45 = vcvt.s32.f32 %v1575_v42 }
 0x221   :  { %1578 = vadd.xlane.f32.xlu0 %v1576_v50  ;;  %v1185_v29 = vpop.xlane.xlu1 %1184 }
 0x222   :  { %v2534_v47 = vsel %vm2446_vm12, %v2533_v53, %v2529_v32  ;;  %v1177_v41 = vadd.s32 %v1176_v24, %v1174_v48  ;;  %v1187_v61 = vcvt.f32.s32 %v1185_v29  ;;  %v1207_v46 = vpop.xlane.xlu0 %1206  ;;  %v1587_v48 = vshrl.u32 %v5455_v20, 16  ;;  %v5458_v20 = vld [vmem:[#allocation36_spill] sm:$0xff] }
 0x223   :  { %v1648_v53 = vcvt.s32.f32 %v1646_v55  ;;  %v1198_v24 = vcvt.f32.s32 %v1195_v37  ;;  %v1670_v55 = vand.u32 65535, %v5458_v20 }
 0x224   :  { %v2538_v38 = vrot.slane %v1177_v41, %v4539_v39  ;;  %v1188_v4 = vshll.u32 %v1187_v61, 16  ;;  %1568 = vadd.xlane.f32.xlu1 %v1565_v28  ;;  %v1647_v61 = vshrl.u32 %v5456_v15, 16 }
 0x225   :  { %1590 = vadd.xlane.f32.xlu0 %v1588_v22  ;;  %v1197_v54 = vpop.xlane.xlu1 %1196 }
 0x226   :  { %v2539_v21 = vsel %vm2453_vm8, %v2538_v38, %v2534_v47  ;;  %v1189_v33 = vadd.s32 %v1188_v4, %v1186_v34  ;;  %v1199_v50 = vcvt.f32.s32 %v1197_v54  ;;  %v1219_v32 = vpop.xlane.xlu0 %1218  ;;  %v1589_v34 = vcvt.s32.f32 %v1587_v48  ;;  %v5459_v48 = vld [vmem:[#allocation37_spill] sm:$0xff] }
 0x227   :  { %v1660_v38 = vcvt.s32.f32 %v1658_v52  ;;  %v1210_v4 = vcvt.f32.s32 %v1207_v46  ;;  %v1682_v52 = vand.u32 65535, %v5459_v48 }
 0x228   :  { %v2543_v35 = vrot.slane %v1189_v33, %v4548_v51  ;;  %v1200_v29 = vshll.u32 %v1199_v50, 16  ;;  %1580 = vadd.xlane.f32.xlu1 %v1577_v45  ;;  %v1659_v33 = vshrl.u32 %v5457_v3, 16 }
 0x229   :  { %1650 = vadd.xlane.f32.xlu0 %v1648_v53  ;;  %v1209_v41 = vpop.xlane.xlu1 %1208 }
 0x22a   :  { %v2544_v42 = vsel %vm2460_vm0, %v2543_v35, %v2539_v21  ;;  %v1201_v47 = vadd.s32 %v1200_v29, %v1198_v24  ;;  %v1211_v28 = vcvt.f32.s32 %v1209_v41  ;;  %v1231_v22 = vpop.xlane.xlu0 %1230  ;;  %v1649_v24 = vcvt.s32.f32 %v1647_v61 }
 0x22b   :  { %v1672_v35 = vcvt.s32.f32 %v1670_v55  ;;  %v1222_v29 = vcvt.f32.s32 %v1219_v32  ;;  %v1684_v55 = vcvt.s32.f32 %v1682_v52  ;;  %v5461_v32 = vld [vmem:[#allocation38_spill] sm:$0xff] }
 0x22c   :  { %v2548_v37 = vrot.slane %v1201_v47, %v4569_v26  ;;  %v1212_v54 = vshll.u32 %v1211_v28, 16  ;;  %1592 = vadd.xlane.f32.xlu1 %v1589_v34  ;;  %v1661_v28 = vcvt.s32.f32 %v1659_v33 }
 0x22d   :  { %1662 = vadd.xlane.f32.xlu0 %v1660_v38  ;;  %v1221_v45 = vpop.xlane.xlu1 %1220 }
 0x22e   :  { %v2549_v15 = vsel %vm2467_vm15, %v2548_v37, %v2544_v42  ;;  %v1213_v50 = vadd.s32 %v1212_v54, %v1210_v4  ;;  %v1223_v21 = vcvt.f32.s32 %v1221_v45  ;;  %v1243_v53 = vpop.xlane.xlu0 %1242  ;;  %v1671_v4 = vshrl.u32 %v5458_v20, 16 }
 0x22f   :  { %v1694_v37 = vand.u32 65535, %v5461_v32  ;;  %v1234_v54 = vcvt.f32.s32 %v1231_v22 }
 0x230   :  { %v2553_v46 = vrot.slane %v1213_v50, %v4576_v23  ;;  %v1224_v41 = vshll.u32 %v1223_v21, 16  ;;  %1652 = vadd.xlane.f32.xlu1 %v1649_v24 }
 0x231   :  { %1674 = vadd.xlane.f32.xlu0 %v1672_v35  ;;  %v1233_v47 = vpop.xlane.xlu1 %1232  ;;  %v1683_v35 = vshrl.u32 %v5459_v48, 16 }
 0x232   :  { %v2554_v3 = vsel %vm5460_vm13, %v2553_v46, %v2549_v15  ;;  %v1225_v34 = vadd.s32 %v1224_v41, %v1222_v29  ;;  %v1235_v42 = vcvt.f32.s32 %v1233_v47  ;;  %v1255_v38 = vpop.xlane.xlu0 %1254  ;;  %v1673_v15 = vcvt.s32.f32 %v1671_v4  ;;  %v5462_v46 = vld [vmem:[#allocation39_spill] sm:$0xff] }
 0x233   :  { %v4692_v61 = vsel %vm3029_vm14, %v2554_v3, %v4593_v25  ;;  %v1696_v29 = vcvt.s32.f32 %v1694_v37  ;;  %v1706_v20 = vand.u32 65535, %v5462_v46  ;;  %v1246_v41 = vcvt.f32.s32 %v1243_v53 }
 0x234   :  { %v1236_v45 = vshll.u32 %v1235_v42, 16  ;;  %1664 = vadd.xlane.f32.xlu1 %v1661_v28  ;;  %v2558_v25 = vrot.slane %v1225_v34, %v4327_v0  ;;  %v1695_v28 = vshrl.u32 %v5461_v32, 16  ;;  %v1685_v48 = vcvt.s32.f32 %v1683_v35  ;;  %v5466_v35 = vld [vmem:[#allocation41_spill] sm:$0xff] }
 0x235   :  { %1686 = vadd.xlane.f32.xlu0 %v1684_v55  ;;  %v1245_v50 = vpop.xlane.xlu1 %1244  ;;  %v1708_v37 = vcvt.s32.f32 %v1706_v20  ;;  %v1730_v20 = vand.u32 65535, %v5466_v35  ;;  %vm5471_vm14 = vcmask 392512   ;;  %vm5473_vm13 = vcmask 458112  }
 0x236   :  { %v1237_v21 = vadd.s32 %v1236_v45, %v1234_v54  ;;  %v1247_v33 = vcvt.f32.s32 %v1245_v50  ;;  %v1267_v24 = vpop.xlane.xlu0 %1266  ;;  %v5464_v54 = vld [vmem:[#allocation40_spill] sm:$0xff]  ;;  %v1258_v50 = vcvt.f32.s32 %v1255_v38 }
 0x237   :  { %v1718_v45 = vand.u32 65535, %v5464_v54 }
 0x238   :  { %v2562_v52 = vrot.slane %v1237_v21, %v4330_v49  ;;  %v1248_v47 = vshll.u32 %v1247_v33, 16  ;;  %1676 = vadd.xlane.f32.xlu1 %v1673_v15  ;;  %v1707_v33 = vshrl.u32 %v5462_v46, 16 }
 0x239   :  { %1698 = vadd.xlane.f32.xlu0 %v1696_v29  ;;  %v1257_v22 = vpop.xlane.xlu1 %1256 }
 0x23a   :  { %v2563_v3 = vsel %vm5463_vm6, %v2562_v52, %v2558_v25  ;;  %v1249_v42 = vadd.s32 %v1248_v47, %v1246_v41  ;;  %v1259_v4 = vcvt.f32.s32 %v1257_v22  ;;  %v1279_v55 = vpop.xlane.xlu0 %1278  ;;  %v1697_v41 = vcvt.s32.f32 %v1695_v28  ;;  %v5468_v28 = vld [vmem:[#allocation42_spill] sm:$0xff] }
 0x23b   :  { %v1720_v52 = vcvt.s32.f32 %v1718_v45  ;;  %v1270_v47 = vcvt.f32.s32 %v1267_v24  ;;  %v1742_v45 = vand.u32 65535, %v5468_v28  ;;  %vm5476_vm6 = vcmask 523712  }
 0x23c   :  { %v2567_v53 = vrot.slane %v1249_v42, %v4334_v59  ;;  %v1260_v34 = vshll.u32 %v1259_v4, 16  ;;  %1688 = vadd.xlane.f32.xlu1 %v1685_v48  ;;  %v1709_v4 = vcvt.s32.f32 %v1707_v33 }
 0x23d   :  { %1710 = vadd.xlane.f32.xlu0 %v1708_v37  ;;  %v1269_v21 = vpop.xlane.xlu1 %1268 }
 0x23e   :  { %v2568_v32 = vsel %vm5465_vm4, %v2567_v53, %v2563_v3  ;;  %v1261_v15 = vadd.s32 %v1260_v34, %v1258_v50  ;;  %v1271_v29 = vcvt.f32.s32 %v1269_v21  ;;  %v1291_v25 = vpop.xlane.xlu0 %1290  ;;  %v1719_v50 = vshrl.u32 %v5464_v54, 16  ;;  %v5470_v54 = vld [vmem:[#allocation43_spill] sm:$0xff] }
 0x23f   :  { %v1732_v53 = vcvt.s32.f32 %v1730_v20  ;;  %v1282_v34 = vcvt.f32.s32 %v1279_v55  ;;  %v1754_v20 = vand.u32 65535, %v5470_v54 }
 0x240   :  { %v2572_v38 = vrot.slane %v1261_v15, %v4347_v58  ;;  %v1272_v22 = vshll.u32 %v1271_v29, 16  ;;  %1700 = vadd.xlane.f32.xlu1 %v1697_v41  ;;  %v1731_v29 = vshrl.u32 %v5466_v35, 16 }
 0x241   :  { %1722 = vadd.xlane.f32.xlu0 %v1720_v52  ;;  %v1281_v42 = vpop.xlane.xlu1 %1280 }
 0x242   :  { %v2573_v48 = vsel %vm5467_vm1, %v2572_v38, %v2568_v32  ;;  %v1273_v46 = vadd.s32 %v1272_v22, %v1270_v47  ;;  %v1283_v37 = vcvt.f32.s32 %v1281_v42  ;;  %v1303_v3 = vpop.xlane.xlu0 %1302  ;;  %v1721_v47 = vcvt.s32.f32 %v1719_v50  ;;  %v5472_v50 = vld [vmem:[#allocation44_spill] sm:$0xff] }
 0x243   :  { %v1744_v38 = vcvt.s32.f32 %v1742_v45  ;;  %v1294_v22 = vcvt.f32.s32 %v1291_v25  ;;  %v1766_v45 = vand.u32 65535, %v5472_v50 }
 0x244   :  { %v2577_v24 = vrot.slane %v1273_v46, %v4365_v36  ;;  %v1284_v21 = vshll.u32 %v1283_v37, 16  ;;  %1712 = vadd.xlane.f32.xlu1 %v1709_v4  ;;  %v1733_v46 = vcvt.s32.f32 %v1731_v29 }
 0x245   :  { %1734 = vadd.xlane.f32.xlu0 %v1732_v53  ;;  %v1293_v15 = vpop.xlane.xlu1 %1292 }
 0x246   :  { %v2578_v33 = vsel %vm5469_vm5, %v2577_v24, %v2573_v48  ;;  %v1285_v32 = vadd.s32 %v1284_v21, %v1282_v34  ;;  %v1295_v41 = vcvt.f32.s32 %v1293_v15  ;;  %v1315_v52 = vpop.xlane.xlu0 %1314  ;;  %v1743_v34 = vshrl.u32 %v5468_v28, 16 }
 0x247   :  { %v1756_v24 = vcvt.s32.f32 %v1754_v20  ;;  %v1306_v21 = vcvt.f32.s32 %v1303_v3  ;;  %v5474_v3 = vld [vmem:[#allocation45_spill] sm:$0xff]  ;;  %vm3031_vm5 = vcmask 1042434  }
 0x248   :  { %v2582_v55 = vrot.slane %v1285_v32, %v4375_v43  ;;  %v1296_v42 = vshll.u32 %v1295_v41, 16  ;;  %1724 = vadd.xlane.f32.xlu1 %v1721_v47  ;;  %v4721_v32 = vrot.slane %v4385_v60, %v3374_v57  ;;  %v1745_v20 = vcvt.s32.f32 %v1743_v34 }
 0x249   :  { %1746 = vadd.xlane.f32.xlu0 %v1744_v38  ;;  %v1305_v4 = vpop.xlane.xlu1 %1304 }
 0x24a   :  { %v2583_v37 = vsel %vm5471_vm14, %v2582_v55, %v2578_v33  ;;  %v1297_v35 = vadd.s32 %v1296_v42, %v1294_v22  ;;  %v1307_v53 = vcvt.f32.s32 %v1305_v4  ;;  %v1327_v48 = vpop.xlane.xlu0 %1326  ;;  %v1755_v33 = vshrl.u32 %v5470_v54, 16 }
 0x24b   :  { %v1768_v22 = vcvt.s32.f32 %v1766_v45  ;;  %v1778_v55 = vand.u32 65535, %v5474_v3  ;;  %v1318_v42 = vcvt.f32.s32 %v1315_v52  ;;  %v1767_v45 = vshrl.u32 %v5472_v50, 16 }
 0x24c   :  { %v2587_v25 = vrot.slane %v1297_v35, %v4382_v27  ;;  %v1308_v15 = vshll.u32 %v1307_v53, 16  ;;  %1736 = vadd.xlane.f32.xlu1 %v1733_v46  ;;  %v782_v35 = vsel %vm4187_vm10, %v4721_v32, 0  ;;  %v1757_v53 = vcvt.s32.f32 %v1755_v33 }
 0x24d   :  { %1758 = vadd.xlane.f32.xlu0 %v1756_v24  ;;  %v1317_v29 = vpop.xlane.xlu1 %1316  ;;  %v1790_v52 = vand.u32 65535, %v782_v35  ;;  %vm5478_vm10 = vcmask 589312   ;;  %vm5491_vm14 = vcmask 1048512  }
 0x24e   :  { %v2588_v41 = vsel %vm5473_vm13, %v2587_v25, %v2583_v37  ;;  %v1309_v47 = vadd.s32 %v1308_v15, %v1306_v21  ;;  %v1319_v28 = vcvt.f32.s32 %v1317_v29  ;;  %v1339_v38 = vpop.xlane.xlu0 %1338  ;;  %v1780_v25 = vcvt.s32.f32 %v1778_v55 }
 0x24f   :  { %v1330_v15 = vcvt.f32.s32 %v1327_v48  ;;  %v1769_v55 = vcvt.s32.f32 %v1767_v45  ;;  %v1342_v60 = vcvt.f32.s32 %v1339_v38  ;;  %v1791_v45 = vshrl.u32 %v782_v35, 16 }
 0x250   :  { %v2592_v4 = vrot.slane %v1309_v47, %v4392_v30  ;;  %v1320_v46 = vshll.u32 %v1319_v28, 16  ;;  %1748 = vadd.xlane.f32.xlu1 %v1745_v20  ;;  %v783_v20 = vsel %vm4194_vm2, %v4721_v32, 0 }
 0x251   :  { %1770 = vadd.xlane.f32.xlu0 %v1768_v22  ;;  %v1329_v54 = vpop.xlane.xlu1 %1328  ;;  %v1802_v48 = vand.u32 65535, %v783_v20  ;;  %v1793_v35 = vcvt.s32.f32 %v1791_v45 }
 0x252   :  { %v2593_v37 = vsel %vm5476_vm6, %v2592_v4, %v2588_v41  ;;  %v1321_v24 = vadd.s32 %v1320_v46, %v1318_v42  ;;  %v1331_v21 = vcvt.f32.s32 %v1329_v54  ;;  %v1351_v34 = vpop.xlane.xlu0 %1350  ;;  %v1779_v41 = vshrl.u32 %v5474_v3, 16 }
 0x253   :  { %v1792_v46 = vcvt.s32.f32 %v1790_v52  ;;  %v1804_v52 = vcvt.s32.f32 %v1802_v48  ;;  %v1354_v38 = vcvt.f32.s32 %v1351_v34 }
 0x254   :  { %v2597_v29 = vrot.slane %v1321_v24, %v4407_v44  ;;  %v1332_v47 = vshll.u32 %v1331_v21, 16  ;;  %1760 = vadd.xlane.f32.xlu1 %v1757_v53  ;;  %v784_v21 = vsel %vm4203_vm11, %v4721_v32, 0  ;;  %v1781_v3 = vcvt.s32.f32 %v1779_v41 }
 0x255   :  { %1782 = vadd.xlane.f32.xlu0 %v1780_v25  ;;  %v1341_v33 = vpop.xlane.xlu1 %1340  ;;  %v1814_v28 = vand.u32 65535, %v784_v21  ;;  %v1803_v41 = vshrl.u32 %v783_v20, 16  ;;  %v1815_v20 = vshrl.u32 %v784_v21, 16 }
 0x256   :  { %v2598_v22 = vsel %vm5478_vm10, %v2597_v29, %v2593_v37  ;;  %v1333_v42 = vadd.s32 %v1332_v47, %v1330_v15  ;;  %v1343_v4 = vcvt.f32.s32 %v1341_v33  ;;  %v1363_v50 = vpop.xlane.xlu0 %1362  ;;  %vm5497_vm10 = vcmask 130112  }
 0x257   :  { %v1816_v48 = vcvt.s32.f32 %v1814_v28  ;;  %v1366_v34 = vcvt.f32.s32 %v1363_v50  ;;  %v1805_v45 = vcvt.s32.f32 %v1803_v41  ;;  %v1817_v21 = vcvt.s32.f32 %v1815_v20 }
 0x258   :  { %v2602_v54 = vrot.slane %v1333_v42, %v4468_v10  ;;  %v1344_v53 = vshll.u32 %v1343_v4, 16  ;;  %1772 = vadd.xlane.f32.xlu1 %v1769_v55  ;;  %v785_v55 = vsel %vm4213_vm9, %v4721_v32, 0 }
 0x259   :  { %1794 = vadd.xlane.f32.xlu0 %v1792_v46  ;;  %v1353_v25 = vpop.xlane.xlu1 %1352  ;;  %v1826_v24 = vand.u32 65535, %v785_v55  ;;  %v1827_v41 = vshrl.u32 %v785_v55, 16 }
 0x25a   :  { %v2603_v37 = vsel %vm2432_vm7, %v2602_v54, %v2598_v22  ;;  %v1345_v15 = vadd.s32 %v1344_v53, %v1342_v60  ;;  %v1355_v29 = vcvt.f32.s32 %v1353_v25  ;;  %v1375_v47 = vpop.xlane.xlu0 %1374 }
 0x25b   :  { %v1828_v28 = vcvt.s32.f32 %v1826_v24  ;;  %v1378_v50 = vcvt.f32.s32 %v1375_v47  ;;  %v1829_v55 = vcvt.s32.f32 %v1827_v41 }
 0x25c   :  { %v2607_v33 = vrot.slane %v1345_v15, %v4484_v40  ;;  %v1356_v42 = vshll.u32 %v1355_v29, 16  ;;  %1784 = vadd.xlane.f32.xlu1 %v1781_v3  ;;  %v5481_v3 = vld [vmem:[#allocation49_spill] sm:$0xff] }
 0x25d   :  { %1806 = vadd.xlane.f32.xlu0 %v1804_v52  ;;  %v1365_v46 = vpop.xlane.xlu1 %1364  ;;  %vm5482_vm2 = vnez %v5481_v3 }
 0x25e   :  { %v2608_v22 = vsel %vm2439_vm3, %v2607_v33, %v2603_v37  ;;  %v1357_v60 = vadd.s32 %v1356_v42, %v1354_v38  ;;  %v1367_v54 = vcvt.f32.s32 %v1365_v46  ;;  %v1387_v53 = vpop.xlane.xlu0 %1386  ;;  %v786_v29 = vsel %vm5482_vm2, %v4721_v32, 0 }
 0x25f   :  { %v1838_v4 = vand.u32 65535, %v786_v29  ;;  %v1390_v47 = vcvt.f32.s32 %v1387_v53  ;;  %v1839_v20 = vshrl.u32 %v786_v29, 16 }
 0x260   :  { %v2612_v25 = vrot.slane %v1357_v60, %v4511_v56  ;;  %v1368_v15 = vshll.u32 %v1367_v54, 16  ;;  %1796 = vadd.xlane.f32.xlu1 %v1793_v35  ;;  %v5483_v54 = vld [vmem:[#allocation50_spill] sm:$0xff] }
 0x261   :  { %1818 = vadd.xlane.f32.xlu0 %v1816_v48  ;;  %v1377_v52 = vpop.xlane.xlu1 %1376  ;;  %vm5484_vm11 = vnez %v5483_v54  ;;  %v1840_v24 = vcvt.s32.f32 %v1838_v4  ;;  %v1841_v41 = vcvt.s32.f32 %v1839_v20 }
 0x262   :  { %v2613_v37 = vsel %vm2446_vm12, %v2612_v25, %v2608_v22  ;;  %v1369_v38 = vadd.s32 %v1368_v15, %v1366_v34  ;;  %v1379_v33 = vcvt.f32.s32 %v1377_v52  ;;  %v1399_v42 = vpop.xlane.xlu0 %1398  ;;  %v787_v35 = vsel %vm5484_vm11, %v4721_v32, 0 }
 0x263   :  { %v1850_v3 = vand.u32 65535, %v787_v35  ;;  %v1402_v53 = vcvt.f32.s32 %v1399_v42  ;;  %v1851_v29 = vshrl.u32 %v787_v35, 16  ;;  %v5489_v42 = vld [vmem:[#allocation53_spill] sm:$0xff]  ;;  %vm5500_vm11 = vcmask 195712  }
 0x264   :  { %v2617_v46 = vrot.slane %v1369_v38, %v4539_v39  ;;  %v1380_v60 = vshll.u32 %v1379_v33, 16  ;;  %1808 = vadd.xlane.f32.xlu1 %v1805_v45  ;;  %v5485_v33 = vld [vmem:[#allocation51_spill] sm:$0xff]  ;;  %vm5490_vm1 = vnez %v5489_v42 }
 0x265   :  { %1830 = vadd.xlane.f32.xlu0 %v1828_v28  ;;  %v1389_v48 = vpop.xlane.xlu1 %1388  ;;  %vm5486_vm9 = vnez %v5485_v33  ;;  %v1852_v4 = vcvt.s32.f32 %v1850_v3 }
 0x266   :  { %v2618_v22 = vsel %vm2453_vm8, %v2617_v46, %v2613_v37  ;;  %v1381_v34 = vadd.s32 %v1380_v60, %v1378_v50  ;;  %v1391_v25 = vcvt.f32.s32 %v1389_v48  ;;  %v1603_v15 = vpop.xlane.xlu0 %1602  ;;  %v788_v45 = vsel %vm5486_vm9, %v4721_v32, 0 }
 0x267   :  { %v1862_v54 = vand.u32 65535, %v788_v45 }
 0x268   :  { %v2622_v52 = vrot.slane %v1381_v34, %v4548_v51  ;;  %v1392_v38 = vshll.u32 %v1391_v25, 16  ;;  %1820 = vadd.xlane.f32.xlu1 %v1817_v21  ;;  %v5487_v21 = vld [vmem:[#allocation52_spill] sm:$0xff] }
 0x269   :  { %1842 = vadd.xlane.f32.xlu0 %v1840_v24  ;;  %v1401_v28 = vpop.xlane.xlu1 %1400  ;;  %vm5488_vm4 = vnez %v5487_v21  ;;  %v1864_v3 = vcvt.s32.f32 %v1862_v54  ;;  %v1853_v54 = vcvt.s32.f32 %v1851_v29 }
 0x26a   :  { %v2623_v37 = vsel %vm2460_vm0, %v2622_v52, %v2618_v22  ;;  %v1393_v50 = vadd.s32 %v1392_v38, %v1390_v47  ;;  %v1403_v46 = vcvt.f32.s32 %v1401_v28  ;;  %v1615_v60 = vpop.xlane.xlu0 %1614  ;;  %v789_v25 = vsel %vm5488_vm4, %v4721_v32, 0 }
 0x26b   :  { %v1874_v33 = vand.u32 65535, %v789_v25  ;;  %v790_v28 = vsel %vm5490_vm1, %v4721_v32, 0  ;;  %vm5504_vm4 = vcmask 261312  }
 0x26c   :  { %v2627_v48 = vrot.slane %v1393_v50, %v4569_v26  ;;  %v1404_v34 = vshll.u32 %v1403_v46, 16  ;;  %1832 = vadd.xlane.f32.xlu1 %v1829_v55  ;;  %v1606_v50 = vcvt.f32.s32 %v1603_v15  ;;  %v1618_v15 = vcvt.f32.s32 %v1615_v60 }
 0x26d   :  { %1854 = vadd.xlane.f32.xlu0 %v1852_v4  ;;  %v1605_v24 = vpop.xlane.xlu1 %1604  ;;  %v1863_v4 = vshrl.u32 %v788_v45, 16  ;;  %v1876_v21 = vcvt.s32.f32 %v1874_v33 }
 0x26e   :  { %v2628_v22 = vsel %vm2467_vm15, %v2627_v48, %v2623_v37  ;;  %v1405_v47 = vadd.s32 %v1404_v34, %v1402_v53  ;;  %v1607_v52 = vcvt.f32.s32 %v1605_v24  ;;  %v1627_v38 = vpop.xlane.xlu0 %1626  ;;  %v1886_v24 = vand.u32 65535, %v790_v28 }
 0x270   :  { %v2632_v46 = vrot.slane %v1405_v47, %v4576_v23  ;;  %v1608_v55 = vshll.u32 %v1607_v52, 16  ;;  %1844 = vadd.xlane.f32.xlu1 %v1841_v41  ;;  %v5493_v47 = vld [vmem:[#allocation54_spill] sm:$0xff]  ;;  %v1888_v29 = vcvt.s32.f32 %v1886_v24 }
 0x271   :  { %1866 = vadd.xlane.f32.xlu0 %v1864_v3  ;;  %v1617_v35 = vpop.xlane.xlu1 %1616  ;;  %vm5494_vm13 = vnez %v5493_v47 }
 0x272   :  { %v2633_v37 = vsel %vm5491_vm14, %v2632_v46, %v2628_v22  ;;  %v1609_v53 = vadd.s32 %v1608_v55, %v1606_v50  ;;  %v1619_v48 = vcvt.f32.s32 %v1617_v35  ;;  %v1639_v20 = vpop.xlane.xlu0 %1638  ;;  %v791_v52 = vsel %vm5494_vm13, %v4721_v32, 0  ;;  %vm5513_vm13 = vmmov %vm5497_vm10 }
 0x273   :  { %v4774_v34 = vsel %vm3031_vm5, %v2633_v37, %v4692_v61  ;;  %v1865_v50 = vcvt.s32.f32 %v1863_v4  ;;  %v1875_v46 = vshrl.u32 %v789_v25, 16  ;;  %v1898_v55 = vand.u32 65535, %v791_v52  ;;  %v5495_v61 = vld [vmem:[#allocation55_spill] sm:$0xff] }
 0x274   :  { %5492 = vst [vmem:[#allocation24_spill] sm:$0xff] %v4774_v34  ;;  %v1620_v42 = vshll.u32 %v1619_v48, 16  ;;  %1856 = vadd.xlane.f32.xlu1 %v1853_v54  ;;  %vm5496_vm6 = vnez %v5495_v61  ;;  %v2716_v60 = vrot.slane %v1609_v53, %v4327_v0  ;;  %v1630_v35 = vcvt.f32.s32 %v1627_v38  ;;  %v5498_v38 = vld [vmem:[#allocation56_spill] sm:$0xff] }
 0x275   :  { %1878 = vadd.xlane.f32.xlu0 %v1876_v21  ;;  %v1629_v45 = vpop.xlane.xlu1 %1628  ;;  %v792_v33 = vsel %vm5496_vm6, %v4721_v32, 0  ;;  %v1887_v21 = vshrl.u32 %v790_v28, 16  ;;  %v1900_v47 = vcvt.s32.f32 %v1898_v55  ;;  %v1642_v61 = vcvt.f32.s32 %v1639_v20 }
 0x276   :  { %v1621_v41 = vadd.s32 %v1620_v42, %v1618_v15  ;;  %v1631_v22 = vcvt.f32.s32 %v1629_v45  ;;  %v1411_v3 = vpop.xlane.xlu0 %1410  ;;  %v1877_v42 = vcvt.s32.f32 %v1875_v46  ;;  %v1910_v45 = vand.u32 65535, %v792_v33 }
 0x277   :  { %vm5499_vm2 = vnez %v5498_v38  ;;  %v1899_v28 = vshrl.u32 %v791_v52, 16  ;;  %v1889_v46 = vcvt.s32.f32 %v1887_v21  ;;  %v1414_v20 = vcvt.f32.s32 %v1411_v3 }
 0x278   :  { %v2720_v37 = vrot.slane %v1621_v41, %v4330_v49  ;;  %v1632_v48 = vshll.u32 %v1631_v22, 16  ;;  %1868 = vadd.xlane.f32.xlu1 %v1865_v50  ;;  %v793_v41 = vsel %vm5499_vm2, %v4721_v32, 0  ;;  %v1912_v55 = vcvt.s32.f32 %v1910_v45 }
 0x279   :  { %1890 = vadd.xlane.f32.xlu0 %v1888_v29  ;;  %v1641_v54 = vpop.xlane.xlu1 %1640 }
 0x27a   :  { %v2721_v15 = vsel %vm5497_vm10, %v2720_v37, %v2716_v60  ;;  %v1633_v4 = vadd.s32 %v1632_v48, %v1630_v35  ;;  %v1643_v25 = vcvt.f32.s32 %v1641_v54  ;;  %v1423_v24 = vpop.xlane.xlu0 %1422  ;;  %v1922_v37 = vand.u32 65535, %v793_v41 }
 0x27c   :  { %v2725_v34 = vrot.slane %v1633_v4, %v4334_v59  ;;  %v1644_v53 = vshll.u32 %v1643_v25, 16  ;;  %1880 = vadd.xlane.f32.xlu1 %v1877_v42  ;;  %v5501_v4 = vld [vmem:[#allocation57_spill] sm:$0xff] }
 0x27d   :  { %1902 = vadd.xlane.f32.xlu0 %v1900_v47  ;;  %v1413_v22 = vpop.xlane.xlu1 %1412  ;;  %vm5502_vm9 = vnez %v5501_v4  ;;  %v5503_v42 = vld [vmem:[#allocation17_spill] sm:$0xff] }
 0x27e   :  { %v2726_v50 = vsel %vm5500_vm11, %v2725_v34, %v2721_v15  ;;  %v1645_v29 = vadd.s32 %v1644_v53, %v1642_v61  ;;  %v1415_v60 = vcvt.f32.s32 %v1413_v22  ;;  %v1435_v35 = vpop.xlane.xlu0 %1434  ;;  %v794_v25 = vsel %vm5502_vm9, %v4721_v32, 0 }
 0x27f   :  { %v225_v52 = vcombine.high %v5503_v42, %v5503_v42  ;;  %v1901_v15 = vcvt.s32.f32 %v1899_v28  ;;  %v1911_v61 = vshrl.u32 %v792_v33, 16  ;;  %v1924_v53 = vcvt.s32.f32 %v1922_v37 }
 0x280   :  { %v2730_v48 = vrot.slane %v1645_v29, %v4347_v58  ;;  %v1416_v54 = vshll.u32 %v1415_v60, 16  ;;  %1892 = vadd.xlane.f32.xlu1 %v1889_v46  ;;  %v1934_v38 = vand.u32 65535, %v794_v25  ;;  %v1426_v22 = vcvt.f32.s32 %v1423_v24  ;;  %v5505_v60 = vld [vmem:[#allocation58_spill] sm:$0xff] }
 0x281   :  { %1914 = vadd.xlane.f32.xlu0 %v1912_v55  ;;  %v1425_v34 = vpop.xlane.xlu1 %1424  ;;  %vm5506_vm1 = vnez %v5505_v60  ;;  %v5507_v55 = vld [vmem:[#allocation12_spill] sm:$0xff] }
 0x282   :  { %v4797_v47 = vsel %vm5504_vm4, %v2730_v48, %v2726_v50  ;;  %v1417_v21 = vadd.s32 %v1416_v54, %v1414_v20  ;;  %v1427_v45 = vcvt.f32.s32 %v1425_v34  ;;  %v1447_v3 = vpop.xlane.xlu0 %1446  ;;  %v795_v46 = vsel %vm5506_vm1, %v4721_v32, 0  ;;  %v5508_v34 = vld [vmem:[#allocation59_spill] sm:$0xff] }
 0x283   :  { %v480_v4 = vrot.slane %v5507_v55, %v3374_v57  ;;  %v1923_v50 = vshrl.u32 %v793_v41, 16  ;;  %v4805_v20 = vrot.slane %v225_v52, %v3374_v57  ;;  %v1913_v54 = vcvt.s32.f32 %v1911_v61 }
 0x284   :  { %v1428_v29 = vshll.u32 %v1427_v45, 16  ;;  %1904 = vadd.xlane.f32.xlu1 %v1901_v15  ;;  %v1936_v24 = vcvt.s32.f32 %v1934_v38  ;;  %v1946_v42 = vand.u32 65535, %v795_v46  ;;  %vm5509_vm5 = vnez %v5508_v34  ;;  %v5510_v45 = vld [vmem:[#allocation27_spill] sm:$0xff] }
 0x285   :  { %1926 = vadd.xlane.f32.xlu0 %v1924_v53  ;;  %v1437_v28 = vpop.xlane.xlu1 %1436  ;;  %v796_v15 = vsel %vm5509_vm5, %v4721_v32, 0  ;;  %v667_v60 = vcombine.high %v5510_v45, %v5510_v45  ;;  %v2637_v53 = vrot.slane %v1417_v21, %v4327_v0  ;;  %v1438_v55 = vcvt.f32.s32 %v1435_v35 }
 0x286   :  { %v1429_v48 = vadd.s32 %v1428_v29, %v1426_v22  ;;  %v1439_v33 = vcvt.f32.s32 %v1437_v28  ;;  %v1459_v37 = vpop.xlane.xlu0 %1458  ;;  %vm4814_vm14 = vcmp.eq.s32.totalorder %v480_v4, 1  ;;  %v1925_v38 = vcvt.s32.f32 %v1923_v50 }
 0x287   :  { %v1935_v29 = vshrl.u32 %v794_v25, 16  ;;  %vm356_vm6 = vcmp.eq.s32.totalorder %v4805_v20, %v3269_v2  ;;  %v1948_v35 = vcvt.s32.f32 %v1946_v42  ;;  %v1958_v21 = vand.u32 65535, %v796_v15 }
 0x288   :  { %v2641_v41 = vrot.slane %v1429_v48, %v4330_v49  ;;  %v1440_v52 = vshll.u32 %v1439_v33, 16  ;;  %1916 = vadd.xlane.f32.xlu1 %v1913_v54  ;;  %v5514_v48 = vld [vmem:[#allocation60_spill] sm:$0xff]  ;;  %v1450_v33 = vcvt.f32.s32 %v1447_v3  ;;  %v4826_v25 = vrot.slane %v667_v60, %v3374_v57  ;;  %vm589_vm2 = vmand %vm356_vm6, %vm4814_vm14 }
 0x289   :  { %1938 = vadd.xlane.f32.xlu0 %v1936_v24  ;;  %v1449_v61 = vpop.xlane.xlu1 %1448  ;;  %vm5515_vm10 = vnez %v5514_v48  ;;  %vm357_vm9 = vcmp.eq.s32.totalorder %v4805_v20, %v3274_v5  ;;  %vm5516_vm1 = vcmask 261312   ;;  %vm358_vm5 = vcmp.eq.s32.totalorder %v4805_v20, %v3279_v6 }
 0x28a   :  { %v2642_v28 = vsel %vm5513_vm13, %v2641_v41, %v2637_v53  ;;  %v1441_v34 = vadd.s32 %v1440_v52, %v1438_v55  ;;  %v1451_v19 = vcvt.f32.s32 %v1449_v61  ;;  %v1471_v45 = vpop.xlane.xlu0 %1470  ;;  %v797_v4 = vsel %vm5515_vm10, %v4721_v32, 0  ;;  %vm590_vm4 = vmand %vm357_vm9, %vm4814_vm14 }
 0x28b   :  { %v1937_v53 = vcvt.s32.f32 %v1935_v29  ;;  %v1947_v55 = vshrl.u32 %v795_v46, 16  ;;  %v1970_v3 = vand.u32 65535, %v797_v4  ;;  %v1462_v52 = vcvt.f32.s32 %v1459_v37  ;;  %vm591_vm13 = vmand %vm358_vm5, %vm4814_vm14 }
 0x28c   :  { %v2646_v54 = vrot.slane %v1441_v34, %v4334_v59  ;;  %v1452_v24 = vshll.u32 %v1451_v19, 16  ;;  %1928 = vadd.xlane.f32.xlu1 %v1925_v38  ;;  %v1960_v19 = vcvt.s32.f32 %v1958_v21  ;;  %v798_v46 = vsel %vm589_vm2, %v4826_v25, 0 }
 0x28d   :  { %1950 = vadd.xlane.f32.xlu0 %v1948_v35  ;;  %v1461_v50 = vpop.xlane.xlu1 %1460  ;;  %v1949_v38 = vcvt.s32.f32 %v1947_v55  ;;  %v1959_v29 = vshrl.u32 %v796_v15, 16  ;;  %v1972_v37 = vcvt.s32.f32 %v1970_v3  ;;  %v1982_v21 = vand.u32 65535, %v798_v46 }
 0x28e   :  { %v2647_v2 = vsel %vm5500_vm11, %v2646_v54, %v2642_v28  ;;  %v1453_v42 = vadd.s32 %v1452_v24, %v1450_v33  ;;  %v1463_v41 = vcvt.f32.s32 %v1461_v50  ;;  %v1483_v32 = vpop.xlane.xlu0 %1482  ;;  %v1474_v48 = vcvt.f32.s32 %v1471_v45 }
 0x28f   :  { %v799_v15 = vsel %vm590_vm4, %v4826_v25, 0  ;;  %v1961_v50 = vcvt.s32.f32 %v1959_v29  ;;  %vm5517_vm6 = vcmask 326912   ;;  %vm359_vm10 = vcmp.eq.s32.totalorder %v4805_v20, %v3282_v7 }
 0x290   :  { %v2651_v57 = vrot.slane %v1453_v42, %v4347_v58  ;;  %v1464_v60 = vshll.u32 %v1463_v41, 16  ;;  %1940 = vadd.xlane.f32.xlu1 %v1937_v53  ;;  %v1971_v53 = vshrl.u32 %v797_v4, 16  ;;  %v1984_v45 = vcvt.s32.f32 %v1982_v21  ;;  %vm592_vm2 = vmand %vm359_vm10, %vm4814_vm14 }
 0x291   :  { %1962 = vadd.xlane.f32.xlu0 %v1960_v19  ;;  %v1473_v61 = vpop.xlane.xlu1 %1472  ;;  %v1994_v41 = vand.u32 65535, %v799_v15  ;;  %v1486_v19 = vcvt.f32.s32 %v1483_v32  ;;  %v800_v4 = vsel %vm591_vm13, %v4826_v25, 0  ;;  %vm5518_vm11 = vcmask 392512  }
 0x292   :  { %v2652_v28 = vsel %vm5516_vm1, %v2651_v57, %v2647_v2  ;;  %v1465_v34 = vadd.s32 %v1464_v60, %v1462_v52  ;;  %v1475_v5 = vcvt.f32.s32 %v1473_v61  ;;  %v1495_v35 = vpop.xlane.xlu0 %1494  ;;  %v1973_v60 = vcvt.s32.f32 %v1971_v53 }
 0x293   :  { %v1983_v61 = vshrl.u32 %v798_v46, 16  ;;  %vm360_vm9 = vcmp.eq.s32.totalorder %v4805_v20, %v3285_v8  ;;  %v1996_v32 = vcvt.s32.f32 %v1994_v41  ;;  %v801_v46 = vsel %vm592_vm2, %v4826_v25, 0 }
 0x294   :  { %v2656_v33 = vrot.slane %v1465_v34, %v4365_v36  ;;  %v1476_v54 = vshll.u32 %v1475_v5, 16  ;;  %1952 = vadd.xlane.f32.xlu1 %v1949_v38  ;;  %v2006_v34 = vand.u32 65535, %v800_v4  ;;  %v1498_v5 = vcvt.f32.s32 %v1495_v35  ;;  %vm593_vm4 = vmand %vm360_vm9, %vm4814_vm14 }
 0x295   :  { %1974 = vadd.xlane.f32.xlu0 %v1972_v37  ;;  %v1485_v24 = vpop.xlane.xlu1 %1484  ;;  %vm5519_vm1 = vcmask 458112   ;;  %vm361_vm5 = vcmp.eq.s32.totalorder %v4805_v20, %v3294_v9  ;;  %vm362_vm10 = vcmp.eq.s32.totalorder %v4805_v20, %v3301_v11  ;;  %vm363_vm9 = vcmp.eq.s32.totalorder %v4805_v20, %v3304_v12 }
 0x296   :  { %v2657_v55 = vsel %vm5517_vm6, %v2656_v33, %v2652_v28  ;;  %v1477_v2 = vadd.s32 %v1476_v54, %v1474_v48  ;;  %v1487_v6 = vcvt.f32.s32 %v1485_v24  ;;  %v1507_v42 = vpop.xlane.xlu0 %1506  ;;  %v1985_v33 = vcvt.s32.f32 %v1983_v61  ;;  %vm594_vm13 = vmand %vm361_vm5, %vm4814_vm14 }
 0x297   :  { %v1995_v54 = vshrl.u32 %v799_v15, 16  ;;  %v2008_v35 = vcvt.s32.f32 %v2006_v34  ;;  %v802_v15 = vsel %vm593_vm4, %v4826_v25, 0  ;;  %vm5520_vm6 = vcmask 523712   ;;  %vm595_vm2 = vmand %vm362_vm10, %vm4814_vm14 }
 0x298   :  { %v2661_v3 = vrot.slane %v1477_v2, %v4375_v43  ;;  %v1488_v52 = vshll.u32 %v1487_v6, 16  ;;  %1964 = vadd.xlane.f32.xlu1 %v1961_v50  ;;  %v1510_v2 = vcvt.f32.s32 %v1507_v42  ;;  %v2030_v61 = vand.u32 65535, %v802_v15  ;;  %vm596_vm4 = vmand %vm363_vm9, %vm4814_vm14 }
 0x299   :  { %1986 = vadd.xlane.f32.xlu0 %v1984_v45  ;;  %v1497_v57 = vpop.xlane.xlu1 %1496  ;;  %vm364_vm5 = vcmp.eq.s32.totalorder %v4805_v20, %v3311_v13  ;;  %vm5527_vm10 = vcmask 392512  }
 0x29a   :  { %v2662_v38 = vsel %vm5518_vm11, %v2661_v3, %v2657_v55  ;;  %v1489_v29 = vadd.s32 %v1488_v52, %v1486_v19  ;;  %v1499_v7 = vcvt.f32.s32 %v1497_v57  ;;  %v1519_v28 = vpop.xlane.xlu0 %1518  ;;  %v2018_v55 = vand.u32 65535, %v801_v46 }
 0x29b   :  { %v1997_v19 = vcvt.s32.f32 %v1995_v54  ;;  %v2007_v3 = vshrl.u32 %v800_v4, 16  ;;  %v803_v4 = vsel %vm594_vm13, %v4826_v25, 0  ;;  %vm5521_vm11 = vcmask 589312   ;;  %vm597_vm13 = vmand %vm364_vm5, %vm4814_vm14 }
 0x29c   :  { %v2666_v37 = vrot.slane %v1489_v29, %v4382_v27  ;;  %v1500_v21 = vshll.u32 %v1499_v7, 16  ;;  %1976 = vadd.xlane.f32.xlu1 %v1973_v60  ;;  %v2020_v42 = vcvt.s32.f32 %v2018_v55  ;;  %vm5533_vm5 = vcmask 589312  }
 0x29d   :  { %1998 = vadd.xlane.f32.xlu0 %v1996_v32  ;;  %v1509_v48 = vpop.xlane.xlu1 %1508  ;;  %v2009_v34 = vcvt.s32.f32 %v2007_v3 }
 0x29e   :  { %v2667_v24 = vsel %vm5519_vm1, %v2666_v37, %v2662_v38  ;;  %v1501_v50 = vadd.s32 %v1500_v21, %v1498_v5  ;;  %v1511_v8 = vcvt.f32.s32 %v1509_v48  ;;  %v1531_v53 = vpop.xlane.xlu0 %1530  ;;  %v1522_v38 = vcvt.f32.s32 %v1519_v28 }
 0x29f   :  { %v2019_v5 = vshrl.u32 %v801_v46, 16  ;;  %v2032_v28 = vcvt.s32.f32 %v2030_v61  ;;  %v1534_v54 = vcvt.f32.s32 %v1531_v53  ;;  %v804_v46 = vsel %vm595_vm2, %v4826_v25, 0 }
 0x2a0   :  { %v2671_v6 = vrot.slane %v1501_v50, %v4392_v30  ;;  %v1512_v45 = vshll.u32 %v1511_v8, 16  ;;  %1988 = vadd.xlane.f32.xlu1 %v1985_v33  ;;  %v2042_v33 = vand.u32 65535, %v803_v4  ;;  %v2054_v53 = vand.u32 65535, %v804_v46 }
 0x2a1   :  { %2010 = vadd.xlane.f32.xlu0 %v2008_v35  ;;  %v1521_v41 = vpop.xlane.xlu1 %1520  ;;  %v2021_v35 = vcvt.s32.f32 %v2019_v5  ;;  %vm5525_vm1 = vcmask 1048512   ;;  %vm365_vm2 = vcmp.eq.s32.totalorder %v4805_v20, %v3314_v14 }
 0x2a2   :  { %v2672_v52 = vsel %vm5520_vm6, %v2671_v6, %v2667_v24  ;;  %v1513_v57 = vadd.s32 %v1512_v45, %v1510_v2  ;;  %v1523_v9 = vcvt.f32.s32 %v1521_v41  ;;  %v1543_v60 = vpop.xlane.xlu0 %1542  ;;  %v2031_v45 = vshrl.u32 %v802_v15, 16  ;;  %vm598_vm9 = vmand %vm365_vm2, %vm4814_vm14 }
 0x2a3   :  { %v2044_v41 = vcvt.s32.f32 %v2042_v33  ;;  %v2056_v15 = vcvt.s32.f32 %v2054_v53  ;;  %vm5526_vm6 = vcmask 326912   ;;  %vm368_vm2 = vcmp.eq.s32.totalorder %v4805_v20, %v3331_v17 }
 0x2a4   :  { %v2676_v29 = vrot.slane %v1513_v57, %v4407_v44  ;;  %v1524_v7 = vshll.u32 %v1523_v9, 16  ;;  %2000 = vadd.xlane.f32.xlu1 %v1997_v19  ;;  %v1546_v19 = vcvt.f32.s32 %v1543_v60  ;;  %v4882_v57 = vsel %vm596_vm4, %v4826_v25, 0 }
 0x2a5   :  { %2022 = vadd.xlane.f32.xlu0 %v2020_v42  ;;  %v1533_v32 = vpop.xlane.xlu1 %1532  ;;  %v2043_v42 = vshrl.u32 %v803_v4, 16  ;;  %vm5531_vm4 = vcmask 523712  }
 0x2a6   :  { %v2677_v37 = vsel %vm5521_vm11, %v2676_v29, %v2672_v52  ;;  %v1525_v21 = vadd.s32 %v1524_v7, %v1522_v38  ;;  %v1535_v11 = vcvt.f32.s32 %v1533_v32  ;;  %v1555_v48 = vpop.xlane.xlu0 %1554  ;;  %v2033_v32 = vcvt.s32.f32 %v2031_v45 }
 0x2a7   :  { %v1558_v60 = vcvt.f32.s32 %v1555_v48  ;;  %vm5529_vm11 = vcmask 458112  }
 0x2a8   :  { %v2681_v24 = vrot.slane %v1525_v21, %v4468_v10  ;;  %v1536_v50 = vshll.u32 %v1535_v11, 16  ;;  %2012 = vadd.xlane.f32.xlu1 %v2009_v34  ;;  %v2066_v34 = vand.u32 65535, %v4882_v57  ;;  %v2055_v11 = vshrl.u32 %v804_v46, 16 }
 0x2a9   :  { %2034 = vadd.xlane.f32.xlu0 %v2032_v28  ;;  %v1545_v8 = vpop.xlane.xlu1 %1544 }
 0x2aa   :  { %v2682_v55 = vsel %vm2432_vm7, %v2681_v24, %v2677_v37  ;;  %v1537_v2 = vadd.s32 %v1536_v50, %v1534_v54  ;;  %v1547_v6 = vcvt.f32.s32 %v1545_v8  ;;  %v1567_v12 = vpop.xlane.xlu0 %1566  ;;  %v2045_v24 = vcvt.s32.f32 %v2043_v42 }
 0x2ab   :  { %v2068_v50 = vcvt.s32.f32 %v2066_v34  ;;  %v2187_v8 = vshrl.u32 %v4424_v62, 16 }
 0x2ac   :  { %v2686_v3 = vrot.slane %v1537_v2, %v4484_v40  ;;  %v1548_v52 = vshll.u32 %v1547_v6, 16  ;;  %2024 = vadd.xlane.f32.xlu1 %v2021_v35  ;;  %v1570_v35 = vcvt.f32.s32 %v1567_v12  ;;  %v2057_v6 = vcvt.s32.f32 %v2055_v11  ;;  %v5524_v11 = vld [vmem:[#allocation18_spill] sm:$0xff] }
 0x2ad   :  { %2046 = vadd.xlane.f32.xlu0 %v2044_v41  ;;  %v1557_v9 = vpop.xlane.xlu1 %1556 }
 0x2ae   :  { %v2687_v61 = vsel %vm2439_vm3, %v2686_v3, %v2682_v55  ;;  %v1549_v38 = vadd.s32 %v1548_v52, %v1546_v19  ;;  %v1559_v29 = vcvt.f32.s32 %v1557_v9  ;;  %v1579_v7 = vpop.xlane.xlu0 %1578  ;;  %v5522_v19 = vld [vmem:[#allocation13_spill] sm:$0xff]  ;;  %v2189_v52 = vcvt.s32.f32 %v2187_v8 }
 0x2af   :  { %v2175_v3 = vshrl.u32 %v5522_v19, 16  ;;  %v2174_v9 = vand.u32 65535, %v5522_v19  ;;  %v1582_v42 = vcvt.f32.s32 %v1579_v7 }
 0x2b0   :  { %v2691_v5 = vrot.slane %v1549_v38, %v4511_v56  ;;  %v1560_v37 = vshll.u32 %v1559_v29, 16  ;;  %2036 = vadd.xlane.f32.xlu1 %v2033_v32  ;;  %v5523_v29 = vld [vmem:[#allocation16_spill] sm:$0xff] }
 0x2b1   :  { %2058 = vadd.xlane.f32.xlu0 %v2056_v15  ;;  %v1569_v21 = vpop.xlane.xlu1 %1568  ;;  %v2199_v32 = vshrl.u32 %v5523_v29, 16 }
 0x2b2   :  { %v2692_v28 = vsel %vm2446_vm12, %v2691_v5, %v2687_v61  ;;  %v1561_v4 = vadd.s32 %v1560_v37, %v1558_v60  ;;  %v1571_v33 = vcvt.f32.s32 %v1569_v21  ;;  %v1591_v54 = vpop.xlane.xlu0 %1590  ;;  %v2177_v37 = vcvt.s32.f32 %v2175_v3 }
 0x2b3   :  { %v2176_v21 = vcvt.s32.f32 %v2174_v9 }
 0x2b4   :  { %v2696_v55 = vrot.slane %v1561_v4, %v4539_v39  ;;  %v1572_v48 = vshll.u32 %v1571_v33, 16  ;;  %2048 = vadd.xlane.f32.xlu1 %v2045_v24  ;;  %v1594_v4 = vcvt.f32.s32 %v1591_v54 }
 0x2b5   :  { %2070 = vadd.xlane.f32.xlu0 %v2068_v50  ;;  %v1581_v2 = vpop.xlane.xlu1 %1580  ;;  %v2186_v50 = vand.u32 65535, %v4424_v62 }
 0x2b6   :  { %v2697_v45 = vsel %vm2453_vm8, %v2696_v55, %v2692_v28  ;;  %v1573_v46 = vadd.s32 %v1572_v48, %v1570_v35  ;;  %v1583_v41 = vcvt.f32.s32 %v1581_v2  ;;  %v1651_v53 = vpop.xlane.xlu0 %1650  ;;  %v2211_v28 = vshrl.u32 %v5524_v11, 16 }
 0x2b7   :  { %v2201_v2 = vcvt.s32.f32 %v2199_v32  ;;  %v2188_v3 = vcvt.s32.f32 %v2186_v50 }
 0x2b8   :  { %v2701_v12 = vrot.slane %v1573_v46, %v4548_v51  ;;  %v1584_v61 = vshll.u32 %v1583_v41, 16  ;;  %2060 = vadd.xlane.f32.xlu1 %v2057_v6  ;;  %v2213_v6 = vcvt.s32.f32 %v2211_v28  ;;  %v1654_v46 = vcvt.f32.s32 %v1651_v53 }
 0x2b9   :  { %2192 = vadd.xlane.f32.xlu0 %v2189_v52  ;;  %v1593_v38 = vpop.xlane.xlu1 %1592  ;;  %v2198_v52 = vand.u32 65535, %v5523_v29  ;;  %v2235_v53 = vshrl.u32 %v4495_v31, 16  ;;  %v2210_v29 = vand.u32 65535, %v5524_v11  ;;  %v4918_v11 = vsel %vm597_vm13, %v4826_v25, 0 }
 0x2ba   :  { %v2702_v15 = vsel %vm2460_vm0, %v2701_v12, %v2697_v45  ;;  %v1585_v34 = vadd.s32 %v1584_v61, %v1582_v42  ;;  %v1595_v60 = vcvt.f32.s32 %v1593_v38  ;;  %v1663_v5 = vpop.xlane.xlu0 %1662  ;;  %v2223_v45 = vshrl.u32 %v4474_v1, 16 }
 0x2bb   :  { %v1666_v38 = vcvt.f32.s32 %v1663_v5  ;;  %v2200_v28 = vcvt.s32.f32 %v2198_v52  ;;  %v2222_v5 = vand.u32 65535, %v4474_v1  ;;  %v2079_v1 = vshrl.u32 %v4918_v11, 16 }
 0x2bc   :  { %v2706_v7 = vrot.slane %v1585_v34, %v4569_v26  ;;  %v1596_v33 = vshll.u32 %v1595_v60, 16  ;;  %2180 = vadd.xlane.f32.xlu1 %v2177_v37  ;;  %v2225_v61 = vcvt.s32.f32 %v2223_v45 }
 0x2bd   :  { %2178 = vadd.xlane.f32.xlu0 %v2176_v21  ;;  %v1653_v24 = vpop.xlane.xlu1 %1652  ;;  %v2224_v45 = vcvt.s32.f32 %v2222_v5  ;;  %v4935_v5 = vsel %vm598_vm9, %v4826_v25, 0  ;;  %vm369_vm9 = vcmp.eq.s32.totalorder %v4805_v20, %v3334_v18 }
 0x2be   :  { %v2707_v8 = vsel %vm2467_vm15, %v2706_v7, %v2702_v15  ;;  %v1597_v35 = vadd.s32 %v1596_v33, %v1594_v4  ;;  %v1655_v55 = vcvt.f32.s32 %v1653_v24  ;;  %v1675_v48 = vpop.xlane.xlu0 %1674  ;;  %v2237_v4 = vcvt.s32.f32 %v2235_v53 }
 0x2bf   :  { %v1678_v7 = vcvt.f32.s32 %v1675_v48  ;;  %v2081_v53 = vcvt.s32.f32 %v2079_v1 }
 0x2c0   :  { %v2711_v54 = vrot.slane %v1597_v35, %v4576_v23  ;;  %v1656_v41 = vshll.u32 %v1655_v55, 16  ;;  %2204 = vadd.xlane.f32.xlu1 %v2201_v2 }
 0x2c1   :  { %2216 = vadd.xlane.f32.xlu0 %v2213_v6  ;;  %v1665_v19 = vpop.xlane.xlu1 %1664  ;;  %v2067_v6 = vshrl.u32 %v4882_v57, 16 }
 0x2c2   :  { %v4904_v62 = vsel %vm5525_vm1, %v2711_v54, %v2707_v8  ;;  %v1657_v9 = vadd.s32 %v1656_v41, %v1654_v46  ;;  %v1667_v42 = vcvt.f32.s32 %v1665_v19  ;;  %v1687_v12 = vpop.xlane.xlu0 %1686  ;;  %v2212_v8 = vcvt.s32.f32 %v2210_v29  ;;  %v5528_v19 = vld [vmem:[#allocation61_spill] sm:$0xff] }
 0x2c3   :  { %v1690_v48 = vcvt.f32.s32 %v1687_v12 }
 0x2c4   :  { %v2735_v32 = vrot.slane %v1657_v9, %v4365_v36  ;;  %v1668_v15 = vshll.u32 %v1667_v42, 16  ;;  %2190 = vadd.xlane.f32.xlu1 %v2188_v3  ;;  %v2247_v3 = vshrl.u32 %v5528_v19, 16 }
 0x2c5   :  { %2228 = vadd.xlane.f32.xlu0 %v2225_v61  ;;  %v1677_v34 = vpop.xlane.xlu1 %1676  ;;  %v2069_v61 = vcvt.s32.f32 %v2067_v6 }
 0x2c6   :  { %v2736_v60 = vsel %vm5526_vm6, %v2735_v32, %v4797_v47  ;;  %v1669_v37 = vadd.s32 %v1668_v15, %v1666_v38  ;;  %v1679_v13 = vcvt.f32.s32 %v1677_v34  ;;  %v1699_v21 = vpop.xlane.xlu0 %1698  ;;  %v5530_v38 = vld [vmem:[#allocation62_spill] sm:$0xff]  ;;  %v2249_v29 = vcvt.s32.f32 %v2247_v3 }
 0x2c7   :  { %v2259_v12 = vshrl.u32 %v5530_v38, 16  ;;  %v1702_v32 = vcvt.f32.s32 %v1699_v21  ;;  %v2246_v21 = vand.u32 65535, %v5528_v19  ;;  %vm367_vm6 = vcmp.eq.s32.totalorder %v4805_v20, %v3324_v16 }
 0x2c8   :  { %v2740_v33 = vrot.slane %v1669_v37, %v4375_v43  ;;  %v1680_v24 = vshll.u32 %v1679_v13, 16  ;;  %2202 = vadd.xlane.f32.xlu1 %v2200_v28 }
 0x2c9   :  { %2240 = vadd.xlane.f32.xlu0 %v2237_v4  ;;  %v1689_v50 = vpop.xlane.xlu1 %1688 }
 0x2ca   :  { %v2741_v47 = vsel %vm5527_vm10, %v2740_v33, %v2736_v60  ;;  %v1681_v35 = vadd.s32 %v1680_v24, %v1678_v7  ;;  %v1691_v55 = vcvt.f32.s32 %v1689_v50  ;;  %v1711_v2 = vpop.xlane.xlu0 %1710  ;;  %v2234_v60 = vand.u32 65535, %v4495_v31  ;;  %vm600_vm10 = vmand %vm367_vm6, %vm4814_vm14 }
 0x2cb   :  { %v2261_v7 = vcvt.s32.f32 %v2259_v12  ;;  %v1714_v33 = vcvt.f32.s32 %v1711_v2  ;;  %v2078_v2 = vand.u32 65535, %v4918_v11  ;;  %vm5540_vm6 = vcmask 130112  }
 0x2cc   :  { %v2745_v46 = vrot.slane %v1681_v35, %v4382_v27  ;;  %v1692_v54 = vshll.u32 %v1691_v55, 16  ;;  %2214 = vadd.xlane.f32.xlu1 %v2212_v8  ;;  %v5532_v8 = vld [vmem:[#allocation9_spill] sm:$0xff]  ;;  %v2236_v1 = vcvt.s32.f32 %v2234_v60 }
 0x2cd   :  { %2226 = vadd.xlane.f32.xlu0 %v2224_v45  ;;  %v1701_v41 = vpop.xlane.xlu1 %1700  ;;  %vm366_vm1 = vcmp.eq.s32.totalorder %v4805_v20, %v5532_v8 }
 0x2ce   :  { %v2746_v52 = vsel %vm5529_vm11, %v2745_v46, %v2741_v47  ;;  %v1693_v9 = vadd.s32 %v1692_v54, %v1690_v48  ;;  %v1703_v42 = vcvt.f32.s32 %v1701_v41  ;;  %v1723_v57 = vpop.xlane.xlu0 %1722  ;;  %v2091_v47 = vshrl.u32 %v4935_v5, 16  ;;  %vm599_vm13 = vmand %vm366_vm1, %vm4814_vm14 }
 0x2cf   :  { %v2248_v48 = vcvt.s32.f32 %v2246_v21  ;;  %v1726_v46 = vcvt.f32.s32 %v1723_v57  ;;  %v4950_v11 = vsel %vm599_vm13, %v4826_v25, 0  ;;  %v2258_v57 = vand.u32 65535, %v5530_v38  ;;  %vm601_vm11 = vmand %vm368_vm2, %vm4814_vm14 }
 0x2d0   :  { %v2750_v15 = vrot.slane %v1693_v9, %v4392_v30  ;;  %v1704_v14 = vshll.u32 %v1703_v42, 16  ;;  %2072 = vadd.xlane.f32.xlu1 %v2069_v61  ;;  %v2093_v3 = vcvt.s32.f32 %v2091_v47  ;;  %v2103_v60 = vshrl.u32 %v4950_v11, 16 }
 0x2d1   :  { %2084 = vadd.xlane.f32.xlu0 %v2081_v53  ;;  %v1713_v34 = vpop.xlane.xlu1 %1712  ;;  %v2090_v38 = vand.u32 65535, %v4935_v5  ;;  %v4965_v5 = vsel %vm600_vm10, %v4826_v25, 0  ;;  %vm5537_vm1 = vcmask 1048512   ;;  %vm5542_vm2 = vcmask 195712  }
 0x2d2   :  { %v2751_v37 = vsel %vm5531_vm4, %v2750_v15, %v2746_v52  ;;  %v1705_v13 = vadd.s32 %v1704_v14, %v1702_v32  ;;  %v1715_v28 = vcvt.f32.s32 %v1713_v34  ;;  %v1735_v4 = vpop.xlane.xlu0 %1734  ;;  %v5534_v52 = vld [vmem:[#allocation63_spill] sm:$0xff]  ;;  %v2080_v32 = vcvt.s32.f32 %v2078_v2  ;;  %vm602_vm4 = vmand %vm369_vm9, %vm4814_vm14 }
 0x2d3   :  { %v2271_v9 = vshrl.u32 %v5534_v52, 16  ;;  %v1738_v15 = vcvt.f32.s32 %v1735_v4  ;;  %v2105_v8 = vcvt.s32.f32 %v2103_v60  ;;  %vm5544_vm9 = vcmask 261312  }
 0x2d4   :  { %v2755_v24 = vrot.slane %v1705_v13, %v4407_v44  ;;  %v1716_v50 = vshll.u32 %v1715_v28, 16  ;;  %2252 = vadd.xlane.f32.xlu1 %v2249_v29 }
 0x2d5   :  { %2264 = vadd.xlane.f32.xlu0 %v2261_v7  ;;  %v1725_v31 = vpop.xlane.xlu1 %1724  ;;  %v2273_v21 = vcvt.s32.f32 %v2271_v9 }
 0x2d6   :  { %v2756_v35 = vsel %vm5533_vm5, %v2755_v24, %v2751_v37  ;;  %v1717_v55 = vadd.s32 %v1716_v50, %v1714_v33  ;;  %v1727_v6 = vcvt.f32.s32 %v1725_v31  ;;  %v1747_v45 = vpop.xlane.xlu0 %1746  ;;  %v2260_v33 = vcvt.s32.f32 %v2258_v57  ;;  %v5535_v31 = vld [vmem:[#allocation64_spill] sm:$0xff] }
 0x2d7   :  { %v1750_v4 = vcvt.f32.s32 %v1747_v45  ;;  %v2283_v47 = vshrl.u32 %v5535_v31, 16  ;;  %v2270_v45 = vand.u32 65535, %v5534_v52  ;;  %v2102_v52 = vand.u32 65535, %v4950_v11 }
 0x2d8   :  { %v2760_v54 = vrot.slane %v1717_v55, %v4468_v10  ;;  %v1728_v41 = vshll.u32 %v1727_v6, 16  ;;  %2238 = vadd.xlane.f32.xlu1 %v2236_v1  ;;  %v810_v11 = vsel %vm601_vm11, %v4826_v25, 0 }
 0x2d9   :  { %2250 = vadd.xlane.f32.xlu0 %v2248_v48  ;;  %v1737_v19 = vpop.xlane.xlu1 %1736  ;;  %v2092_v48 = vcvt.s32.f32 %v2090_v38 }
 0x2da   :  { %v2761_v42 = vsel %vm2432_vm7, %v2760_v54, %v2756_v35  ;;  %v1729_v61 = vadd.s32 %v1728_v41, %v1726_v46  ;;  %v1739_v53 = vcvt.f32.s32 %v1737_v19  ;;  %v1759_v12 = vpop.xlane.xlu0 %1758  ;;  %v2115_v19 = vshrl.u32 %v4965_v5, 16 }
 0x2db   :  { %v1762_v2 = vcvt.f32.s32 %v1759_v12 }
 0x2dc   :  { %v2765_v14 = vrot.slane %v1729_v61, %v4484_v40  ;;  %v1740_v34 = vshll.u32 %v1739_v53, 16  ;;  %2096 = vadd.xlane.f32.xlu1 %v2093_v3  ;;  %v2285_v53 = vcvt.s32.f32 %v2283_v47 }
 0x2dd   :  { %2082 = vadd.xlane.f32.xlu0 %v2080_v32  ;;  %v1749_v29 = vpop.xlane.xlu1 %1748  ;;  %v2272_v32 = vcvt.s32.f32 %v2270_v45 }
 0x2de   :  { %v2766_v37 = vsel %vm2439_vm3, %v2765_v14, %v2761_v42  ;;  %v1741_v13 = vadd.s32 %v1740_v34, %v1738_v15  ;;  %v1751_v28 = vcvt.f32.s32 %v1749_v29  ;;  %v1771_v7 = vpop.xlane.xlu0 %1770  ;;  %v2117_v14 = vcvt.s32.f32 %v2115_v19 }
 0x2df   :  { %v1774_v12 = vcvt.f32.s32 %v1771_v7  ;;  %v2295_v34 = vshrl.u32 %v4583_v63, 16 }
 0x2e0   :  { %v2770_v24 = vrot.slane %v1741_v13, %v4511_v56  ;;  %v1752_v16 = vshll.u32 %v1751_v28, 16  ;;  %2276 = vadd.xlane.f32.xlu1 %v2273_v21  ;;  %v2104_v28 = vcvt.s32.f32 %v2102_v52  ;;  %v2282_v21 = vand.u32 65535, %v5535_v31 }
 0x2e1   :  { %2262 = vadd.xlane.f32.xlu0 %v2260_v33  ;;  %v1761_v50 = vpop.xlane.xlu1 %1760  ;;  %v2114_v31 = vand.u32 65535, %v4965_v5  ;;  %v811_v5 = vsel %vm602_vm4, %v4826_v25, 0  ;;  %vm5547_vm4 = vcmask 392512  }
 0x2e2   :  { %v2771_v35 = vsel %vm2446_vm12, %v2770_v24, %v2766_v37  ;;  %v1753_v55 = vadd.s32 %v1752_v16, %v1750_v4  ;;  %v1763_v6 = vcvt.f32.s32 %v1761_v50  ;;  %v1783_v1 = vpop.xlane.xlu0 %1782  ;;  %v2127_v24 = vshrl.u32 %v810_v11, 16 }
 0x2e3   :  { %v1786_v7 = vcvt.f32.s32 %v1783_v1 }
 0x2e4   :  { %v2775_v46 = vrot.slane %v1753_v55, %v4539_v39  ;;  %v1764_v54 = vshll.u32 %v1763_v6, 16  ;;  %2108 = vadd.xlane.f32.xlu1 %v2105_v8  ;;  %v2284_v55 = vcvt.s32.f32 %v2282_v21  ;;  %v2129_v45 = vcvt.s32.f32 %v2127_v24 }
 0x2e5   :  { %2094 = vadd.xlane.f32.xlu0 %v2092_v48  ;;  %v1773_v41 = vpop.xlane.xlu1 %1772 }
 0x2e6   :  { %v2776_v3 = vsel %vm2453_vm8, %v2775_v46, %v2771_v35  ;;  %v1765_v9 = vadd.s32 %v1764_v54, %v1762_v2  ;;  %v1775_v42 = vcvt.f32.s32 %v1773_v41  ;;  %v1795_v61 = vpop.xlane.xlu0 %1794  ;;  %v2297_v35 = vcvt.s32.f32 %v2295_v34  ;;  %v5536_v2 = vld [vmem:[#allocation19_spill] sm:$0xff] }
 0x2e7   :  { %v1798_v6 = vcvt.f32.s32 %v1795_v61  ;;  %v2307_v46 = vshrl.u32 %v5536_v2, 16 }
 0x2e8   :  { %v2780_v57 = vrot.slane %v1765_v9, %v4548_v51  ;;  %v1776_v17 = vshll.u32 %v1775_v42, 16  ;;  %2288 = vadd.xlane.f32.xlu1 %v2285_v53  ;;  %v2116_v9 = vcvt.s32.f32 %v2114_v31  ;;  %v2294_v42 = vand.u32 65535, %v4583_v63 }
 0x2e9   :  { %2274 = vadd.xlane.f32.xlu0 %v2272_v32  ;;  %v1785_v15 = vpop.xlane.xlu1 %1784  ;;  %v5538_v32 = vld [vmem:[#allocation10_spill] sm:$0xff] }
 0x2ea   :  { %v2781_v29 = vsel %vm2460_vm0, %v2780_v57, %v2776_v3  ;;  %v1777_v60 = vadd.s32 %v1776_v17, %v1774_v12  ;;  %v1787_v37 = vcvt.f32.s32 %v1785_v15  ;;  %v1807_v13 = vpop.xlane.xlu0 %1806  ;;  %vm370_vm5 = vcmp.eq.s32.totalorder %v4805_v20, %v5538_v32 }
 0x2eb   :  { %v1810_v61 = vcvt.f32.s32 %v1807_v13  ;;  %v2139_v12 = vshrl.u32 %v811_v5, 16  ;;  %v2296_v34 = vcvt.s32.f32 %v2294_v42  ;;  %vm603_vm13 = vmand %vm370_vm5, %vm4814_vm14  ;;  %vm5550_vm5 = vcmask 523712  }
 0x2ec   :  { %v2785_v33 = vrot.slane %v1777_v60, %v4569_v26  ;;  %v1788_v38 = vshll.u32 %v1787_v37, 16  ;;  %2120 = vadd.xlane.f32.xlu1 %v2117_v14  ;;  %v2309_v14 = vcvt.s32.f32 %v2307_v46 }
 0x2ed   :  { %2106 = vadd.xlane.f32.xlu0 %v2104_v28  ;;  %v1797_v4 = vpop.xlane.xlu1 %1796  ;;  %v2141_v21 = vcvt.s32.f32 %v2139_v12 }
 0x2ee   :  { %v2786_v16 = vsel %vm2467_vm15, %v2785_v33, %v2781_v29  ;;  %v1789_v50 = vadd.s32 %v1788_v38, %v1786_v7  ;;  %v1799_v8 = vcvt.f32.s32 %v1797_v4  ;;  %v1819_v47 = vpop.xlane.xlu0 %1818  ;;  %v2126_v29 = vand.u32 65535, %v810_v11  ;;  %v5539_v7 = vld [vmem:[#allocation20_spill] sm:$0xff] }
 0x2ef   :  { %v1822_v60 = vcvt.f32.s32 %v1819_v47  ;;  %v2319_v33 = vshrl.u32 %v5539_v7, 16 }
 0x2f0   :  { %v2790_v1 = vrot.slane %v1789_v50, %v4576_v23  ;;  %v1800_v48 = vshll.u32 %v1799_v8, 16  ;;  %2300 = vadd.xlane.f32.xlu1 %v2297_v35  ;;  %v2128_v50 = vcvt.s32.f32 %v2126_v29  ;;  %v2306_v8 = vand.u32 65535, %v5536_v2 }
 0x2f1   :  { %2286 = vadd.xlane.f32.xlu0 %v2284_v55  ;;  %v1809_v18 = vpop.xlane.xlu1 %1808 }
 0x2f2   :  { %v4991_v54 = vsel %vm5537_vm1, %v2790_v1, %v2786_v16  ;;  %v1801_v41 = vadd.s32 %v1800_v48, %v1798_v6  ;;  %v1811_v19 = vcvt.f32.s32 %v1809_v18  ;;  %v1831_v3 = vpop.xlane.xlu0 %1830  ;;  %v812_v16 = vsel %vm603_vm13, %v4826_v25, 0  ;;  %v5541_v1 = vld [vmem:[#allocation11_spill] sm:$0xff] }
 0x2f3   :  { %v1834_v47 = vcvt.f32.s32 %v1831_v3  ;;  %v2151_v6 = vshrl.u32 %v812_v16, 16  ;;  %vm371_vm10 = vcmp.eq.s32.totalorder %v4805_v20, %v5541_v1  ;;  %vm5549_vm1 = vcmask 458112  }
 0x2f4   :  { %v1812_v53 = vshll.u32 %v1811_v19, 16  ;;  %2132 = vadd.xlane.f32.xlu1 %v2129_v45  ;;  %v2795_v63 = vrot.slane %v1801_v41, %v4327_v0  ;;  %v2321_v41 = vcvt.s32.f32 %v2319_v33  ;;  %v2308_v19 = vcvt.s32.f32 %v2306_v8  ;;  %vm604_vm11 = vmand %vm371_vm10, %vm4814_vm14 }
 0x2f5   :  { %2118 = vadd.xlane.f32.xlu0 %v2116_v9  ;;  %v1821_v52 = vpop.xlane.xlu1 %1820  ;;  %v2138_v9 = vand.u32 65535, %v811_v5  ;;  %v2318_v5 = vand.u32 65535, %v5539_v7  ;;  %vm5545_vm14 = vcmask 326912   ;;  %v2150_v7 = vand.u32 65535, %v812_v16 }
 0x2f6   :  { %v1813_v57 = vadd.s32 %v1812_v53, %v1810_v61  ;;  %v1823_v17 = vcvt.f32.s32 %v1821_v52  ;;  %v1843_v15 = vpop.xlane.xlu0 %1842  ;;  %v5543_v53 = vld [vmem:[#allocation21_spill] sm:$0xff]  ;;  %vm5551_vm13 = vcmask 589312   ;;  %vm3035_vm10 = vcmask 1044484  }
 0x2f7   :  { %v1846_v2 = vcvt.f32.s32 %v1843_v15  ;;  %v2331_v20 = vshrl.u32 %v5543_v53, 16  ;;  %v5016_v15 = vsel %vm604_vm11, %v4826_v25, 0  ;;  %v2152_v1 = vcvt.s32.f32 %v2150_v7 }
 0x2f8   :  { %v2799_v37 = vrot.slane %v1813_v57, %v4330_v49  ;;  %v1824_v13 = vshll.u32 %v1823_v17, 16  ;;  %2312 = vadd.xlane.f32.xlu1 %v2309_v14  ;;  %v2153_v17 = vcvt.s32.f32 %v2151_v6  ;;  %v2140_v14 = vcvt.s32.f32 %v2138_v9 }
 0x2f9   :  { %2298 = vadd.xlane.f32.xlu0 %v2296_v34  ;;  %v1833_v28 = vpop.xlane.xlu1 %1832  ;;  %v2163_v33 = vshrl.u32 %v5016_v15, 16  ;;  %vm5553_vm11 = vcmask 1048512  }
 0x2fa   :  { %v2800_v38 = vsel %vm5540_vm6, %v2799_v37, %v2795_v63  ;;  %v1825_v4 = vadd.s32 %v1824_v13, %v1822_v60  ;;  %v1835_v24 = vcvt.f32.s32 %v1833_v28  ;;  %v1855_v11 = vpop.xlane.xlu0 %1854  ;;  %v2333_v60 = vcvt.s32.f32 %v2331_v20 }
 0x2fb   :  { %v1858_v34 = vcvt.f32.s32 %v1855_v11  ;;  %v2165_v6 = vcvt.s32.f32 %v2163_v33  ;;  %vm3033_vm6 = vcmask 1043459  }
 0x2fc   :  { %v2804_v35 = vrot.slane %v1825_v4, %v4334_v59  ;;  %v1836_v55 = vshll.u32 %v1835_v24, 16  ;;  %2144 = vadd.xlane.f32.xlu1 %v2141_v21 }
 0x2fd   :  { %2130 = vadd.xlane.f32.xlu0 %v2128_v50  ;;  %v1845_v31 = vpop.xlane.xlu1 %1844  ;;  %v5546_v50 = vld [vmem:[#allocation22_spill] sm:$0xff] }
 0x2fe   :  { %v2805_v48 = vsel %vm5542_vm2, %v2804_v35, %v2800_v38  ;;  %v1837_v18 = vadd.s32 %v1836_v55, %v1834_v47  ;;  %v1847_v45 = vcvt.f32.s32 %v1845_v31  ;;  %v1867_v46 = vpop.xlane.xlu0 %1866  ;;  %v2320_v38 = vcvt.s32.f32 %v2318_v5 }
 0x2ff   :  { %v1870_v4 = vcvt.f32.s32 %v1867_v46  ;;  %v2343_v8 = vshrl.u32 %v5546_v50, 16  ;;  %vm3037_vm2 = vcmask 1045509  }
 0x300   :  { %v2809_v3 = vrot.slane %v1837_v18, %v4347_v58  ;;  %v1848_v42 = vshll.u32 %v1847_v45, 16  ;;  %2324 = vadd.xlane.f32.xlu1 %v2321_v41 }
 0x301   :  { %2310 = vadd.xlane.f32.xlu0 %v2308_v19  ;;  %v1857_v61 = vpop.xlane.xlu1 %1856  ;;  %v2330_v19 = vand.u32 65535, %v5543_v53 }
 0x302   :  { %v2810_v32 = vsel %vm5544_vm9, %v2809_v3, %v2805_v48  ;;  %v1849_v52 = vadd.s32 %v1848_v42, %v1846_v2  ;;  %v1859_v12 = vcvt.f32.s32 %v1857_v61  ;;  %v1879_v57 = vpop.xlane.xlu0 %1878  ;;  %v5548_v48 = vld [vmem:[#allocation23_spill] sm:$0xff]  ;;  %v2345_v61 = vcvt.s32.f32 %v2343_v8 }
 0x303   :  { %v2355_v18 = vshrl.u32 %v5548_v48, 16  ;;  %v1882_v45 = vcvt.f32.s32 %v1879_v57  ;;  %vm5554_vm9 = vcmask 130112  }
 0x304   :  { %v2814_v22 = vrot.slane %v1849_v52, %v4365_v36  ;;  %v1860_v29 = vshll.u32 %v1859_v12, 16  ;;  %2156 = vadd.xlane.f32.xlu1 %v2153_v17 }
 0x305   :  { %2142 = vadd.xlane.f32.xlu0 %v2140_v14  ;;  %v1869_v63 = vpop.xlane.xlu1 %1868  ;;  %v2357_v20 = vcvt.s32.f32 %v2355_v18  ;;  %v2332_v14 = vcvt.s32.f32 %v2330_v19 }
 0x306   :  { %v2815_v37 = vsel %vm5545_vm14, %v2814_v22, %v2810_v32  ;;  %v1861_v13 = vadd.s32 %v1860_v29, %v1858_v34  ;;  %v1871_v28 = vcvt.f32.s32 %v1869_v63  ;;  %v1891_v21 = vpop.xlane.xlu0 %1890  ;;  %v2342_v32 = vand.u32 65535, %v5546_v50 }
 0x307   :  { %v1894_v52 = vcvt.f32.s32 %v1891_v21  ;;  %v2162_v29 = vand.u32 65535, %v5016_v15  ;;  %v2354_v21 = vand.u32 65535, %v5548_v48  ;;  %vm5555_vm14 = vcmask 195712  }
 0x308   :  { %v2819_v25 = vrot.slane %v1861_v13, %v4375_v43  ;;  %v1872_v24 = vshll.u32 %v1871_v28, 16  ;;  %2336 = vadd.xlane.f32.xlu1 %v2333_v60  ;;  %v2344_v63 = vcvt.s32.f32 %v2342_v32 }
 0x309   :  { %2322 = vadd.xlane.f32.xlu0 %v2320_v38  ;;  %v1881_v11 = vpop.xlane.xlu1 %1880 }
 0x30a   :  { %v2820_v47 = vsel %vm5547_vm4, %v2819_v25, %v2815_v37  ;;  %v1873_v35 = vadd.s32 %v1872_v24, %v1870_v4  ;;  %v1883_v55 = vcvt.f32.s32 %v1881_v11  ;;  %v1903_v31 = vpop.xlane.xlu0 %1902  ;;  %v2164_v25 = vcvt.s32.f32 %v2162_v29 }
 0x30b   :  { %v1906_v60 = vcvt.f32.s32 %v1903_v31  ;;  %v2356_v31 = vcvt.s32.f32 %v2354_v21  ;;  %vm5556_vm4 = vcmask 261312  }
 0x30c   :  { %v2824_v16 = vrot.slane %v1873_v35, %v4382_v27  ;;  %v1884_v46 = vshll.u32 %v1883_v55, 16  ;;  %2168 = vadd.xlane.f32.xlu1 %v2165_v6 }
 0x30d   :  { %2154 = vadd.xlane.f32.xlu0 %v2152_v1  ;;  %v1893_v41 = vpop.xlane.xlu1 %1892 }
 0x30e   :  { %v2825_v9 = vsel %vm5549_vm1, %v2824_v16, %v2820_v47  ;;  %v1885_v2 = vadd.s32 %v1884_v46, %v1882_v45  ;;  %v1895_v3 = vcvt.f32.s32 %v1893_v41  ;;  %v1915_v42 = vpop.xlane.xlu0 %1914  ;;  %vm5557_vm1 = vcmask 326912  }
 0x30f   :  { %v1918_v24 = vcvt.f32.s32 %v1915_v42 }
 0x310   :  { %v2829_v12 = vrot.slane %v1885_v2, %v4392_v30  ;;  %v1896_v57 = vshll.u32 %v1895_v3, 16  ;;  %2348 = vadd.xlane.f32.xlu1 %v2345_v61 }
 0x311   :  { %2360 = vadd.xlane.f32.xlu0 %v2357_v20  ;;  %v1905_v17 = vpop.xlane.xlu1 %1904 }
 0x312   :  { %v2830_v5 = vsel %vm5550_vm5, %v2829_v12, %v2825_v9  ;;  %v1897_v53 = vadd.s32 %v1896_v57, %v1894_v52  ;;  %v1907_v34 = vcvt.f32.s32 %v1905_v17  ;;  %v1927_v22 = vpop.xlane.xlu0 %1926  ;;  %vm5558_vm5 = vcmask 392512  }
 0x313   :  { %v1930_v6 = vcvt.f32.s32 %v1927_v22 }
 0x314   :  { %v2834_v37 = vrot.slane %v1897_v53, %v4407_v44  ;;  %v1908_v13 = vshll.u32 %v1907_v34, 16  ;;  %2334 = vadd.xlane.f32.xlu1 %v2332_v14 }
 0x315   :  { %2346 = vadd.xlane.f32.xlu0 %v2344_v63  ;;  %v1917_v28 = vpop.xlane.xlu1 %1916 }
 0x316   :  { %v2835_v33 = vsel %vm5551_vm13, %v2834_v37, %v2830_v5  ;;  %v1909_v38 = vadd.s32 %v1908_v13, %v1906_v60  ;;  %v1919_v7 = vcvt.f32.s32 %v1917_v28  ;;  %v1939_v4 = vpop.xlane.xlu0 %1938  ;;  %vm5559_vm13 = vcmask 458112  }
 0x317   :  { %v1942_v19 = vcvt.f32.s32 %v1939_v4 }
 0x318   :  { %v2839_v11 = vrot.slane %v1909_v38, %v4468_v10  ;;  %v1920_v15 = vshll.u32 %v1919_v7, 16  ;;  %2166 = vadd.xlane.f32.xlu1 %v2164_v25 }
 0x319   :  { %v1929_v50 = vpop.xlane.xlu1 %1928 }
 0x31a   :  { %v2840_v8 = vsel %vm2432_vm7, %v2839_v11, %v2835_v33  ;;  %v1921_v47 = vadd.s32 %v1920_v15, %v1918_v24  ;;  %v1931_v35 = vcvt.f32.s32 %v1929_v50  ;;  %v1951_v55 = vpop.xlane.xlu0 %1950  ;;  %v5552_v33 = vld [vmem:[#allocation24_spill] sm:$0xff] }
 0x31b   :  { %v1954_v52 = vcvt.f32.s32 %v1951_v55  ;;  %v3034_v38 = vsel %vm3033_vm6, %v4904_v62, %v5552_v33  ;;  %vm5560_vm6 = vmmov %vm5554_vm9 }
 0x31c   :  { %v2844_v1 = vrot.slane %v1921_v47, %v4484_v40  ;;  %v1932_v48 = vshll.u32 %v1931_v35, 16  ;;  %2358 = vadd.xlane.f32.xlu1 %v2356_v31 }
 0x31d   :  { %v1941_v18 = vpop.xlane.xlu1 %1940 }
 0x31e   :  { %v2845_v45 = vsel %vm2439_vm3, %v2844_v1, %v2840_v8  ;;  %v1933_v16 = vadd.s32 %v1932_v48, %v1930_v6  ;;  %v1943_v46 = vcvt.f32.s32 %v1941_v18  ;;  %v1963_v41 = vpop.xlane.xlu0 %1962  ;;  %v3036_v6 = vsel %vm3035_vm10, %v4991_v54, %v3034_v38  ;;  %vm5561_vm10 = vmmov %vm5555_vm14 }
 0x31f   :  { %v1966_v22 = vcvt.f32.s32 %v1963_v41 }
 0x320   :  { %v2849_v9 = vrot.slane %v1933_v16, %v4511_v56  ;;  %v1944_v2 = vshll.u32 %v1943_v46, 16 }
 0x321   :  { %v1953_v3 = vpop.xlane.xlu1 %1952 }
 0x322   :  { %v2850_v42 = vsel %vm2446_vm12, %v2849_v9, %v2845_v45  ;;  %v1945_v61 = vadd.s32 %v1944_v2, %v1942_v19  ;;  %v1955_v20 = vcvt.f32.s32 %v1953_v3  ;;  %v1975_v32 = vpop.xlane.xlu0 %1974 }
 0x323   :  { %v1978_v7 = vcvt.f32.s32 %v1975_v32 }
 0x324   :  { %v2854_v12 = vrot.slane %v1945_v61, %v4539_v39  ;;  %v1956_v57 = vshll.u32 %v1955_v20, 16 }
 0x325   :  { %v1965_v17 = vpop.xlane.xlu1 %1964 }
 0x326   :  { %v2855_v14 = vsel %vm2453_vm8, %v2854_v12, %v2850_v42  ;;  %v1957_v5 = vadd.s32 %v1956_v57, %v1954_v52  ;;  %v1967_v53 = vcvt.f32.s32 %v1965_v17  ;;  %v1987_v34 = vpop.xlane.xlu0 %1986 }
 0x327   :  { %v1990_v47 = vcvt.f32.s32 %v1987_v34 }
 0x328   :  { %v2859_v29 = vrot.slane %v1957_v5, %v4548_v51  ;;  %v1968_v63 = vshll.u32 %v1967_v53, 16 }
 0x329   :  { %v1977_v60 = vpop.xlane.xlu1 %1976 }
 0x32a   :  { %v2860_v37 = vsel %vm2460_vm0, %v2859_v29, %v2855_v14  ;;  %v1969_v13 = vadd.s32 %v1968_v63, %v1966_v22  ;;  %v1979_v28 = vcvt.f32.s32 %v1977_v60  ;;  %v1999_v21 = vpop.xlane.xlu0 %1998 }
 0x32b   :  { %v2002_v16 = vcvt.f32.s32 %v1999_v21 }
 0x32c   :  { %v2864_v4 = vrot.slane %v1969_v13, %v4569_v26  ;;  %v1980_v25 = vshll.u32 %v1979_v28, 16 }
 0x32d   :  { %v1989_v24 = vpop.xlane.xlu1 %1988 }
 0x32e   :  { %v2865_v11 = vsel %vm2467_vm15, %v2864_v4, %v2860_v37  ;;  %v1981_v15 = vadd.s32 %v1980_v25, %v1978_v7  ;;  %v1991_v50 = vcvt.f32.s32 %v1989_v24  ;;  %v2011_v8 = vpop.xlane.xlu0 %2010 }
 0x32f   :  { %v2014_v42 = vcvt.f32.s32 %v2011_v8 }
 0x330   :  { %v2869_v35 = vrot.slane %v1981_v15, %v4576_v23  ;;  %v1992_v55 = vshll.u32 %v1991_v50, 16 }
 0x331   :  { %v2001_v31 = vpop.xlane.xlu1 %2000 }
 0x332   :  { %v2870_v62 = vsel %vm5553_vm11, %v2869_v35, %v2865_v11  ;;  %v1993_v1 = vadd.s32 %v1992_v55, %v1990_v47  ;;  %v2003_v48 = vcvt.f32.s32 %v2001_v31  ;;  %v2023_v18 = vpop.xlane.xlu0 %2022  ;;  %vm5563_vm11 = vmmov %vm5557_vm1 }
 0x333   :  { %v5052_v45 = vsel %vm3037_vm2, %v2870_v62, %v3036_v6  ;;  %v2026_v17 = vcvt.f32.s32 %v2023_v18  ;;  %vm5562_vm2 = vmmov %vm5556_vm4 }
 0x334   :  { %v2004_v46 = vshll.u32 %v2003_v48, 16  ;;  %v2874_v3 = vrot.slane %v1993_v1, %v4327_v0 }
 0x335   :  { %v2013_v41 = vpop.xlane.xlu1 %2012 }
 0x336   :  { %v2005_v19 = vadd.s32 %v2004_v46, %v2002_v16  ;;  %v2015_v9 = vcvt.f32.s32 %v2013_v41  ;;  %v2035_v2 = vpop.xlane.xlu0 %2034 }
 0x337   :  { %v2038_v60 = vcvt.f32.s32 %v2035_v2 }
 0x338   :  { %v2878_v61 = vrot.slane %v2005_v19, %v4330_v49  ;;  %v2016_v20 = vshll.u32 %v2015_v9, 16 }
 0x339   :  { %v2025_v54 = vpop.xlane.xlu1 %2024 }
 0x33a   :  { %v2879_v32 = vsel %vm5554_vm9, %v2878_v61, %v2874_v3  ;;  %v2017_v52 = vadd.s32 %v2016_v20, %v2014_v42  ;;  %v2027_v12 = vcvt.f32.s32 %v2025_v54  ;;  %v2047_v57 = vpop.xlane.xlu0 %2046  ;;  %vm5564_vm9 = vcmask 523712  }
 0x33b   :  { %v2050_v4 = vcvt.f32.s32 %v2047_v57 }
 0x33c   :  { %v2883_v14 = vrot.slane %v2017_v52, %v4334_v59  ;;  %v2028_v5 = vshll.u32 %v2027_v12, 16 }
 0x33d   :  { %v2037_v53 = vpop.xlane.xlu1 %2036 }
 0x33e   :  { %v2884_v34 = vsel %vm5555_vm14, %v2883_v14, %v2879_v32  ;;  %v2029_v22 = vadd.s32 %v2028_v5, %v2026_v17  ;;  %v2039_v29 = vcvt.f32.s32 %v2037_v53  ;;  %v2059_v63 = vpop.xlane.xlu0 %2058  ;;  %vm5565_vm14 = vmmov %vm5558_vm5 }
 0x33f   :  { %v2062_v35 = vcvt.f32.s32 %v2059_v63 }
 0x340   :  { %v2888_v37 = vrot.slane %v2029_v22, %v4347_v58  ;;  %v2040_v13 = vshll.u32 %v2039_v29, 16 }
 0x341   :  { %v2049_v28 = vpop.xlane.xlu1 %2048 }
 0x342   :  { %v2889_v21 = vsel %vm5556_vm4, %v2888_v37, %v2884_v34  ;;  %v2041_v33 = vadd.s32 %v2040_v13, %v2038_v60  ;;  %v2051_v38 = vcvt.f32.s32 %v2049_v28  ;;  %v5061_v7 = vpop.xlane.xlu0 %2070  ;;  %vm5566_vm4 = vmmov %vm5559_vm13 }
 0x344   :  { %v2893_v25 = vrot.slane %v2041_v33, %v4365_v36  ;;  %v2052_v24 = vshll.u32 %v2051_v38, 16 }
 0x345   :  { %v2061_v11 = vpop.xlane.xlu1 %2060 }
 0x346   :  { %v2894_v15 = vsel %vm5557_vm1, %v2893_v25, %v2889_v21  ;;  %v2053_v50 = vadd.s32 %v2052_v24, %v2050_v4  ;;  %v2063_v8 = vcvt.f32.s32 %v2061_v11  ;;  %v2193_v47 = vpop.xlane.xlu0 %2192  ;;  %vm5567_vm1 = vcmask 589312  }
 0x347   :  { %v2195_v2 = vcvt.f32.s32 %v2193_v47  ;;  %v2074_v47 = vcvt.f32.s32 %v5061_v7 }
 0x348   :  { %v2898_v55 = vrot.slane %v2053_v50, %v4375_v43  ;;  %v2064_v31 = vshll.u32 %v2063_v8, 16 }
 0x349   :  { %v2181_v6 = vpop.xlane.xlu1 %2180  ;;  %v2196_v20 = vshll.u32 %v2195_v2, 16 }
 0x34a   :  { %v2899_v62 = vsel %vm5558_vm5, %v2898_v55, %v2894_v15  ;;  %v2065_v1 = vadd.s32 %v2064_v31, %v2062_v35  ;;  %v2183_v48 = vcvt.f32.s32 %v2181_v6  ;;  %v2179_v18 = vpop.xlane.xlu0 %2178  ;;  %vm5568_vm5 = vmmov %vm5564_vm9 }
 0x34b   :  { %v2182_v41 = vcvt.f32.s32 %v2179_v18 }
 0x34c   :  { %v2903_v16 = vrot.slane %v2065_v1, %v4382_v27  ;;  %v2184_v46 = vshll.u32 %v2183_v48, 16 }
 0x34d   :  { %v2205_v19 = vpop.xlane.xlu1 %2204 }
 0x34e   :  { %v2904_v9 = vsel %vm5559_vm13, %v2903_v16, %v2899_v62  ;;  %v2185_v3 = vadd.s32 %v2184_v46, %v2182_v41  ;;  %v2217_v42 = vpop.xlane.xlu0 %2216  ;;  %v2207_v54 = vcvt.f32.s32 %v2205_v19  ;;  %vm5569_vm13 = vmmov %vm5567_vm1 }
 0x34f   :  { %v2219_v57 = vcvt.f32.s32 %v2217_v42 }
 0x350   :  { %v2953_v14 = vrot.slane %v2185_v3, %v4327_v0  ;;  %v2208_v5 = vshll.u32 %v2207_v54, 16 }
 0x351   :  { %v2191_v61 = vpop.xlane.xlu1 %2190  ;;  %v2220_v13 = vshll.u32 %v2219_v57, 16 }
 0x352   :  { %v2194_v32 = vcvt.f32.s32 %v2191_v61  ;;  %v2229_v52 = vpop.xlane.xlu0 %2228 }
 0x353   :  { %v2231_v29 = vcvt.f32.s32 %v2229_v52 }
 0x354   :  { %v2197_v12 = vadd.s32 %v2196_v20, %v2194_v32 }
 0x355   :  { %v2203_v17 = vpop.xlane.xlu1 %2202  ;;  %v2232_v38 = vshll.u32 %v2231_v29, 16 }
 0x356   :  { %v2957_v53 = vrot.slane %v2197_v12, %v4330_v49  ;;  %v2206_v34 = vcvt.f32.s32 %v2203_v17  ;;  %v2241_v22 = vpop.xlane.xlu0 %2240 }
 0x357   :  { %v2243_v6 = vcvt.f32.s32 %v2241_v22 }
 0x358   :  { %v2958_v63 = vsel %vm5560_vm6, %v2957_v53, %v2953_v14  ;;  %v2209_v60 = vadd.s32 %v2208_v5, %v2206_v34  ;;  %vm3039_vm6 = vcmask 1046534  }
 0x359   :  { %v2215_v37 = vpop.xlane.xlu1 %2214  ;;  %v2244_v16 = vshll.u32 %v2243_v6, 16 }
 0x35a   :  { %v2962_v28 = vrot.slane %v2209_v60, %v4334_v59  ;;  %v2218_v21 = vcvt.f32.s32 %v2215_v37  ;;  %v2227_v33 = vpop.xlane.xlu0 %2226 }
 0x35b   :  { %v2230_v4 = vcvt.f32.s32 %v2227_v33 }
 0x35c   :  { %v2963_v25 = vsel %vm5561_vm10, %v2962_v28, %v2958_v63  ;;  %v2221_v0 = vadd.s32 %v2220_v13, %v2218_v21 }
 0x35d   :  { %v2233_v24 = vadd.s32 %v2232_v38, %v2230_v4  ;;  %v2073_v11 = vpop.xlane.xlu1 %2072 }
 0x35e   :  { %v2967_v49 = vrot.slane %v2221_v0, %v4347_v58  ;;  %v2075_v15 = vcvt.f32.s32 %v2073_v11  ;;  %v2085_v50 = vpop.xlane.xlu0 %2084 }
 0x35f   :  { %v2972_v8 = vrot.slane %v2233_v24, %v4365_v36  ;;  %v2087_v63 = vcvt.f32.s32 %v2085_v50 }
 0x360   :  { %v2968_v35 = vsel %vm5562_vm2, %v2967_v49, %v2963_v25  ;;  %v2076_v59 = vshll.u32 %v2075_v15, 16 }
 0x361   :  { %v2973_v55 = vsel %vm5563_vm11, %v2972_v8, %v2968_v35  ;;  %v2253_v31 = vpop.xlane.xlu1 %2252  ;;  %v2088_v0 = vshll.u32 %v2087_v63, 16 }
 0x362   :  { %v2077_v62 = vadd.s32 %v2076_v59, %v2074_v47  ;;  %v2265_v1 = vpop.xlane.xlu0 %2264  ;;  %v2255_v22 = vcvt.f32.s32 %v2253_v31 }
 0x363   :  { %v2267_v60 = vcvt.f32.s32 %v2265_v1 }
 0x364   :  { %v2908_v48 = vrot.slane %v2077_v62, %v4392_v30  ;;  %v2256_v38 = vshll.u32 %v2255_v22, 16 }
 0x365   :  { %v2239_v18 = vpop.xlane.xlu1 %2238  ;;  %v2268_v24 = vshll.u32 %v2267_v60, 16 }
 0x366   :  { %v2909_v58 = vsel %vm5564_vm9, %v2908_v48, %v2904_v9  ;;  %v2242_v46 = vcvt.f32.s32 %v2239_v18  ;;  %v2251_v41 = vpop.xlane.xlu0 %2250 }
 0x367   :  { %v2254_v37 = vcvt.f32.s32 %v2251_v41 }
 0x368   :  { %v2245_v36 = vadd.s32 %v2244_v16, %v2242_v46 }
 0x369   :  { %v2097_v19 = vpop.xlane.xlu1 %2096  ;;  %v2257_v11 = vadd.s32 %v2256_v38, %v2254_v37 }
 0x36a   :  { %v2977_v7 = vrot.slane %v2245_v36, %v4375_v43  ;;  %v2083_v2 = vpop.xlane.xlu0 %2082  ;;  %v2099_v13 = vcvt.f32.s32 %v2097_v19 }
 0x36b   :  { %v2086_v28 = vcvt.f32.s32 %v2083_v2  ;;  %v2982_v6 = vrot.slane %v2257_v11, %v4382_v27 }
 0x36c   :  { %v2978_v3 = vsel %vm5565_vm14, %v2977_v7, %v2973_v55  ;;  %v2100_v49 = vshll.u32 %v2099_v13, 16 }
 0x36d   :  { %v2277_v42 = vpop.xlane.xlu1 %2276  ;;  %v2089_v15 = vadd.s32 %v2088_v0, %v2086_v28 }
 0x36e   :  { %v2263_v61 = vpop.xlane.xlu0 %2262  ;;  %v2279_v8 = vcvt.f32.s32 %v2277_v42  ;;  %v2983_v42 = vsel %vm5566_vm4, %v2982_v6, %v2978_v3 }
 0x36f   :  { %v2266_v21 = vcvt.f32.s32 %v2263_v61  ;;  %v2913_v62 = vrot.slane %v2089_v15, %v4407_v44 }
 0x370   :  { %v2280_v1 = vshll.u32 %v2279_v8, 16 }
 0x371   :  { %v2109_v20 = vpop.xlane.xlu1 %2108  ;;  %v2269_v47 = vadd.s32 %v2268_v24, %v2266_v21  ;;  %v2914_v61 = vsel %vm5567_vm1, %v2913_v62, %v2909_v58 }
 0x372   :  { %v2095_v54 = vpop.xlane.xlu0 %2094  ;;  %v2111_v55 = vcvt.f32.s32 %v2109_v20 }
 0x373   :  { %v2098_v4 = vcvt.f32.s32 %v2095_v54  ;;  %v2987_v48 = vrot.slane %v2269_v47, %v4392_v30 }
 0x374   :  { %v2112_v19 = vshll.u32 %v2111_v55, 16 }
 0x375   :  { %v2289_v32 = vpop.xlane.xlu1 %2288  ;;  %v2101_v50 = vadd.s32 %v2100_v49, %v2098_v4  ;;  %v2988_v27 = vsel %vm5568_vm5, %v2987_v48, %v2983_v42 }
 0x376   :  { %v2275_v52 = vpop.xlane.xlu0 %2274  ;;  %v2291_v41 = vcvt.f32.s32 %v2289_v32 }
 0x377   :  { %v2278_v31 = vcvt.f32.s32 %v2275_v52  ;;  %v2918_v46 = vrot.slane %v2101_v50, %v4468_v10 }
 0x378   :  { %v2292_v30 = vshll.u32 %v2291_v41, 16 }
 0x379   :  { %v2121_v12 = vpop.xlane.xlu1 %2120  ;;  %v2281_v7 = vadd.s32 %v2280_v1, %v2278_v31  ;;  %v2919_v52 = vsel %vm2432_vm7, %v2918_v46, %v2914_v61 }
 0x37a   :  { %v2107_v57 = vpop.xlane.xlu0 %2106  ;;  %v2123_v2 = vcvt.f32.s32 %v2121_v12 }
 0x37b   :  { %v2110_v18 = vcvt.f32.s32 %v2107_v57  ;;  %v2992_v63 = vrot.slane %v2281_v7, %v4407_v44 }
 0x37c   :  { %v2124_v60 = vshll.u32 %v2123_v2, 16 }
 0x37d   :  { %v5083_v17 = vpop.xlane.xlu1 %2300  ;;  %v2113_v20 = vadd.s32 %v2112_v19, %v2110_v18  ;;  %v2993_v46 = vsel %vm5569_vm13, %v2992_v63, %v2988_v27 }
 0x37e   :  { %v5085_v9 = vpop.xlane.xlu0 %2286  ;;  %v2303_v57 = vcvt.f32.s32 %v5083_v17 }
 0x37f   :  { %v2290_v12 = vcvt.f32.s32 %v5085_v9  ;;  %v2923_v17 = vrot.slane %v2113_v20, %v4484_v40 }
 0x380   :  { %v2304_v4 = vshll.u32 %v2303_v57, 16 }
 0x381   :  { %v5087_v14 = vpop.xlane.xlu1 %2132  ;;  %v2924_v7 = vsel %vm2439_vm3, %v2923_v17, %v2919_v52 }
 0x382   :  { %v5089_v5 = vpop.xlane.xlu0 %2118  ;;  %v2135_v22 = vcvt.f32.s32 %v5087_v14 }
 0x383   :  { %v2122_v58 = vcvt.f32.s32 %v5089_v5  ;;  %v2293_v5 = vadd.s32 %v2292_v30, %v2290_v12 }
 0x384   :  { %v2136_v9 = vshll.u32 %v2135_v22, 16 }
 0x385   :  { %v5091_v43 = vpop.xlane.xlu1 %2312  ;;  %v2997_v1 = vrot.slane %v2293_v5, %v4468_v10  ;;  %v5573_v5 = vld [vmem:[#allocation8_spill] sm:$0xff] }
 0x386   :  { %v5093_v53 = vpop.xlane.xlu0 %2298  ;;  %v2315_v3 = vcvt.f32.s32 %v5091_v43 }
 0x387   :  { %v2302_v37 = vcvt.f32.s32 %v5093_v53  ;;  %v2998_v27 = vsel %vm2432_vm7, %v2997_v1, %v2993_v46  ;;  %vm5570_vm7 = vcmask 1048512  }
 0x388   :  { %v2316_v11 = vshll.u32 %v2315_v3, 16 }
 0x389   :  { %v5095_v34 = vpop.xlane.xlu1 %2144  ;;  %v2305_v15 = vadd.s32 %v2304_v4, %v2302_v37 }
 0x38a   :  { %v5097_v29 = vpop.xlane.xlu0 %2130  ;;  %v2147_v13 = vcvt.f32.s32 %v5095_v34  ;;  %v2125_v34 = vadd.s32 %v2124_v60, %v2122_v58 }
 0x38b   :  { %v2134_v28 = vcvt.f32.s32 %v5097_v29 }
 0x38c   :  { %v2148_v29 = vshll.u32 %v2147_v13, 16  ;;  %v2928_v41 = vrot.slane %v2125_v34, %v4511_v56 }
 0x38d   :  { %v5099_v33 = vpop.xlane.xlu1 %2324  ;;  %v2137_v8 = vadd.s32 %v2136_v9, %v2134_v28 }
 0x38e   :  { %v5101_v25 = vpop.xlane.xlu0 %2310  ;;  %v2327_v14 = vcvt.f32.s32 %v5099_v33  ;;  %v2929_v52 = vsel %vm2446_vm12, %v2928_v41, %v2924_v7 }
 0x38f   :  { %v2314_v21 = vcvt.f32.s32 %v5101_v25  ;;  %v2933_v2 = vrot.slane %v2137_v8, %v4539_v39 }
 0x390   :  { %v2328_v47 = vshll.u32 %v2327_v14, 16 }
 0x391   :  { %v2157_v35 = vpop.xlane.xlu1 %2156  ;;  %v2317_v50 = vadd.s32 %v2316_v11, %v2314_v21  ;;  %v2934_v12 = vsel %vm2453_vm8, %v2933_v2, %v2929_v52 }
 0x392   :  { %v2143_v59 = vpop.xlane.xlu0 %2142  ;;  %v2159_v44 = vcvt.f32.s32 %v2157_v35 }
 0x393   :  { %v2146_v0 = vcvt.f32.s32 %v2143_v59  ;;  %v3007_v42 = vrot.slane %v2317_v50, %v4511_v56 }
 0x394   :  { %v2160_v33 = vshll.u32 %v2159_v44, 16 }
 0x395   :  { %v2337_v16 = vpop.xlane.xlu1 %2336  ;;  %v2149_v35 = vadd.s32 %v2148_v29, %v2146_v0 }
 0x396   :  { %v2323_v36 = vpop.xlane.xlu0 %2322  ;;  %v2339_v43 = vcvt.f32.s32 %v2337_v16 }
 0x397   :  { %v2326_v53 = vcvt.f32.s32 %v2323_v36  ;;  %v3002_v36 = vrot.slane %v2305_v15, %v4484_v40  ;;  %v2938_v10 = vrot.slane %v2149_v35, %v4548_v51 }
 0x398   :  { %v2340_v31 = vshll.u32 %v2339_v43, 16 }
 0x399   :  { %v2169_v54 = vpop.xlane.xlu1 %2168  ;;  %v2329_v48 = vadd.s32 %v2328_v47, %v2326_v53  ;;  %v3003_v63 = vsel %vm2439_vm3, %v3002_v36, %v2998_v27  ;;  %v2939_v37 = vsel %vm2460_vm0, %v2938_v10, %v2934_v12  ;;  %vm3041_vm3 = vcmask 1047559  }
 0x39a   :  { %v2155_v32 = vpop.xlane.xlu0 %2154  ;;  %v2171_v6 = vcvt.f32.s32 %v2169_v54  ;;  %v3008_v3 = vsel %vm2446_vm12, %v3007_v42, %v3003_v63  ;;  %vm5571_vm12 = vmmov %vm5570_vm7 }
 0x39b   :  { %v2158_v49 = vcvt.f32.s32 %v2155_v32  ;;  %v3012_v22 = vrot.slane %v2329_v48, %v4539_v39 }
 0x39c   :  { %v2172_v54 = vshll.u32 %v2171_v6, 16 }
 0x39d   :  { %v2349_v38 = vpop.xlane.xlu1 %2348  ;;  %v2161_v18 = vadd.s32 %v2160_v33, %v2158_v49  ;;  %v3013_v17 = vsel %vm2453_vm8, %v3012_v22, %v3008_v3 }
 0x39e   :  { %v2361_v24 = vpop.xlane.xlu0 %2360  ;;  %v2351_v55 = vcvt.f32.s32 %v2349_v38 }
 0x39f   :  { %v2363_v30 = vcvt.f32.s32 %v2361_v24  ;;  %v2943_v40 = vrot.slane %v2161_v18, %v4569_v26  ;;  %v5572_v24 = vld [vmem:[#allocation15_spill] sm:$0xff] }
 0x3a0   :  { %v2352_v61 = vshll.u32 %v2351_v55, 16  ;;  %vm2366_vm8 = vcmp.lt.s32.totalorder %v5573_v5, %v5572_v24 }
 0x3a1   :  { %v2335_v25 = vpop.xlane.xlu1 %2334  ;;  %v2364_v13 = vshll.u32 %v2363_v30, 16  ;;  %v2944_v14 = vsel %vm2467_vm15, %v2943_v40, %v2939_v37 }
 0x3a2   :  { %v2338_v62 = vcvt.f32.s32 %v2335_v25  ;;  %v2347_v59 = vpop.xlane.xlu0 %2346 }
 0x3a3   :  { %v2350_v16 = vcvt.f32.s32 %v2347_v59 }
 0x3a4   :  { %v2341_v19 = vadd.s32 %v2340_v31, %v2338_v62 }
 0x3a5   :  { %v2167_v20 = vpop.xlane.xlu1 %2166  ;;  %v2353_v32 = vadd.s32 %v2352_v61, %v2350_v16 }
 0x3a6   :  { %v2170_v57 = vcvt.f32.s32 %v2167_v20  ;;  %v3017_v56 = vrot.slane %v2341_v19, %v4548_v51 }
 0x3a7   :  { %v3022_v21 = vrot.slane %v2353_v32, %v4569_v26 }
 0x3a8   :  { %v2173_v60 = vadd.s32 %v2172_v54, %v2170_v57  ;;  %v3018_v51 = vsel %vm2460_vm0, %v3017_v56, %v3013_v17 }
 0x3a9   :  { %v2359_v58 = vpop.xlane.xlu1 %2358  ;;  %v3023_v0 = vsel %vm2467_vm15, %v3022_v21, %v3018_v51 }
 0x3aa   :  { %v2948_v39 = vrot.slane %v2173_v60, %v4576_v23  ;;  %v2362_v28 = vcvt.f32.s32 %v2359_v58 }
 0x3ac   :  { %v2365_v44 = vadd.s32 %v2364_v13, %v2362_v28  ;;  %v2949_v38 = vsel %vm5570_vm7, %v2948_v39, %v2944_v14 }
 0x3ad   :  { %v3040_v4 = vsel %vm3039_vm6, %v2949_v38, %v5052_v45 }
 0x3ae   :  { %v3027_v9 = vrot.slane %v2365_v44, %v4576_v23 }
 0x3b0   :  { %v3028_v43 = vsel %vm5571_vm12, %v3027_v9, %v3023_v0 }
 0x3b1   :  { %v3042_v26 = vsel %vm3041_vm3, %v3028_v43, %v3040_v4 }
 0x3b2   :  { %v3043_v11 = vsel %vm2366_vm8, %v3042_v26, 4294967295 }
 0x3b3   :  { %3044 = vst [vmem:[#allocation5] sm:$0xff] %v3043_v11 }
 0x3b4   :  { %3218 = shalt.err (!%p3215_p12)
}
 0x3b5   :  { %s3219_s26 = scalar_lea.hbm %s5165_s1, 128 }
 0x3b6   :  { %p3220_p13 = scmp.ne.s32.totalorder %s5165_s1, %s3219_s26  ;;  %p3223_p0 = scmp.lt.u32.totalorder %s3219_s26, %s5165_s1 }
 0x3b8   :  { %p3225_p1 = pnand %p3223_p0, %p3220_p13 }
 0x3ba   :  { %3228 = shalt.err (!%p3225_p1)
}
 0x3bb   :  { %3054 = dma.vmem_to_hbm [thread:$0]  %s3052_s22, 128, %s5165_s1, [#allocation4]  }
 0x3bc   :  { %3231 = dma.done.wait [#allocation4], 128  }
 0x3bd   :  { %3232 = vsyncadd [#allocation4], 4294967168 }
 0x3be   :  { %3062 = vsyncpa [#allocation3], 1 }
 0x3bf   :  { %3063 = vsyncpa [#allocation4], 1 }

</bundles_post_ra>
